<compile_context>
chip_gen: v7x
topology: tpu7x:2x2x1
jax: 0.10.0
libtpu: 0.0.40
codegen_flags: <defaults>
</compile_context>

<pallas_src>
import jax
import jax.numpy as jnp
from jax.experimental import pallas as pl
from jax.experimental.pallas import tpu as pltpu

EPS = 1e-5


def _vmem_limit_bytes():
    """Generation-dependent VMEM cap: ~48 MiB on v7x (64 MiB/TC), ~96 MiB on v5e/v6e."""
    try:
        cap = int(pltpu.get_tpu_info().vmem_capacity_bytes)
    except Exception:
        cap = 64 * 1024 * 1024
    return max(32 * 1024 * 1024, min((cap * 3) // 4, 112 * 1024 * 1024))


# ---------------------------------------------------------------------------
# Kernels
# ---------------------------------------------------------------------------

def _partial_stats(y):
    """Per-channel (sum, sum_sq) of y:(rows, C) via ones-row matmuls (MXU)."""
    ones = jnp.ones((1, y.shape[0]), jnp.float32)
    ssum = jnp.dot(ones, y, preferred_element_type=jnp.float32)        # (1, C)
    ssq = jnp.dot(ones, y * y, preferred_element_type=jnp.float32)     # (1, C)
    return jnp.concatenate([ssum, ssq], axis=0)                        # (2, C)


def _conv1_from_nchw_kernel(x_ref, w_ref, h1_ref, st_ref):
    """pass 1: read one NCHW image, transpose on the idle XLU, conv1 (1x1) on
    the MXU (bf16 in, f32 acc); write h1 bf16 + per-image BN1 partial stats."""
    _, H, W, P = h1_ref.shape
    xt = jnp.transpose(x_ref[0])                                       # (HW, C0) f32
    y = jnp.dot(xt.astype(jnp.bfloat16), w_ref[...],
                preferred_element_type=jnp.float32)                    # (HW, P) f32
    h1_ref[0] = y.reshape(H, W, P).astype(jnp.bfloat16)
    st_ref[0] = _partial_stats(y)


def _bn1_conv3x3_stats_kernel(h1_ref, sc_ref, sh_ref, w_ref, h2_ref, st_ref):
    """pass 2: relu(bn1(h1)) -> 3x3 conv (stride 1, pad 1) as three K=3P im2col
    matmuls (one per filter row, f32 accumulated); write h2 bf16 + BN2 stats."""
    _, H, W, P = h1_ref.shape
    HW = H * W
    # fused BN scale/shift + ReLU in f32, then one cast to bf16 for the MXU
    h = jnp.maximum(h1_ref[0].astype(jnp.float32) * sc_ref[...] + sh_ref[...], 0.0)
    h = h.astype(jnp.bfloat16)                                         # (H, W, P)

    # value-level zero padding (no scratch ref, no partial stores to VMEM refs)
    zr = jnp.zeros((1, W, P), jnp.bfloat16)
    hv = jnp.concatenate([zr, h, zr], axis=0)                          # (H+2, W, P)
    zc = jnp.zeros((H + 2, 1, P), jnp.bfloat16)
    hp = jnp.concatenate([zc, hv, zc], axis=1)                         # (H+2, W+2, P)

    acc = jnp.zeros((HW, P), jnp.float32)
    for dy in range(3):                                                # static unroll
        patch = jnp.concatenate(
            [hp[dy:dy + H, dx:dx + W, :].reshape(HW, P) for dx in range(3)],
            axis=1)                                                    # (HW, 3P) bf16
        acc = acc + jnp.dot(patch, w_ref[dy * 3 * P:(dy + 1) * 3 * P, :],
                            preferred_element_type=jnp.float32)        # (HW, P) f32
    h2_ref[0] = acc.astype(jnp.bfloat16)
    st_ref[0] = _partial_stats(acc)


def _bn2_conv3_stats_kernel(h2_ref, sc_ref, sh_ref, w_ref, st_ref):
    """pass 3 (stats only): relu(bn2(h2)) @ w3; emit per-image BN3 partial
    stats. conv3's wide output is never written to HBM -- pass 4 recomputes it
    from the 4x-smaller h2."""
    h = jnp.maximum(h2_ref[0].astype(jnp.float32) * sc_ref[...] + sh_ref[...], 0.0)
    y = jnp.dot(h.astype(jnp.bfloat16), w_ref[...],
                preferred_element_type=jnp.float32)                    # (HW, C0)
    st_ref[0] = _partial_stats(y)


def _bn2_conv3_bn3_residual_kernel(h2_ref, sc2_ref, sh2_ref, w_ref,
                                   sc3_ref, sh3_ref, x_ref, o_ref):
    """pass 4: recompute conv3 from h2, apply bn3, transpose on the XLU, add
    the NCHW residual, relu, and write the NCHW output directly."""
    h = jnp.maximum(h2_ref[0].astype(jnp.float32) * sc2_ref[...] + sh2_ref[...], 0.0)
    y = jnp.dot(h.astype(jnp.bfloat16), w_ref[...],
                preferred_element_type=jnp.float32)                    # (HW, C0)
    z = y * sc3_ref[...] + sh3_ref[...]                                # (HW, C0) f32
    o_ref[0] = jnp.maximum(jnp.transpose(z) + x_ref[0], 0.0)           # (C0, HW)


# ---------------------------------------------------------------------------
# Wrapper
# ---------------------------------------------------------------------------

def _stats_to_affine(partial_stats, gamma, beta, count):
    """Reduce per-image (sum, sum_sq) and fold BN into (scale, shift)."""
    s = jnp.sum(partial_stats, axis=0)                 # (2, C)
    mu = s[0] / count
    var = s[1] / count - mu * mu                       # biased variance
    # TODO(synk): E[x^2]-E[x]^2 can cancel for |mean|>>std channels; use a
    # centered second pass if tighter BN accuracy is ever required.
    scale = gamma * jax.lax.rsqrt(var + EPS)           # (1, C)
    shift = beta - mu.reshape(1, -1) * scale           # (1, C)
    return scale, shift


def bottleneck_forward(x_nchw, params):
    """x_nchw: (N, C0, H, W) float32; params in kernel layout (see init_params)."""
    N, C0, H, W = x_nchw.shape
    P = params["w1"].shape[1]
    HW = H * W
    M = N * HW

    x = x_nchw.reshape(N, C0, HW).astype(jnp.float32)  # metadata-only reshape

    w1 = params["w1"].astype(jnp.bfloat16)             # (C0, P)
    w2 = params["w2"].astype(jnp.bfloat16)             # (9P, P) im2col (dy,dx,cin)
    w3 = params["w3"].astype(jnp.bfloat16)             # (P, C0)

    cparams = pltpu.CompilerParams(
        dimension_semantics=("parallel",),
        vmem_limit_bytes=_vmem_limit_bytes(),
    )
    # TODO(synk): for very large H*W on v7x (64 MiB VMEM), pass 2 should be
    # tiled over row bands with a 1-row halo instead of whole images.

    # ---- pass 1: NCHW read + transpose + conv1 (1x1) + BN1 partial stats ---
    h1, st1 = pl.pallas_call(
        _conv1_from_nchw_kernel,
        grid=(N,),
        in_specs=[
            pl.BlockSpec((1, C0, HW), lambda n: (n, 0, 0)),
            pl.BlockSpec((C0, P), lambda n: (0, 0)),
        ],
        out_specs=(
            pl.BlockSpec((1, H, W, P), lambda n: (n, 0, 0, 0)),
            pl.BlockSpec((1, 2, P), lambda n: (n, 0, 0)),
        ),
        out_shape=(
            jax.ShapeDtypeStruct((N, H, W, P), jnp.bfloat16),
            jax.ShapeDtypeStruct((N, 2, P), jnp.float32),
        ),
        compiler_params=cparams,
        cost_estimate=pl.CostEstimate(
            flops=2 * M * C0 * P, transcendentals=0,
            bytes_accessed=M * C0 * 4 + M * P * 2 + C0 * P * 2 + N * 2 * P * 4),
    )(x, w1)
    sc1, sh1 = _stats_to_affine(st1, params["g1"], params["b1"], M)

    # ---- pass 2: bn1+relu -> conv2 (3x3 im2col) + BN2 partial stats --------
    h2, st2 = pl.pallas_call(
        _bn1_conv3x3_stats_kernel,
        grid=(N,),
        in_specs=[
            pl.BlockSpec((1, H, W, P), lambda n: (n, 0, 0, 0)),
            pl.BlockSpec((1, P), lambda n: (0, 0)),
            pl.BlockSpec((1, P), lambda n: (0, 0)),
            pl.BlockSpec((9 * P, P), lambda n: (0, 0)),
        ],
        out_specs=(
            pl.BlockSpec((1, HW, P), lambda n: (n, 0, 0)),
            pl.BlockSpec((1, 2, P), lambda n: (n, 0, 0)),
        ),
        out_shape=(
            jax.ShapeDtypeStruct((N, HW, P), jnp.bfloat16),
            jax.ShapeDtypeStruct((N, 2, P), jnp.float32),
        ),
        compiler_params=cparams,
        cost_estimate=pl.CostEstimate(
            flops=2 * M * 9 * P * P, transcendentals=0,
            bytes_accessed=2 * M * P * 2 + 9 * P * P * 2 + N * 2 * P * 4),
    )(h1, sc1, sh1, w2)
    sc2, sh2 = _stats_to_affine(st2, params["g2"], params["b2"], M)

    # ---- pass 3 (stats only): bn2+relu -> conv3 -> BN3 partial stats -------
    st3 = pl.pallas_call(
        _bn2_conv3_stats_kernel,
        grid=(N,),
        in_specs=[
            pl.BlockSpec((1, HW, P), lambda n: (n, 0, 0)),
            pl.BlockSpec((1, P), lambda n: (0, 0)),
            pl.BlockSpec((1, P), lambda n: (0, 0)),
            pl.BlockSpec((P, C0), lambda n: (0, 0)),
        ],
        out_specs=pl.BlockSpec((1, 2, C0), lambda n: (n, 0, 0)),
        out_shape=jax.ShapeDtypeStruct((N, 2, C0), jnp.float32),
        compiler_params=cparams,
        cost_estimate=pl.CostEstimate(
            flops=2 * M * P * C0, transcendentals=0,
            bytes_accessed=M * P * 2 + P * C0 * 2 + N * 2 * C0 * 4),
    )(h2, sc2, sh2, w3)
    sc3, sh3 = _stats_to_affine(st3, params["g3"], params["b3"], M)

    # ---- pass 4: recompute conv3, bn3 + residual + relu, NCHW write --------
    out = pl.pallas_call(
        _bn2_conv3_bn3_residual_kernel,
        grid=(N,),
        in_specs=[
            pl.BlockSpec((1, HW, P), lambda n: (n, 0, 0)),
            pl.BlockSpec((1, P), lambda n: (0, 0)),
            pl.BlockSpec((1, P), lambda n: (0, 0)),
            pl.BlockSpec((P, C0), lambda n: (0, 0)),
            pl.BlockSpec((1, C0), lambda n: (0, 0)),
            pl.BlockSpec((1, C0), lambda n: (0, 0)),
            pl.BlockSpec((1, C0, HW), lambda n: (n, 0, 0)),
        ],
        out_specs=pl.BlockSpec((1, C0, HW), lambda n: (n, 0, 0)),
        out_shape=jax.ShapeDtypeStruct((N, C0, HW), jnp.float32),
        compiler_params=cparams,
        cost_estimate=pl.CostEstimate(
            flops=2 * M * P * C0, transcendentals=0,
            bytes_accessed=M * P * 2 + 2 * M * C0 * 4 + P * C0 * 2),
    )(h2, sc2, sh2, w3, sc3, sh3, x)

    return out.reshape(N, C0, H, W)                    # metadata-only reshape


# ---------------------------------------------------------------------------
# Params / reference
# ---------------------------------------------------------------------------

def init_params(key, inplanes, planes):
    """Deterministic synthetic params. Conv weights generated in PyTorch
    (out, in, kh, kw) layout, then converted to the kernels' matmul layouts."""
    assert inplanes == planes * 4, "downsample=None path requires inplanes == 4*planes"
    ks = jax.random.split(key, 9)
    w1_t = 0.1 * jax.random.normal(ks[0], (planes, inplanes, 1, 1), jnp.float32)
    w2_t = 0.1 * jax.random.normal(ks[1], (planes, planes, 3, 3), jnp.float32)
    w3_t = 0.1 * jax.random.normal(ks[2], (planes * 4, planes, 1, 1), jnp.float32)
    return {
        # (Cin, Cout) for 1x1 convs
        "w1": jnp.transpose(w1_t[:, :, 0, 0], (1, 0)),
        # im2col layout (kh*kw*Cin, Cout), row order (dy, dx, cin)
        "w2": jnp.transpose(w2_t, (2, 3, 1, 0)).reshape(9 * planes, planes),
        "w3": jnp.transpose(w3_t[:, :, 0, 0], (1, 0)),
        "g1": 1.0 + 0.1 * jax.random.normal(ks[3], (1, planes), jnp.float32),
        "b1": 0.1 * jax.random.normal(ks[4], (1, planes), jnp.float32),
        "g2": 1.0 + 0.1 * jax.random.normal(ks[5], (1, planes), jnp.float32),
        "b2": 0.1 * jax.random.normal(ks[6], (1, planes), jnp.float32),
        "g3": 1.0 + 0.1 * jax.random.normal(ks[7], (1, planes * 4), jnp.float32),
        "b3": 0.1 * jax.random.normal(ks[8], (1, planes * 4), jnp.float32),
    }


def reference_forward(x_nchw, params):
    """Pure-JAX f32 reference (exact PyTorch training-mode math)."""
    x = jnp.transpose(x_nchw, (0, 2, 3, 1))
    N, H, W, C0 = x.shape
    P = params["w1"].shape[1]

    def bn(y, g, b, relu):
        mu = jnp.mean(y, axis=(0, 1, 2), keepdims=True)
        var = jnp.mean((y - mu) ** 2, axis=(0, 1, 2), keepdims=True)
        o = (y - mu) * jax.lax.rsqrt(var + EPS) * g.reshape(1, 1, 1, -1) + b.reshape(1, 1, 1, -1)
        return jnp.maximum(o, 0.0) if relu else o

    h1 = bn(jnp.einsum("nhwc,cp->nhwp", x, params["w1"]), params["g1"], params["b1"], True)
    pad = jnp.pad(h1, ((0, 0), (1, 1), (1, 1), (0, 0)))
    w2 = params["w2"].reshape(3, 3, P, P)
    acc = jnp.zeros((N, H, W, P), jnp.float32)
    for dy in range(3):
        for dx in range(3):
            acc = acc + jnp.einsum("nhwp,pq->nhwq",
                                   pad[:, dy:dy + H, dx:dx + W, :], w2[dy, dx])
    h2 = bn(acc, params["g2"], params["b2"], True)
    h3 = bn(jnp.einsum("nhwp,pq->nhwq", h2, params["w3"]), params["g3"], params["b3"], False)
    out = jnp.maximum(h3 + x, 0.0)
    return jnp.transpose(out, (0, 3, 1, 2))


if __name__ == "__main__":
    key = jax.random.PRNGKey(0)
    k_x, k_p = jax.random.split(key)

    N, planes, HW = 2, 8, 16
    inplanes = planes * 4                        # required for downsample=None
    x = jax.random.normal(k_x, (N, inplanes, HW, HW), jnp.float32)
    params = init_params(k_p, inplanes, planes)

    out = jax.block_until_ready(jax.jit(bottleneck_forward)(x, params))
    ref = reference_forward(x, params)

    assert out.shape == (N, inplanes, HW, HW)
    # Tolerance covers bf16 matmul inputs + bf16-stored intermediates (f32
    # accumulation and f32 BN stats) vs the f32 reference.
    assert jnp.allclose(out, ref, atol=6e-2, rtol=6e-2), (
        f"mismatch vs reference, max abs err {float(jnp.max(jnp.abs(out - ref)))}")
    print("KERNEL_OK")
</pallas_src>

<mosaic_0001>
module attributes {stable_mosaic.version = 11 : i64} {
  func.func @_conv1_from_nchw_kernel(%arg0: i32, %arg1: memref<1x32x256xf32, #tpu.memory_space<vmem>>, %arg2: memref<32x8xbf16, #tpu.memory_space<vmem>>, %arg3: memref<1x16x16x8xbf16, #tpu.memory_space<vmem>>, %arg4: memref<1x2x8xf32, #tpu.memory_space<vmem>>) attributes {dimension_semantics = [#tpu.dimension_semantics<parallel>], iteration_bounds = array<i64: 2>, scalar_prefetch = 0 : i64, scratch_operands = 0 : i64, tpu.core_type = #tpu.core_type<tc>, window_params = [{transform_indices = @transform_0, window_bounds = array<i64: 1, 32, 256>}, {pipeline_mode = #tpu.pipeline_mode<synchronous>, transform_indices = @transform_1, window_bounds = array<i64: 32, 8>}, {transform_indices = @transform_2, window_bounds = array<i64: 1, 16, 16, 8>}, {transform_indices = @transform_3, window_bounds = array<i64: 1, 2, 8>}]} {
    %c0 = arith.constant 0 : index
    %c0_0 = arith.constant 0 : index
    %c0_1 = arith.constant 0 : index
    %0 = vector.load %arg1[%c0, %c0_0, %c0_1] : memref<1x32x256xf32, #tpu.memory_space<vmem>>, vector<1x32x256xf32>
    %1 = vector.shape_cast %0 : vector<1x32x256xf32> to vector<32x256xf32>
    %2 = tpu.transpose %1, [1, 0] : vector<32x256xf32> -> vector<256x32xf32>
    %3 = arith.truncf %2 : vector<256x32xf32> to vector<256x32xbf16>
    %c0_2 = arith.constant 0 : index
    %c0_3 = arith.constant 0 : index
    %4 = vector.load %arg2[%c0_2, %c0_3] : memref<32x8xbf16, #tpu.memory_space<vmem>>, vector<32x8xbf16>
    %cst = arith.constant dense<0.000000e+00> : vector<256x8xf32>
    %5 = tpu.matmul %3, %4, %cst {dimension_numbers = #tpu.dot_dimension_numbers<[1], [0], [0], [1], [0, 0, 1, 1], [], []>} : vector<256x32xbf16>, vector<32x8xbf16>, vector<256x8xf32> -> vector<256x8xf32>
    %6 = vector.shape_cast %5 : vector<256x8xf32> to vector<16x16x8xf32>
    %7 = arith.truncf %6 : vector<16x16x8xf32> to vector<16x16x8xbf16>
    %c0_4 = arith.constant 0 : index
    %c0_5 = arith.constant 0 : index
    %c0_6 = arith.constant 0 : index
    %c0_7 = arith.constant 0 : index
    %8 = vector.load %arg3[%c0_4, %c0_5, %c0_6, %c0_7] : memref<1x16x16x8xbf16, #tpu.memory_space<vmem>>, vector<1x16x16x8xbf16>
    %9 = vector.shape_cast %8 : vector<1x16x16x8xbf16> to vector<16x16x8xbf16>
    %10 = vector.shape_cast %7 : vector<16x16x8xbf16> to vector<1x16x16x8xbf16>
    tpu.vector_store %arg3[%c0_4, %c0_5, %c0_6, %c0_7], %10 {strides = array<i32>} : memref<1x16x16x8xbf16, #tpu.memory_space<vmem>>, vector<1x16x16x8xbf16>,
    %cst_8 = arith.constant 1.000000e+00 : f32
    %11 = vector.broadcast %cst_8 : f32 to vector<1x256xf32>
    %cst_9 = arith.constant dense<0.000000e+00> : vector<1x8xf32>
    %12 = tpu.matmul %11, %5, %cst_9 {dimension_numbers = #tpu.dot_dimension_numbers<[1], [0], [0], [1], [0, 0, 1, 1], [], []>} : vector<1x256xf32>, vector<256x8xf32>, vector<1x8xf32> -> vector<1x8xf32>
    %13 = arith.mulf %5, %5 : vector<256x8xf32>
    %cst_10 = arith.constant dense<0.000000e+00> : vector<1x8xf32>
    %14 = tpu.matmul %11, %13, %cst_10 {dimension_numbers = #tpu.dot_dimension_numbers<[1], [0], [0], [1], [0, 0, 1, 1], [], []>} : vector<1x256xf32>, vector<256x8xf32>, vector<1x8xf32> -> vector<1x8xf32>
    %15 = tpu.concatenate %12, %14 in 0 : vector<1x8xf32>, vector<1x8xf32> -> vector<2x8xf32>
    %c0_11 = arith.constant 0 : index
    %c0_12 = arith.constant 0 : index
    %c0_13 = arith.constant 0 : index
    %16 = vector.load %arg4[%c0_11, %c0_12, %c0_13] : memref<1x2x8xf32, #tpu.memory_space<vmem>>, vector<1x2x8xf32>
    %17 = vector.shape_cast %16 : vector<1x2x8xf32> to vector<2x8xf32>
    %18 = vector.shape_cast %15 : vector<2x8xf32> to vector<1x2x8xf32>
    tpu.vector_store %arg4[%c0_11, %c0_12, %c0_13], %18 {strides = array<i32>} : memref<1x2x8xf32, #tpu.memory_space<vmem>>, vector<1x2x8xf32>,
    return
  }
  func.func @transform_0(%arg0: i32) -> (i32, i32, i32) {
    %c0_i32 = arith.constant 0 : i32
    %c0_i32_0 = arith.constant 0 : i32
    %c0_i32_1 = arith.constant 0 : i32
    return %arg0, %c0_i32, %c0_i32_0 : i32, i32, i32
  }
  func.func @transform_1(%arg0: i32) -> (i32, i32) {
    %c0_i32 = arith.constant 0 : i32
    %c0_i32_0 = arith.constant 0 : i32
    %c0_i32_1 = arith.constant 0 : i32
    return %c0_i32, %c0_i32_0 : i32, i32
  }
  func.func @transform_2(%arg0: i32) -> (i32, i32, i32, i32) {
    %c0_i32 = arith.constant 0 : i32
    %c0_i32_0 = arith.constant 0 : i32
    %c0_i32_1 = arith.constant 0 : i32
    %c0_i32_2 = arith.constant 0 : i32
    return %arg0, %c0_i32, %c0_i32_0, %c0_i32_1 : i32, i32, i32, i32
  }
  func.func @transform_3(%arg0: i32) -> (i32, i32, i32) {
    %c0_i32 = arith.constant 0 : i32
    %c0_i32_0 = arith.constant 0 : i32
    %c0_i32_1 = arith.constant 0 : i32
    return %arg0, %c0_i32, %c0_i32_0 : i32, i32, i32
  }
}

module attributes {stable_mosaic.version = 11 : i64} {
  func.func @_bn1_conv3x3_stats_kernel(%arg0: i32, %arg1: memref<1x16x16x8xbf16, #tpu.memory_space<vmem>>, %arg2: memref<1x8xf32, #tpu.memory_space<vmem>>, %arg3: memref<1x8xf32, #tpu.memory_space<vmem>>, %arg4: memref<72x8xbf16, #tpu.memory_space<vmem>>, %arg5: memref<1x256x8xbf16, #tpu.memory_space<vmem>>, %arg6: memref<1x2x8xf32, #tpu.memory_space<vmem>>) attributes {dimension_semantics = [#tpu.dimension_semantics<parallel>], iteration_bounds = array<i64: 2>, scalar_prefetch = 0 : i64, scratch_operands = 0 : i64, tpu.core_type = #tpu.core_type<tc>, window_params = [{transform_indices = @transform_0, window_bounds = array<i64: 1, 16, 16, 8>}, {pipeline_mode = #tpu.pipeline_mode<synchronous>, transform_indices = @transform_1, window_bounds = array<i64: 1, 8>}, {pipeline_mode = #tpu.pipeline_mode<synchronous>, transform_indices = @transform_2, window_bounds = array<i64: 1, 8>}, {pipeline_mode = #tpu.pipeline_mode<synchronous>, transform_indices = @transform_3, window_bounds = array<i64: 72, 8>}, {transform_indices = @transform_4, window_bounds = array<i64: 1, 256, 8>}, {transform_indices = @transform_5, window_bounds = array<i64: 1, 2, 8>}]} {
    %c0 = arith.constant 0 : index
    %c0_0 = arith.constant 0 : index
    %c0_1 = arith.constant 0 : index
    %c0_2 = arith.constant 0 : index
    %0 = vector.load %arg1[%c0, %c0_0, %c0_1, %c0_2] : memref<1x16x16x8xbf16, #tpu.memory_space<vmem>>, vector<1x16x16x8xbf16>
    %1 = vector.shape_cast %0 : vector<1x16x16x8xbf16> to vector<16x16x8xbf16>
    %2 = arith.extf %1 : vector<16x16x8xbf16> to vector<16x16x8xf32>
    %c0_3 = arith.constant 0 : index
    %c0_4 = arith.constant 0 : index
    %3 = vector.load %arg2[%c0_3, %c0_4] : memref<1x8xf32, #tpu.memory_space<vmem>>, vector<1x8xf32>
    %4 = vector.shape_cast %3 : vector<1x8xf32> to vector<1x1x8xf32>
    %5 = vector.broadcast %4 : vector<1x1x8xf32> to vector<16x16x8xf32>
    %6 = arith.mulf %2, %5 : vector<16x16x8xf32>
    %c0_5 = arith.constant 0 : index
    %c0_6 = arith.constant 0 : index
    %7 = vector.load %arg3[%c0_5, %c0_6] : memref<1x8xf32, #tpu.memory_space<vmem>>, vector<1x8xf32>
    %8 = vector.shape_cast %7 : vector<1x8xf32> to vector<1x1x8xf32>
    %9 = vector.broadcast %8 : vector<1x1x8xf32> to vector<16x16x8xf32>
    %10 = arith.addf %6, %9 : vector<16x16x8xf32>
    %cst = arith.constant 0.000000e+00 : f32
    %11 = vector.broadcast %cst : f32 to vector<16x16x8xf32>
    %12 = arith.maximumf %10, %11 : vector<16x16x8xf32>
    %13 = arith.truncf %12 : vector<16x16x8xf32> to vector<16x16x8xbf16>
    %cst_7 = arith.constant 0.000000e+00 : bf16
    %14 = vector.broadcast %cst_7 : bf16 to vector<1x16x8xbf16>
    %15 = tpu.concatenate %14, %13, %14 in 0 : vector<1x16x8xbf16>, vector<16x16x8xbf16>, vector<1x16x8xbf16> -> vector<18x16x8xbf16>
    %cst_8 = arith.constant 0.000000e+00 : bf16
    %16 = vector.broadcast %cst_8 : bf16 to vector<18x1x8xbf16>
    %17 = tpu.concatenate %16, %15, %16 in 1 : vector<18x1x8xbf16>, vector<18x16x8xbf16>, vector<18x1x8xbf16> -> vector<18x18x8xbf16>
    %cst_9 = arith.constant 0.000000e+00 : f32
    %18 = vector.broadcast %cst_9 : f32 to vector<256x8xf32>
    %19 = vector.extract_strided_slice %17 {offsets = [0, 0, 0], sizes = [16, 16, 8], strides = [1, 1, 1]} : vector<18x18x8xbf16> to vector<16x16x8xbf16>
    %20 = vector.shape_cast %19 : vector<16x16x8xbf16> to vector<256x8xbf16>
    %21 = vector.extract_strided_slice %17 {offsets = [0, 1, 0], sizes = [16, 16, 8], strides = [1, 1, 1]} : vector<18x18x8xbf16> to vector<16x16x8xbf16>
    %22 = vector.shape_cast %21 : vector<16x16x8xbf16> to vector<256x8xbf16>
    %23 = vector.extract_strided_slice %17 {offsets = [0, 2, 0], sizes = [16, 16, 8], strides = [1, 1, 1]} : vector<18x18x8xbf16> to vector<16x16x8xbf16>
    %24 = vector.shape_cast %23 : vector<16x16x8xbf16> to vector<256x8xbf16>
    %25 = tpu.concatenate %20, %22, %24 in 1 : vector<256x8xbf16>, vector<256x8xbf16>, vector<256x8xbf16> -> vector<256x24xbf16>
    %c0_10 = arith.constant 0 : index
    %c0_11 = arith.constant 0 : index
    %26 = vector.load %arg4[%c0_10, %c0_11] : memref<72x8xbf16, #tpu.memory_space<vmem>>, vector<24x8xbf16>
    %cst_12 = arith.constant dense<0.000000e+00> : vector<256x8xf32>
    %27 = tpu.matmul %25, %26, %cst_12 {dimension_numbers = #tpu.dot_dimension_numbers<[1], [0], [0], [1], [0, 0, 1, 1], [], []>} : vector<256x24xbf16>, vector<24x8xbf16>, vector<256x8xf32> -> vector<256x8xf32>
    %28 = arith.addf %18, %27 : vector<256x8xf32>
    %29 = vector.extract_strided_slice %17 {offsets = [1, 0, 0], sizes = [16, 16, 8], strides = [1, 1, 1]} : vector<18x18x8xbf16> to vector<16x16x8xbf16>
    %30 = vector.shape_cast %29 : vector<16x16x8xbf16> to vector<256x8xbf16>
    %31 = vector.extract_strided_slice %17 {offsets = [1, 1, 0], sizes = [16, 16, 8], strides = [1, 1, 1]} : vector<18x18x8xbf16> to vector<16x16x8xbf16>
    %32 = vector.shape_cast %31 : vector<16x16x8xbf16> to vector<256x8xbf16>
    %33 = vector.extract_strided_slice %17 {offsets = [1, 2, 0], sizes = [16, 16, 8], strides = [1, 1, 1]} : vector<18x18x8xbf16> to vector<16x16x8xbf16>
    %34 = vector.shape_cast %33 : vector<16x16x8xbf16> to vector<256x8xbf16>
    %35 = tpu.concatenate %30, %32, %34 in 1 : vector<256x8xbf16>, vector<256x8xbf16>, vector<256x8xbf16> -> vector<256x24xbf16>
    %c24 = arith.constant 24 : index
    %c0_13 = arith.constant 0 : index
    %36 = vector.load %arg4[%c24, %c0_13] : memref<72x8xbf16, #tpu.memory_space<vmem>>, vector<24x8xbf16>
    %cst_14 = arith.constant dense<0.000000e+00> : vector<256x8xf32>
    %37 = tpu.matmul %35, %36, %cst_14 {dimension_numbers = #tpu.dot_dimension_numbers<[1], [0], [0], [1], [0, 0, 1, 1], [], []>} : vector<256x24xbf16>, vector<24x8xbf16>, vector<256x8xf32> -> vector<256x8xf32>
    %38 = arith.addf %28, %37 : vector<256x8xf32>
    %39 = vector.extract_strided_slice %17 {offsets = [2, 0, 0], sizes = [16, 16, 8], strides = [1, 1, 1]} : vector<18x18x8xbf16> to vector<16x16x8xbf16>
    %40 = vector.shape_cast %39 : vector<16x16x8xbf16> to vector<256x8xbf16>
    %41 = vector.extract_strided_slice %17 {offsets = [2, 1, 0], sizes = [16, 16, 8], strides = [1, 1, 1]} : vector<18x18x8xbf16> to vector<16x16x8xbf16>
    %42 = vector.shape_cast %41 : vector<16x16x8xbf16> to vector<256x8xbf16>
    %43 = vector.extract_strided_slice %17 {offsets = [2, 2, 0], sizes = [16, 16, 8], strides = [1, 1, 1]} : vector<18x18x8xbf16> to vector<16x16x8xbf16>
    %44 = vector.shape_cast %43 : vector<16x16x8xbf16> to vector<256x8xbf16>
    %45 = tpu.concatenate %40, %42, %44 in 1 : vector<256x8xbf16>, vector<256x8xbf16>, vector<256x8xbf16> -> vector<256x24xbf16>
    %c48 = arith.constant 48 : index
    %c0_15 = arith.constant 0 : index
    %46 = vector.load %arg4[%c48, %c0_15] : memref<72x8xbf16, #tpu.memory_space<vmem>>, vector<24x8xbf16>
    %cst_16 = arith.constant dense<0.000000e+00> : vector<256x8xf32>
    %47 = tpu.matmul %45, %46, %cst_16 {dimension_numbers = #tpu.dot_dimension_numbers<[1], [0], [0], [1], [0, 0, 1, 1], [], []>} : vector<256x24xbf16>, vector<24x8xbf16>, vector<256x8xf32> -> vector<256x8xf32>
    %48 = arith.addf %38, %47 : vector<256x8xf32>
    %49 = arith.truncf %48 : vector<256x8xf32> to vector<256x8xbf16>
    %c0_17 = arith.constant 0 : index
    %c0_18 = arith.constant 0 : index
    %c0_19 = arith.constant 0 : index
    %50 = vector.load %arg5[%c0_17, %c0_18, %c0_19] : memref<1x256x8xbf16, #tpu.memory_space<vmem>>, vector<1x256x8xbf16>
    %51 = vector.shape_cast %50 : vector<1x256x8xbf16> to vector<256x8xbf16>
    %52 = vector.shape_cast %49 : vector<256x8xbf16> to vector<1x256x8xbf16>
    tpu.vector_store %arg5[%c0_17, %c0_18, %c0_19], %52 {strides = array<i32>} : memref<1x256x8xbf16, #tpu.memory_space<vmem>>, vector<1x256x8xbf16>,
    %cst_20 = arith.constant 1.000000e+00 : f32
    %53 = vector.broadcast %cst_20 : f32 to vector<1x256xf32>
    %cst_21 = arith.constant dense<0.000000e+00> : vector<1x8xf32>
    %54 = tpu.matmul %53, %48, %cst_21 {dimension_numbers = #tpu.dot_dimension_numbers<[1], [0], [0], [1], [0, 0, 1, 1], [], []>} : vector<1x256xf32>, vector<256x8xf32>, vector<1x8xf32> -> vector<1x8xf32>
    %55 = arith.mulf %48, %48 : vector<256x8xf32>
    %cst_22 = arith.constant dense<0.000000e+00> : vector<1x8xf32>
    %56 = tpu.matmul %53, %55, %cst_22 {dimension_numbers = #tpu.dot_dimension_numbers<[1], [0], [0], [1], [0, 0, 1, 1], [], []>} : vector<1x256xf32>, vector<256x8xf32>, vector<1x8xf32> -> vector<1x8xf32>
    %57 = tpu.concatenate %54, %56 in 0 : vector<1x8xf32>, vector<1x8xf32> -> vector<2x8xf32>
    %c0_23 = arith.constant 0 : index
    %c0_24 = arith.constant 0 : index
    %c0_25 = arith.constant 0 : index
    %58 = vector.load %arg6[%c0_23, %c0_24, %c0_25] : memref<1x2x8xf32, #tpu.memory_space<vmem>>, vector<1x2x8xf32>
    %59 = vector.shape_cast %58 : vector<1x2x8xf32> to vector<2x8xf32>
    %60 = vector.shape_cast %57 : vector<2x8xf32> to vector<1x2x8xf32>
    tpu.vector_store %arg6[%c0_23, %c0_24, %c0_25], %60 {strides = array<i32>} : memref<1x2x8xf32, #tpu.memory_space<vmem>>, vector<1x2x8xf32>,
    return
  }
  func.func @transform_0(%arg0: i32) -> (i32, i32, i32, i32) {
    %c0_i32 = arith.constant 0 : i32
    %c0_i32_0 = arith.constant 0 : i32
    %c0_i32_1 = arith.constant 0 : i32
    %c0_i32_2 = arith.constant 0 : i32
    return %arg0, %c0_i32, %c0_i32_0, %c0_i32_1 : i32, i32, i32, i32
  }
  func.func @transform_1(%arg0: i32) -> (i32, i32) {
    %c0_i32 = arith.constant 0 : i32
    %c0_i32_0 = arith.constant 0 : i32
    %c0_i32_1 = arith.constant 0 : i32
    return %c0_i32, %c0_i32_0 : i32, i32
  }
  func.func @transform_2(%arg0: i32) -> (i32, i32) {
    %c0_i32 = arith.constant 0 : i32
    %c0_i32_0 = arith.constant 0 : i32
    %c0_i32_1 = arith.constant 0 : i32
    return %c0_i32, %c0_i32_0 : i32, i32
  }
  func.func @transform_3(%arg0: i32) -> (i32, i32) {
    %c0_i32 = arith.constant 0 : i32
    %c0_i32_0 = arith.constant 0 : i32
    %c0_i32_1 = arith.constant 0 : i32
    return %c0_i32, %c0_i32_0 : i32, i32
  }
  func.func @transform_4(%arg0: i32) -> (i32, i32, i32) {
    %c0_i32 = arith.constant 0 : i32
    %c0_i32_0 = arith.constant 0 : i32
    %c0_i32_1 = arith.constant 0 : i32
    return %arg0, %c0_i32, %c0_i32_0 : i32, i32, i32
  }
  func.func @transform_5(%arg0: i32) -> (i32, i32, i32) {
    %c0_i32 = arith.constant 0 : i32
    %c0_i32_0 = arith.constant 0 : i32
    %c0_i32_1 = arith.constant 0 : i32
    return %arg0, %c0_i32, %c0_i32_0 : i32, i32, i32
  }
}

module attributes {stable_mosaic.version = 11 : i64} {
  func.func @_bn2_conv3_stats_kernel(%arg0: i32, %arg1: memref<1x256x8xbf16, #tpu.memory_space<vmem>>, %arg2: memref<1x8xf32, #tpu.memory_space<vmem>>, %arg3: memref<1x8xf32, #tpu.memory_space<vmem>>, %arg4: memref<8x32xbf16, #tpu.memory_space<vmem>>, %arg5: memref<1x2x32xf32, #tpu.memory_space<vmem>>) attributes {dimension_semantics = [#tpu.dimension_semantics<parallel>], iteration_bounds = array<i64: 2>, scalar_prefetch = 0 : i64, scratch_operands = 0 : i64, tpu.core_type = #tpu.core_type<tc>, window_params = [{transform_indices = @transform_0, window_bounds = array<i64: 1, 256, 8>}, {pipeline_mode = #tpu.pipeline_mode<synchronous>, transform_indices = @transform_1, window_bounds = array<i64: 1, 8>}, {pipeline_mode = #tpu.pipeline_mode<synchronous>, transform_indices = @transform_2, window_bounds = array<i64: 1, 8>}, {pipeline_mode = #tpu.pipeline_mode<synchronous>, transform_indices = @transform_3, window_bounds = array<i64: 8, 32>}, {transform_indices = @transform_4, window_bounds = array<i64: 1, 2, 32>}]} {
    %c0 = arith.constant 0 : index
    %c0_0 = arith.constant 0 : index
    %c0_1 = arith.constant 0 : index
    %0 = vector.load %arg1[%c0, %c0_0, %c0_1] : memref<1x256x8xbf16, #tpu.memory_space<vmem>>, vector<1x256x8xbf16>
    %1 = vector.shape_cast %0 : vector<1x256x8xbf16> to vector<256x8xbf16>
    %2 = arith.extf %1 : vector<256x8xbf16> to vector<256x8xf32>
    %c0_2 = arith.constant 0 : index
    %c0_3 = arith.constant 0 : index
    %3 = vector.load %arg2[%c0_2, %c0_3] : memref<1x8xf32, #tpu.memory_space<vmem>>, vector<1x8xf32>
    %4 = vector.broadcast %3 : vector<1x8xf32> to vector<256x8xf32>
    %5 = arith.mulf %2, %4 : vector<256x8xf32>
    %c0_4 = arith.constant 0 : index
    %c0_5 = arith.constant 0 : index
    %6 = vector.load %arg3[%c0_4, %c0_5] : memref<1x8xf32, #tpu.memory_space<vmem>>, vector<1x8xf32>
    %7 = vector.broadcast %6 : vector<1x8xf32> to vector<256x8xf32>
    %8 = arith.addf %5, %7 : vector<256x8xf32>
    %cst = arith.constant 0.000000e+00 : f32
    %9 = vector.broadcast %cst : f32 to vector<256x8xf32>
    %10 = arith.maximumf %8, %9 : vector<256x8xf32>
    %11 = arith.truncf %10 : vector<256x8xf32> to vector<256x8xbf16>
    %c0_6 = arith.constant 0 : index
    %c0_7 = arith.constant 0 : index
    %12 = vector.load %arg4[%c0_6, %c0_7] : memref<8x32xbf16, #tpu.memory_space<vmem>>, vector<8x32xbf16>
    %cst_8 = arith.constant dense<0.000000e+00> : vector<256x32xf32>
    %13 = tpu.matmul %11, %12, %cst_8 {dimension_numbers = #tpu.dot_dimension_numbers<[1], [0], [0], [1], [0, 0, 1, 1], [], []>} : vector<256x8xbf16>, vector<8x32xbf16>, vector<256x32xf32> -> vector<256x32xf32>
    %cst_9 = arith.constant 1.000000e+00 : f32
    %14 = vector.broadcast %cst_9 : f32 to vector<1x256xf32>
    %cst_10 = arith.constant dense<0.000000e+00> : vector<1x32xf32>
    %15 = tpu.matmul %14, %13, %cst_10 {dimension_numbers = #tpu.dot_dimension_numbers<[1], [0], [0], [1], [0, 0, 1, 1], [], []>} : vector<1x256xf32>, vector<256x32xf32>, vector<1x32xf32> -> vector<1x32xf32>
    %16 = arith.mulf %13, %13 : vector<256x32xf32>
    %cst_11 = arith.constant dense<0.000000e+00> : vector<1x32xf32>
    %17 = tpu.matmul %14, %16, %cst_11 {dimension_numbers = #tpu.dot_dimension_numbers<[1], [0], [0], [1], [0, 0, 1, 1], [], []>} : vector<1x256xf32>, vector<256x32xf32>, vector<1x32xf32> -> vector<1x32xf32>
    %18 = tpu.concatenate %15, %17 in 0 : vector<1x32xf32>, vector<1x32xf32> -> vector<2x32xf32>
    %c0_12 = arith.constant 0 : index
    %c0_13 = arith.constant 0 : index
    %c0_14 = arith.constant 0 : index
    %19 = vector.load %arg5[%c0_12, %c0_13, %c0_14] : memref<1x2x32xf32, #tpu.memory_space<vmem>>, vector<1x2x32xf32>
    %20 = vector.shape_cast %19 : vector<1x2x32xf32> to vector<2x32xf32>
    %21 = vector.shape_cast %18 : vector<2x32xf32> to vector<1x2x32xf32>
    tpu.vector_store %arg5[%c0_12, %c0_13, %c0_14], %21 {strides = array<i32>} : memref<1x2x32xf32, #tpu.memory_space<vmem>>, vector<1x2x32xf32>,
    return
  }
  func.func @transform_0(%arg0: i32) -> (i32, i32, i32) {
    %c0_i32 = arith.constant 0 : i32
    %c0_i32_0 = arith.constant 0 : i32
    %c0_i32_1 = arith.constant 0 : i32
    return %arg0, %c0_i32, %c0_i32_0 : i32, i32, i32
  }
  func.func @transform_1(%arg0: i32) -> (i32, i32) {
    %c0_i32 = arith.constant 0 : i32
    %c0_i32_0 = arith.constant 0 : i32
    %c0_i32_1 = arith.constant 0 : i32
    return %c0_i32, %c0_i32_0 : i32, i32
  }
  func.func @transform_2(%arg0: i32) -> (i32, i32) {
    %c0_i32 = arith.constant 0 : i32
    %c0_i32_0 = arith.constant 0 : i32
    %c0_i32_1 = arith.constant 0 : i32
    return %c0_i32, %c0_i32_0 : i32, i32
  }
  func.func @transform_3(%arg0: i32) -> (i32, i32) {
    %c0_i32 = arith.constant 0 : i32
    %c0_i32_0 = arith.constant 0 : i32
    %c0_i32_1 = arith.constant 0 : i32
    return %c0_i32, %c0_i32_0 : i32, i32
  }
  func.func @transform_4(%arg0: i32) -> (i32, i32, i32) {
    %c0_i32 = arith.constant 0 : i32
    %c0_i32_0 = arith.constant 0 : i32
    %c0_i32_1 = arith.constant 0 : i32
    return %arg0, %c0_i32, %c0_i32_0 : i32, i32, i32
  }
}

module attributes {stable_mosaic.version = 11 : i64} {
  func.func @_bn2_conv3_bn3_residual_kernel(%arg0: i32, %arg1: memref<1x256x8xbf16, #tpu.memory_space<vmem>>, %arg2: memref<1x8xf32, #tpu.memory_space<vmem>>, %arg3: memref<1x8xf32, #tpu.memory_space<vmem>>, %arg4: memref<8x32xbf16, #tpu.memory_space<vmem>>, %arg5: memref<1x32xf32, #tpu.memory_space<vmem>>, %arg6: memref<1x32xf32, #tpu.memory_space<vmem>>, %arg7: memref<1x32x256xf32, #tpu.memory_space<vmem>>, %arg8: memref<1x32x256xf32, #tpu.memory_space<vmem>>) attributes {dimension_semantics = [#tpu.dimension_semantics<parallel>], iteration_bounds = array<i64: 2>, scalar_prefetch = 0 : i64, scratch_operands = 0 : i64, tpu.core_type = #tpu.core_type<tc>, window_params = [{transform_indices = @transform_0, window_bounds = array<i64: 1, 256, 8>}, {pipeline_mode = #tpu.pipeline_mode<synchronous>, transform_indices = @transform_1, window_bounds = array<i64: 1, 8>}, {pipeline_mode = #tpu.pipeline_mode<synchronous>, transform_indices = @transform_2, window_bounds = array<i64: 1, 8>}, {pipeline_mode = #tpu.pipeline_mode<synchronous>, transform_indices = @transform_3, window_bounds = array<i64: 8, 32>}, {pipeline_mode = #tpu.pipeline_mode<synchronous>, transform_indices = @transform_4, window_bounds = array<i64: 1, 32>}, {pipeline_mode = #tpu.pipeline_mode<synchronous>, transform_indices = @transform_5, window_bounds = array<i64: 1, 32>}, {transform_indices = @transform_6, window_bounds = array<i64: 1, 32, 256>}, {transform_indices = @transform_7, window_bounds = array<i64: 1, 32, 256>}]} {
    %c0 = arith.constant 0 : index
    %c0_0 = arith.constant 0 : index
    %c0_1 = arith.constant 0 : index
    %0 = vector.load %arg1[%c0, %c0_0, %c0_1] : memref<1x256x8xbf16, #tpu.memory_space<vmem>>, vector<1x256x8xbf16>
    %1 = vector.shape_cast %0 : vector<1x256x8xbf16> to vector<256x8xbf16>
    %2 = arith.extf %1 : vector<256x8xbf16> to vector<256x8xf32>
    %c0_2 = arith.constant 0 : index
    %c0_3 = arith.constant 0 : index
    %3 = vector.load %arg2[%c0_2, %c0_3] : memref<1x8xf32, #tpu.memory_space<vmem>>, vector<1x8xf32>
    %4 = vector.broadcast %3 : vector<1x8xf32> to vector<256x8xf32>
    %5 = arith.mulf %2, %4 : vector<256x8xf32>
    %c0_4 = arith.constant 0 : index
    %c0_5 = arith.constant 0 : index
    %6 = vector.load %arg3[%c0_4, %c0_5] : memref<1x8xf32, #tpu.memory_space<vmem>>, vector<1x8xf32>
    %7 = vector.broadcast %6 : vector<1x8xf32> to vector<256x8xf32>
    %8 = arith.addf %5, %7 : vector<256x8xf32>
    %cst = arith.constant 0.000000e+00 : f32
    %9 = vector.broadcast %cst : f32 to vector<256x8xf32>
    %10 = arith.maximumf %8, %9 : vector<256x8xf32>
    %11 = arith.truncf %10 : vector<256x8xf32> to vector<256x8xbf16>
    %c0_6 = arith.constant 0 : index
    %c0_7 = arith.constant 0 : index
    %12 = vector.load %arg4[%c0_6, %c0_7] : memref<8x32xbf16, #tpu.memory_space<vmem>>, vector<8x32xbf16>
    %cst_8 = arith.constant dense<0.000000e+00> : vector<256x32xf32>
    %13 = tpu.matmul %11, %12, %cst_8 {dimension_numbers = #tpu.dot_dimension_numbers<[1], [0], [0], [1], [0, 0, 1, 1], [], []>} : vector<256x8xbf16>, vector<8x32xbf16>, vector<256x32xf32> -> vector<256x32xf32>
    %c0_9 = arith.constant 0 : index
    %c0_10 = arith.constant 0 : index
    %14 = vector.load %arg5[%c0_9, %c0_10] : memref<1x32xf32, #tpu.memory_space<vmem>>, vector<1x32xf32>
    %15 = vector.broadcast %14 : vector<1x32xf32> to vector<256x32xf32>
    %16 = arith.mulf %13, %15 : vector<256x32xf32>
    %c0_11 = arith.constant 0 : index
    %c0_12 = arith.constant 0 : index
    %17 = vector.load %arg6[%c0_11, %c0_12] : memref<1x32xf32, #tpu.memory_space<vmem>>, vector<1x32xf32>
    %18 = vector.broadcast %17 : vector<1x32xf32> to vector<256x32xf32>
    %19 = arith.addf %16, %18 : vector<256x32xf32>
    %20 = tpu.transpose %19, [1, 0] : vector<256x32xf32> -> vector<32x256xf32>
    %c0_13 = arith.constant 0 : index
    %c0_14 = arith.constant 0 : index
    %c0_15 = arith.constant 0 : index
    %21 = vector.load %arg7[%c0_13, %c0_14, %c0_15] : memref<1x32x256xf32, #tpu.memory_space<vmem>>, vector<1x32x256xf32>
    %22 = vector.shape_cast %21 : vector<1x32x256xf32> to vector<32x256xf32>
    %23 = arith.addf %20, %22 : vector<32x256xf32>
    %cst_16 = arith.constant 0.000000e+00 : f32
    %24 = vector.broadcast %cst_16 : f32 to vector<32x256xf32>
    %25 = arith.maximumf %23, %24 : vector<32x256xf32>
    %c0_17 = arith.constant 0 : index
    %c0_18 = arith.constant 0 : index
    %c0_19 = arith.constant 0 : index
    %26 = vector.load %arg8[%c0_17, %c0_18, %c0_19] : memref<1x32x256xf32, #tpu.memory_space<vmem>>, vector<1x32x256xf32>
    %27 = vector.shape_cast %26 : vector<1x32x256xf32> to vector<32x256xf32>
    %28 = vector.shape_cast %25 : vector<32x256xf32> to vector<1x32x256xf32>
    tpu.vector_store %arg8[%c0_17, %c0_18, %c0_19], %28 {strides = array<i32>} : memref<1x32x256xf32, #tpu.memory_space<vmem>>, vector<1x32x256xf32>,
    return
  }
  func.func @transform_0(%arg0: i32) -> (i32, i32, i32) {
    %c0_i32 = arith.constant 0 : i32
    %c0_i32_0 = arith.constant 0 : i32
    %c0_i32_1 = arith.constant 0 : i32
    return %arg0, %c0_i32, %c0_i32_0 : i32, i32, i32
  }
  func.func @transform_1(%arg0: i32) -> (i32, i32) {
    %c0_i32 = arith.constant 0 : i32
    %c0_i32_0 = arith.constant 0 : i32
    %c0_i32_1 = arith.constant 0 : i32
    return %c0_i32, %c0_i32_0 : i32, i32
  }
  func.func @transform_2(%arg0: i32) -> (i32, i32) {
    %c0_i32 = arith.constant 0 : i32
    %c0_i32_0 = arith.constant 0 : i32
    %c0_i32_1 = arith.constant 0 : i32
    return %c0_i32, %c0_i32_0 : i32, i32
  }
  func.func @transform_3(%arg0: i32) -> (i32, i32) {
    %c0_i32 = arith.constant 0 : i32
    %c0_i32_0 = arith.constant 0 : i32
    %c0_i32_1 = arith.constant 0 : i32
    return %c0_i32, %c0_i32_0 : i32, i32
  }
  func.func @transform_4(%arg0: i32) -> (i32, i32) {
    %c0_i32 = arith.constant 0 : i32
    %c0_i32_0 = arith.constant 0 : i32
    %c0_i32_1 = arith.constant 0 : i32
    return %c0_i32, %c0_i32_0 : i32, i32
  }
  func.func @transform_5(%arg0: i32) -> (i32, i32) {
    %c0_i32 = arith.constant 0 : i32
    %c0_i32_0 = arith.constant 0 : i32
    %c0_i32_1 = arith.constant 0 : i32
    return %c0_i32, %c0_i32_0 : i32, i32
  }
  func.func @transform_6(%arg0: i32) -> (i32, i32, i32) {
    %c0_i32 = arith.constant 0 : i32
    %c0_i32_0 = arith.constant 0 : i32
    %c0_i32_1 = arith.constant 0 : i32
    return %arg0, %c0_i32, %c0_i32_0 : i32, i32, i32
  }
  func.func @transform_7(%arg0: i32) -> (i32, i32, i32) {
    %c0_i32 = arith.constant 0 : i32
    %c0_i32_0 = arith.constant 0 : i32
    %c0_i32_1 = arith.constant 0 : i32
    return %arg0, %c0_i32, %c0_i32_0 : i32, i32, i32
  }
}

</mosaic_0001>

<bundles_post_ra>
// kernel: bottleneck_forward.4
= control target key start
LH: loop header
LB: loop body
LE: loop exit
PB: predicated region body
PF: predicated region fallthrough
CT: control target
= control target key end

     0   :  { %s1248_s12 = smov 0   ;;  %s1603_s0 = inlined_call_operand.vmem [shape: f32[2,32,256], index: 0, kind: input, shape index: {}]   ;;  %s1604_s1 = inlined_call_operand.vmem [shape: bf16[32,8], index: 1, kind: input, shape index: {}]   ;;  %s1605_s2 = inlined_call_operand.vmem [shape: bf16[2,16,16,8], index: 2, kind: output, shape index: {0}]   ;;  %s1606_s3 = inlined_call_operand.vmem [shape: f32[2,2,8], index: 3, kind: output, shape index: {1}]  }
   0x1 LB: > { %s923_s13 = sadd.s32 4294967295, %s1225_s12   ;;  %p927_p0 = scmp.ge.s32.totalorder %s1225_s12, 1  ;;  %s1225_s12 = sphi %s1248_s12, %s14_s12  }
   0x2   : > { %p140_p1 = scmp.lt.s32.totalorder %s1225_s12, 3 }
   0x4   : > { %p141_p2 = pnand %p927_p0, %p140_p1 }
   0x5   : > { %p168_p3 = scmp.lt.s32.totalorder (!%p141_p2), %s923_s13, 1  ;;  %v1217_v5 = vld [vmem:[%s1604_s1] sm:$0xff] (!%p141_p2)   ;;  %v1218_v7 = vld [vmem:[%s1604_s1 + $0x8] sm:$0xff] (!%p141_p2)   ;;  %vm287_vm0 = vcmask (!%p141_p2), 261120   ;;  %v1227_v58 = vmov (!%p141_p2), 1.0   ;;  %vm625_vm1 = vcmask (!%p141_p2), 60416  }
   0x6   : > { %144 = sbr.rel (%p141_p2) target bundleno = 716 (0x2cc), region = 28  ;;  %1107 = vmatprep.subr.bf16.mxu0 (!%p141_p2), %v1217_v5  ;;  %722 = vmatprep.mubr.f32.mxu1 (!%p141_p2), %v1227_v58  ;;  %vm833_vm2 = vcmask (!%p141_p2), 1040384   ;;  %vm835_vm3 = vcmask (!%p141_p2), 58368  }
   0x7   : > { %1108 = vmatpush3.bf16.msra.mxu0 (!%p141_p2), %v1217_v5 }
   0x8   : > { %1109 = vmatprep.subr.bf16.mxu0 (!%p141_p2), %v1218_v7 }
   0xb   : > { %1110 = vmatpush3.bf16.msra.mxu0 (!%p141_p2), %v1218_v7 }
   0xd   : > { %s1610_s13 = smov (!%p168_p3, %s923_s13), 1 }
   0xe   : > { %s985_s14 = sshll.u32 %s1610_s13, 6  ;;  %s986_s22 = sshll.u32 %s1610_s13, 7 }
   0xf   : > { %s172_s17 = scalar_lea.vmem %s1603_s0, %s985_s14  ;;  %s1289_s25 = scalar_lea.vmem %s1605_s2, %s986_s22 }
  0x10   : > { %v183_v0 = vld [vmem:[%s172_s17] sm:$0xff]  ;;  %v184_v1 = vld [vmem:[%s172_s17 + $0x8] sm:$0xff]  ;;  %v185_v2 = vld [vmem:[%s172_s17 + $0x10] sm:$0xff]  ;;  %s932_s26 = sshll.u32 %s1610_s13, 1 }
  0x11   : > { %191 = vxpose.xlu0.b32.start [1/4] (short) %v183_v0, 128  ;;  %223 = vxpose.xlu1.b32.start [1/4] (short) %v184_v1, 128  ;;  %v186_v3 = vld [vmem:[%s172_s17 + $0x18] sm:$0xff]  ;;  %v187_v4 = vld [vmem:[%s172_s17 + $0x20] sm:$0xff]  ;;  %v188_v6 = vld [vmem:[%s172_s17 + $0x28] sm:$0xff]  ;;  %s181_s29 = scalar_lea.vmem %s1606_s3, %s932_s26 }
  0x12   : > { %v189_v8 = vld [vmem:[%s172_s17 + $0x30] sm:$0xff]  ;;  %v190_v9 = vld [vmem:[%s172_s17 + $0x38] sm:$0xff] }
  0x15   : > { %192 = vxpose.xlu0.b32.cont [2/4] (short) %v185_v2, 128  ;;  %224 = vxpose.xlu1.b32.cont [2/4] (short) %v186_v3, 128 }
  0x19   : > { %193 = vxpose.xlu0.b32.cont [3/4] (short) %v187_v4, 128  ;;  %225 = vxpose.xlu1.b32.cont [3/4] (short) %v188_v6, 128 }
  0x1d   : > { %194 = vxpose.xlu0.b32.end [4/4] (short) %v189_v8, 128  ;;  %226 = vxpose.xlu1.b32.end [4/4] (short) %v190_v9, 128 }
  0x91   : > { %v207_v10 = vpop.trf.xlu0  ;;  %v239_v11 = vpop.trf.xlu1 }
  0x95   : > { %v208_v12 = vpop.trf.xlu0  ;;  %v240_v14 = vpop.trf.xlu1 }
  0x96   : > { %v255_v13 = vpack.c.bf16 %v208_v12, %v207_v10  ;;  %v263_v45 = vpack.c.bf16 %v240_v14, %v239_v11 }
  0x98   : > { %1111 = vmatprep.mubr.msk.bf16.mxu0 %vm287_vm0, %v255_v13 }
  0x99   : > { %v209_v15 = vpop.trf.xlu0  ;;  %v241_v17 = vpop.trf.xlu1 }
  0x9d   : > { %v210_v16 = vpop.trf.xlu0  ;;  %v242_v20 = vpop.trf.xlu1 }
  0x9e   : > { %v256_v18 = vpack.c.bf16 %v210_v16, %v209_v15  ;;  %v264_v47 = vpack.c.bf16 %v242_v20, %v241_v17 }
  0xa0   : > { %1112 = vmatmul.mubr.msk.bf16.vlgmr.msra.gmra.mrb[0].mxu0 %vm287_vm0, %v256_v18 }
  0xa1   : > { %v211_v19 = vpop.trf.xlu0  ;;  %v243_v24 = vpop.trf.xlu1 }
  0xa5   : > { %v212_v21 = vpop.trf.xlu0  ;;  %v244_v27 = vpop.trf.xlu1 }
  0xa6   : > { %v257_v22 = vpack.c.bf16 %v212_v21, %v211_v19  ;;  %v265_v48 = vpack.c.bf16 %v244_v27, %v243_v24 }
  0xa8   : > { %1115 = vmatprep.mubr.msk.bf16.mxu0 %vm287_vm0, %v257_v22 }
  0xa9   : > { %v213_v23 = vpop.trf.xlu0  ;;  %v245_v30 = vpop.trf.xlu1 }
  0xad   : > { %v214_v25 = vpop.trf.xlu0  ;;  %v246_v33 = vpop.trf.xlu1 }
  0xae   : > { %v258_v26 = vpack.c.bf16 %v214_v25, %v213_v23  ;;  %v266_v50 = vpack.c.bf16 %v246_v33, %v245_v30 }
  0xb0   : > { %1116 = vmatmul.mubr.msk.bf16.gmra.mrb[4].mxu0 %vm287_vm0, %v258_v26 }
  0xb1   : > { %v215_v28 = vpop.trf.xlu0  ;;  %v247_v37 = vpop.trf.xlu1 }
  0xb5   : > { %v216_v29 = vpop.trf.xlu0  ;;  %v248_v40 = vpop.trf.xlu1 }
  0xb6   : > { %v259_v31 = vpack.c.bf16 %v216_v29, %v215_v28  ;;  %v267_v51 = vpack.c.bf16 %v248_v40, %v247_v37 }
  0xb8   : > { %1119 = vmatprep.mubr.msk.bf16.mxu0 %vm287_vm0, %v259_v31 }
  0xb9   : > { %v217_v32 = vpop.trf.xlu0  ;;  %v249_v43 = vpop.trf.xlu1 }
  0xbd   : > { %v218_v34 = vpop.trf.xlu0  ;;  %v250_v46 = vpop.trf.xlu1 }
  0xbe   : > { %v260_v35 = vpack.c.bf16 %v218_v34, %v217_v32  ;;  %v268_v54 = vpack.c.bf16 %v250_v46, %v249_v43 }
  0xc0   : > { %1120 = vmatmul.mubr.msk.bf16.gmra.mrb[8].mxu0 %vm287_vm0, %v260_v35 }
  0xc1   : > { %v219_v36 = vpop.trf.xlu0  ;;  %v251_v49 = vpop.trf.xlu1 }
  0xc5   : > { %v220_v38 = vpop.trf.xlu0  ;;  %v252_v52 = vpop.trf.xlu1 }
  0xc6   : > { %v261_v39 = vpack.c.bf16 %v220_v38, %v219_v36  ;;  %v269_v55 = vpack.c.bf16 %v252_v52, %v251_v49 }
  0xc8   : > { %1123 = vmatprep.mubr.msk.bf16.mxu0 %vm287_vm0, %v261_v39 }
  0xc9   : > { %v221_v41 = vpop.trf.xlu0  ;;  %v253_v53 = vpop.trf.xlu1 }
  0xcd   : > { %v222_v42 = vpop.trf.xlu0  ;;  %v254_v56 = vpop.trf.xlu1 }
  0xce   : > { %v262_v44 = vpack.c.bf16 %v222_v42, %v221_v41  ;;  %v270_v57 = vpack.c.bf16 %v254_v56, %v253_v53 }
  0xd0   : > { %1124 = vmatmul.mubr.msk.bf16.gmra.mrb[12].mxu0 %vm287_vm0, %v262_v44 }
  0xd1   : > { %1127 = vmatprep.mubr.msk.bf16.mxu0 %vm287_vm0, %v263_v45 }
  0xd8   : > { %1128 = vmatmul.mubr.msk.bf16.gmra.mrb[16].mxu0 %vm287_vm0, %v264_v47 }
  0xd9   : > { %1131 = vmatprep.mubr.msk.bf16.mxu0 %vm287_vm0, %v265_v48 }
  0xe0   : > { %1132 = vmatmul.mubr.msk.bf16.gmra.mrb[20].mxu0 %vm287_vm0, %v266_v50 }
  0xe1   : > { %1135 = vmatprep.mubr.msk.bf16.mxu0 %vm287_vm0, %v267_v51 }
  0xe8   : > { %1136 = vmatmul.mubr.msk.bf16.gmra.mrb[24].mxu0 %vm287_vm0, %v268_v54 }
  0xe9   : > { %1139 = vmatprep.mubr.msk.bf16.mxu0 %vm287_vm0, %v269_v55 }
  0xf0   : > { %1140 = vmatmul.mubr.msk.bf16.gmra.mrb[28].mxu0 %vm287_vm0, %v270_v57 }
 0x173   : > { %v1291_v59 = vpop.f32.mrb[0].mxu0 }
 0x174   : > { %v989_v60 = vpack.c.bf16 %v1291_v59, %v1291_v59  ;;  %v1295_v61 = vpop.f32.mrb[1].mxu0  ;;  %v1305_v0 = vmul.f32 %v1291_v59, %v1291_v59 }
 0x175   : > { %v987_v62 = vpack.c.bf16 %v1295_v61, %v1295_v61  ;;  %v1299_v63 = vpop.f32.mrb[2].mxu0  ;;  %v1321_v5 = vmul.f32 %v1295_v61, %v1295_v61 }
 0x176   : > { %628 = vst.msk [vmem:[%s1289_s25 + $0x8] sm:$0xf] %vm625_vm1, %v989_v60  ;;  %v990_v1 = vpack.c.bf16 %v1299_v63, %v1299_v63  ;;  %v1149_v2 = vpack.c.bf16 %v1299_v63, %v1291_v59  ;;  %v1313_v3 = vmul.f32 %v1299_v63, %v1299_v63  ;;  %v1315_v4 = vpop.f32.mrb[3].mxu0 }
 0x177   : > { %626 = vst.msk [vmem:[%s1289_s25] sm:$0xf] %vm625_vm1, %v987_v62  ;;  %v988_v6 = vpack.c.bf16 %v1315_v4, %v1315_v4  ;;  %v1327_v7 = vmul.f32 %v1315_v4, %v1315_v4  ;;  %v1145_v8 = vpack.c.bf16 %v1315_v4, %v1295_v61 }
 0x178   : > { %629 = vst.msk [vmem:[%s1289_s25 + $0xc] sm:$0xf] %vm625_vm1, %v990_v1  ;;  %v1181_v9 = vpack.c.bf16 %v1313_v3, %v1305_v0 }
 0x179   : > { %627 = vst.msk [vmem:[%s1289_s25 + $0x4] sm:$0xf] %vm625_vm1, %v988_v6  ;;  %v1177_v10 = vpack.c.bf16 %v1327_v7, %v1321_v5 }
 0x183   : > { %v1339_v11 = vpop.f32.mrb[4].mxu0 }
 0x184   : > { %v993_v12 = vpack.c.bf16 %v1339_v11, %v1339_v11  ;;  %v1343_v13 = vpop.f32.mrb[5].mxu0  ;;  %v1353_v16 = vmul.f32 %v1339_v11, %v1339_v11 }
 0x185   : > { %v991_v14 = vpack.c.bf16 %v1343_v13, %v1343_v13  ;;  %v1347_v15 = vpop.f32.mrb[6].mxu0  ;;  %v1369_v21 = vmul.f32 %v1343_v13, %v1343_v13 }
 0x186   : > { %632 = vst.msk [vmem:[%s1289_s25 + $0x18] sm:$0xf] %vm625_vm1, %v993_v12  ;;  %v994_v17 = vpack.c.bf16 %v1347_v15, %v1347_v15  ;;  %v1157_v18 = vpack.c.bf16 %v1347_v15, %v1339_v11  ;;  %v1361_v19 = vmul.f32 %v1347_v15, %v1347_v15  ;;  %v1363_v20 = vpop.f32.mrb[7].mxu0 }
 0x187   : > { %630 = vst.msk [vmem:[%s1289_s25 + $0x10] sm:$0xf] %vm625_vm1, %v991_v14  ;;  %v992_v22 = vpack.c.bf16 %v1363_v20, %v1363_v20  ;;  %v1153_v23 = vpack.c.bf16 %v1363_v20, %v1343_v13  ;;  %v1377_v24 = vmul.f32 %v1363_v20, %v1363_v20 }
 0x188   : > { %633 = vst.msk [vmem:[%s1289_s25 + $0x1c] sm:$0xf] %vm625_vm1, %v994_v17  ;;  %v1189_v25 = vpack.c.bf16 %v1361_v19, %v1353_v16 }
 0x189   : > { %631 = vst.msk [vmem:[%s1289_s25 + $0x14] sm:$0xf] %vm625_vm1, %v992_v22  ;;  %v1185_v26 = vpack.c.bf16 %v1377_v24, %v1369_v21 }
 0x193   : > { %v1387_v27 = vpop.f32.mrb[8].mxu0 }
 0x194   : > { %v997_v28 = vpack.c.bf16 %v1387_v27, %v1387_v27  ;;  %v1391_v29 = vpop.f32.mrb[9].mxu0  ;;  %v1401_v32 = vmul.f32 %v1387_v27, %v1387_v27 }
 0x195   : > { %v995_v30 = vpack.c.bf16 %v1391_v29, %v1391_v29  ;;  %v1395_v31 = vpop.f32.mrb[10].mxu0  ;;  %v1417_v37 = vmul.f32 %v1391_v29, %v1391_v29 }
 0x196   : > { %636 = vst.msk [vmem:[%s1289_s25 + $0x28] sm:$0xf] %vm625_vm1, %v997_v28  ;;  %v998_v33 = vpack.c.bf16 %v1395_v31, %v1395_v31  ;;  %v1165_v34 = vpack.c.bf16 %v1395_v31, %v1387_v27  ;;  %v1409_v35 = vmul.f32 %v1395_v31, %v1395_v31  ;;  %v1411_v36 = vpop.f32.mrb[11].mxu0 }
 0x197   : > { %634 = vst.msk [vmem:[%s1289_s25 + $0x20] sm:$0xf] %vm625_vm1, %v995_v30  ;;  %v996_v38 = vpack.c.bf16 %v1411_v36, %v1411_v36  ;;  %v1161_v39 = vpack.c.bf16 %v1411_v36, %v1391_v29  ;;  %v1425_v40 = vmul.f32 %v1411_v36, %v1411_v36 }
 0x198   : > { %637 = vst.msk [vmem:[%s1289_s25 + $0x2c] sm:$0xf] %vm625_vm1, %v998_v33  ;;  %v1197_v41 = vpack.c.bf16 %v1409_v35, %v1401_v32 }
 0x199   : > { %635 = vst.msk [vmem:[%s1289_s25 + $0x24] sm:$0xf] %vm625_vm1, %v996_v38  ;;  %v1193_v42 = vpack.c.bf16 %v1425_v40, %v1417_v37 }
 0x1a3   : > { %v1435_v43 = vpop.f32.mrb[12].mxu0 }
 0x1a4   : > { %v1001_v44 = vpack.c.bf16 %v1435_v43, %v1435_v43  ;;  %v1439_v45 = vpop.f32.mrb[13].mxu0  ;;  %v1449_v48 = vmul.f32 %v1435_v43, %v1435_v43 }
 0x1a5   : > { %v999_v46 = vpack.c.bf16 %v1439_v45, %v1439_v45  ;;  %v1443_v47 = vpop.f32.mrb[14].mxu0  ;;  %v1465_v53 = vmul.f32 %v1439_v45, %v1439_v45 }
 0x1a6   : > { %640 = vst.msk [vmem:[%s1289_s25 + $0x38] sm:$0xf] %vm625_vm1, %v1001_v44  ;;  %v1002_v49 = vpack.c.bf16 %v1443_v47, %v1443_v47  ;;  %v1173_v50 = vpack.c.bf16 %v1443_v47, %v1435_v43  ;;  %v1457_v51 = vmul.f32 %v1443_v47, %v1443_v47  ;;  %v1459_v52 = vpop.f32.mrb[15].mxu0 }
 0x1a7   : > { %638 = vst.msk [vmem:[%s1289_s25 + $0x30] sm:$0xf] %vm625_vm1, %v999_v46  ;;  %v1000_v54 = vpack.c.bf16 %v1459_v52, %v1459_v52  ;;  %v1169_v55 = vpack.c.bf16 %v1459_v52, %v1439_v45  ;;  %v1473_v56 = vmul.f32 %v1459_v52, %v1459_v52 }
 0x1a8   : > { %641 = vst.msk [vmem:[%s1289_s25 + $0x3c] sm:$0xf] %vm625_vm1, %v1002_v49  ;;  %v1608_v3 = vpack.c.bf16 %v1457_v51, %v1449_v48 }
 0x1a9   : > { %639 = vst.msk [vmem:[%s1289_s25 + $0x34] sm:$0xf] %vm625_vm1, %v1000_v54  ;;  %v1607_v0 = vpack.c.bf16 %v1473_v56, %v1465_v53 }
 0x1ab   : > { %v1129_v62 = vpop.f32.mrb[16].mxu0 }
 0x1ac   : > { %v1005_v1 = vpack.c.bf16 %v1129_v62, %v1129_v62  ;;  %v434_v6 = vpop.f32.mrb[17].mxu0  ;;  %v1485_v17 = vmul.f32 %v1129_v62, %v1129_v62 }
 0x1ad   : > { %v1003_v12 = vpack.c.bf16 %v434_v6, %v434_v6  ;;  %v1130_v14 = vpop.f32.mrb[18].mxu0  ;;  %v1491_v38 = vmul.f32 %v434_v6, %v434_v6 }
 0x1ae   : > { %644 = vst.msk [vmem:[%s1289_s25 + $0x48] sm:$0xf] %vm625_vm1, %v1005_v1  ;;  %v1006_v22 = vpack.c.bf16 %v1130_v14, %v1130_v14  ;;  %v1147_v28 = vpack.c.bf16 %v1130_v14, %v1129_v62  ;;  %v1487_v30 = vmul.f32 %v1130_v14, %v1130_v14  ;;  %v437_v33 = vpop.f32.mrb[19].mxu0 }
 0x1af   : > { %642 = vst.msk [vmem:[%s1289_s25 + $0x40] sm:$0xf] %vm625_vm1, %v1003_v12  ;;  %v1004_v44 = vpack.c.bf16 %v437_v33, %v437_v33  ;;  %v1493_v46 = vmul.f32 %v437_v33, %v437_v33  ;;  %v1143_v49 = vpack.c.bf16 %v437_v33, %v434_v6 }
 0x1b0   : > { %645 = vst.msk [vmem:[%s1289_s25 + $0x4c] sm:$0xf] %vm625_vm1, %v1006_v22  ;;  %v1179_v54 = vpack.c.bf16 %v1487_v30, %v1485_v17 }
 0x1b1   : > { %643 = vst.msk [vmem:[%s1289_s25 + $0x44] sm:$0xf] %vm625_vm1, %v1004_v44  ;;  %1144 = vmatprep.subr.bf16.mxu1 %v1143_v49  ;;  %v1175_v62 = vpack.c.bf16 %v1493_v46, %v1491_v38 }
 0x1b2   : > { %1146 = vmatpush3.bf16.msra.mxu1 %v1145_v8 }
 0x1b3   : > { %v1133_v1 = vpop.f32.mrb[20].mxu0  ;;  %1148 = vmatprep.subr.bf16.mxu1 %v1147_v28 }
 0x1b4   : > { %v1009_v12 = vpack.c.bf16 %v1133_v1, %v1133_v1  ;;  %v450_v6 = vpop.f32.mrb[21].mxu0  ;;  %v1508_v33 = vmul.f32 %v1133_v1, %v1133_v1 }
 0x1b5   : > { %v1007_v14 = vpack.c.bf16 %v450_v6, %v450_v6  ;;  %v1134_v22 = vpop.f32.mrb[22].mxu0  ;;  %v1517_v61 = vmul.f32 %v450_v6, %v450_v6 }
 0x1b6   : > { %648 = vst.msk [vmem:[%s1289_s25 + $0x58] sm:$0xf] %vm625_vm1, %v1009_v12  ;;  %v1010_v44 = vpack.c.bf16 %v1134_v22, %v1134_v22  ;;  %v1155_v49 = vpack.c.bf16 %v1134_v22, %v1133_v1  ;;  %v1510_v57 = vmul.f32 %v1134_v22, %v1134_v22  ;;  %v453_v60 = vpop.f32.mrb[23].mxu0  ;;  %1150 = vmatpush3.bf16.msra.mxu1 %v1149_v2 }
 0x1b7   : > { %646 = vst.msk [vmem:[%s1289_s25 + $0x50] sm:$0xf] %vm625_vm1, %v1007_v14  ;;  %v1008_v4 = vpack.c.bf16 %v453_v60, %v453_v60  ;;  %v1151_v8 = vpack.c.bf16 %v453_v60, %v450_v6  ;;  %v1519_v28 = vmul.f32 %v453_v60, %v453_v60 }
 0x1b8   : > { %649 = vst.msk [vmem:[%s1289_s25 + $0x5c] sm:$0xf] %vm625_vm1, %v1010_v44  ;;  %v1187_v1 = vpack.c.bf16 %v1510_v57, %v1508_v33 }
 0x1b9   : > { %647 = vst.msk [vmem:[%s1289_s25 + $0x54] sm:$0xf] %vm625_vm1, %v1008_v4  ;;  %1152 = vmatprep.subr.bf16.mxu1 %v1151_v8  ;;  %v1183_v59 = vpack.c.bf16 %v1519_v28, %v1517_v61 }
 0x1ba   : > { %1154 = vmatpush3.bf16.msra.mxu1 %v1153_v23 }
 0x1bb   : > { %v1137_v63 = vpop.f32.mrb[24].mxu0  ;;  %1156 = vmatprep.subr.bf16.mxu1 %v1155_v49 }
 0x1bc   : > { %v1013_v2 = vpack.c.bf16 %v1137_v63, %v1137_v63  ;;  %v466_v60 = vpop.f32.mrb[25].mxu0  ;;  %v754_v57 = vmul.f32 %v1137_v63, %v1137_v63 }
 0x1bd   : > { %v1011_v12 = vpack.c.bf16 %v466_v60, %v466_v60  ;;  %v1138_v6 = vpop.f32.mrb[26].mxu0  ;;  %v752_v13 = vmul.f32 %v466_v60, %v466_v60 }
 0x1be   : > { %652 = vst.msk [vmem:[%s1289_s25 + $0x68] sm:$0xf] %vm625_vm1, %v1013_v2  ;;  %v1014_v14 = vpack.c.bf16 %v1138_v6, %v1138_v6  ;;  %v1163_v22 = vpack.c.bf16 %v1138_v6, %v1137_v63  ;;  %v755_v33 = vmul.f32 %v1138_v6, %v1138_v6  ;;  %v469_v44 = vpop.f32.mrb[27].mxu0  ;;  %1158 = vmatpush3.bf16.msra.mxu1 %v1157_v18 }
 0x1bf   : > { %650 = vst.msk [vmem:[%s1289_s25 + $0x60] sm:$0xf] %vm625_vm1, %v1011_v12  ;;  %v1012_v20 = vpack.c.bf16 %v469_v44, %v469_v44  ;;  %v1159_v23 = vpack.c.bf16 %v469_v44, %v466_v60  ;;  %v753_v49 = vmul.f32 %v469_v44, %v469_v44 }
 0x1c0   : > { %653 = vst.msk [vmem:[%s1289_s25 + $0x6c] sm:$0xf] %vm625_vm1, %v1014_v14  ;;  %v1195_v61 = vpack.c.bf16 %v755_v33, %v754_v57 }
 0x1c1   : > { %651 = vst.msk [vmem:[%s1289_s25 + $0x64] sm:$0xf] %vm625_vm1, %v1012_v20  ;;  %1160 = vmatprep.subr.bf16.mxu1 %v1159_v23  ;;  %v1191_v4 = vpack.c.bf16 %v753_v49, %v752_v13 }
 0x1c2   : > { %1162 = vmatpush3.bf16.msra.mxu1 %v1161_v39 }
 0x1c3   : > { %v1141_v11 = vpop.f32.mrb[28].mxu0  ;;  %1164 = vmatprep.subr.bf16.mxu1 %v1163_v22 }
 0x1c4   : > { %v1017_v15 = vpack.c.bf16 %v1141_v11, %v1141_v11  ;;  %v482_v18 = vpop.f32.mrb[29].mxu0  ;;  %v758_v63 = vmul.f32 %v1141_v11, %v1141_v11 }
 0x1c5   : > { %v1015_v8 = vpack.c.bf16 %v482_v18, %v482_v18  ;;  %v1142_v28 = vpop.f32.mrb[30].mxu0  ;;  %v756_v29 = vmul.f32 %v482_v18, %v482_v18 }
 0x1c6   : > { %656 = vst.msk [vmem:[%s1289_s25 + $0x78] sm:$0xf] %vm625_vm1, %v1017_v15  ;;  %v1018_v2 = vpack.c.bf16 %v1142_v28, %v1142_v28  ;;  %v1171_v60 = vpack.c.bf16 %v1142_v28, %v1141_v11  ;;  %v759_v12 = vmul.f32 %v1142_v28, %v1142_v28  ;;  %v485_v6 = vpop.f32.mrb[31].mxu0  ;;  %1166 = vmatpush3.bf16.msra.mxu1 %v1165_v34 }
 0x1c7   : > { %654 = vst.msk [vmem:[%s1289_s25 + $0x70] sm:$0xf] %vm625_vm1, %v1015_v8  ;;  %v1016_v36 = vpack.c.bf16 %v485_v6, %v485_v6  ;;  %v1167_v39 = vpack.c.bf16 %v485_v6, %v482_v18  ;;  %v757_v57 = vmul.f32 %v485_v6, %v485_v6 }
 0x1c8   : > { %657 = vst.msk [vmem:[%s1289_s25 + $0x7c] sm:$0xf] %vm625_vm1, %v1018_v2  ;;  %v1203_v14 = vpack.c.bf16 %v759_v12, %v758_v63 }
 0x1c9   : > { %655 = vst.msk [vmem:[%s1289_s25 + $0x74] sm:$0xf] %vm625_vm1, %v1016_v36  ;;  %v1199_v22 = vpack.c.bf16 %v757_v57, %v756_v29  ;;  %1168 = vmatprep.subr.bf16.mxu1 %v1167_v39 }
 0x1ca   : > { %1170 = vmatpush3.bf16.msra.mxu1 %v1169_v55 }
 0x1cb   : > { %1172 = vmatprep.subr.bf16.mxu1 %v1171_v60 }
 0x1ce   : > { %1174 = vmatpush3.bf16.msra.mxu1 %v1173_v50 }
 0x1cf   : > { %1176 = vmatprep.subr.bf16.mxu1 %v1175_v62 }
 0x1d1   : > { %723 = vmatmul.mubr.f32.vlgmr.msra.gmra.mrb[0].mxu1 %v1227_v58 }
 0x1d2   : > { %1178 = vmatpush3.bf16.msra.mxu1 %v1177_v10  ;;  %824 = vmatprep.mubr.f32.mxu1 %v1227_v58 }
 0x1d3   : > { %1180 = vmatprep.subr.bf16.mxu1 %v1179_v54 }
 0x1d6   : > { %1182 = vmatpush3.bf16.msra.mxu1 %v1181_v9 }
 0x1d7   : > { %1184 = vmatprep.subr.bf16.mxu1 %v1183_v59 }
 0x1da   : > { %1186 = vmatpush3.bf16.msra.mxu1 %v1185_v26 }
 0x1db   : > { %1188 = vmatprep.subr.bf16.mxu1 %v1187_v1 }
 0x1de   : > { %1190 = vmatpush3.bf16.msra.mxu1 %v1189_v25 }
 0x1df   : > { %1192 = vmatprep.subr.bf16.mxu1 %v1191_v4 }
 0x1e2   : > { %1194 = vmatpush3.bf16.msra.mxu1 %v1193_v42 }
 0x1e3   : > { %1196 = vmatprep.subr.bf16.mxu1 %v1195_v61 }
 0x1e6   : > { %1198 = vmatpush3.bf16.msra.mxu1 %v1197_v41 }
 0x1e7   : > { %1200 = vmatprep.subr.bf16.mxu1 %v1199_v22 }
 0x1ea   : > { %1202 = vmatpush3.bf16.msra.mxu1 %v1607_v0 }
 0x1eb   : > { %1204 = vmatprep.subr.bf16.mxu1 %v1203_v14 }
 0x1ee   : > { %1206 = vmatpush3.bf16.msra.mxu1 %v1608_v3 }
 0x1f1   : > { %825 = vmatmul.mubr.f32.vlgmr.msra.gmra.mrb[2].mxu1 %v1227_v58 }
 0x2a4   : > { %v1069_v5 = vpop.f32.mrb[0].mxu1 }
 0x2a5   : > { %v1070_v7 = vpop.f32.mrb[1].mxu1 }
 0x2a6   : > { %v1071_v9 = vadd.f32 %v1070_v7, %v1069_v5 }
 0x2c4   : > { %v1104_v10 = vpop.f32.mrb[2].mxu1 }
 0x2c5   : > { %v1105_v16 = vpop.f32.mrb[3].mxu1 }
 0x2c6   : > { %v1106_v19 = vadd.f32 %v1105_v16, %v1104_v10 }
 0x2c8   : > { %v831_v21 = vrot.slane %v1106_v19, 7 }
 0x2ca   : > { %v834_v24 = vsel %vm833_vm2, %v1071_v9, %v831_v21 }
 0x2cb   : > { %836 = vst.msk [vmem:[%s181_s29] sm:$0x3] %vm835_vm3, %v834_v24 }
 0x2cc PF: > { %s14_s12 = sadd.s32 1, %s1225_s12  }
 0x2cd   : > { %p11_p4 = scmp.ge.s32.totalorder %s14_s12, 4  }
 0x2cf   :  { %13 = sbr.rel (!%p11_p4) target bundleno = 1 (0x1), region = 70 }

// kernel: bottleneck_forward.7
= control target key start
LH: loop header
LB: loop body
LE: loop exit
PB: predicated region body
PF: predicated region fallthrough
CT: control target
= control target key end

     0   :  { %s1172_s24 = smov 0   ;;  %s1391_s0 = inlined_call_operand.vmem [shape: bf16[2,256,8], index: 0, kind: input, shape index: {}]   ;;  %s1392_s1 = inlined_call_operand.vmem [shape: f32[1,8], index: 1, kind: input, shape index: {}]   ;;  %s1393_s2 = inlined_call_operand.vmem [shape: f32[1,8], index: 2, kind: input, shape index: {}]   ;;  %s1394_s3 = inlined_call_operand.vmem [shape: bf16[8,32], index: 3, kind: input, shape index: {}]   ;;  %s1395_s4 = inlined_call_operand.vmem [shape: f32[1,32], index: 4, kind: input, shape index: {}]   ;;  %s1396_s5 = inlined_call_operand.vmem [shape: f32[1,32], index: 5, kind: input, shape index: {}]   ;;  %s1397_s6 = inlined_call_operand.vmem [shape: f32[2,32,256], index: 6, kind: input, shape index: {}]   ;;  %s1398_s7 = inlined_call_operand.vmem [shape: f32[2,32,256], index: 7, kind: output, shape index: {}]  }
   0x1 LB: > { %s946_s25 = sadd.s32 4294967295, %s1130_s24   ;;  %p950_p0 = scmp.ge.s32.totalorder %s1130_s24, 1  ;;  %s1130_s24 = sphi %s1172_s24, %s17_s24  }
   0x2   : > { %p247_p1 = scmp.lt.s32.totalorder %s1130_s24, 3 }
   0x4   : > { %p248_p2 = pnand %p950_p0, %p247_p1 }
   0x5   : > { %v490_v0 = vld [vmem:[%s1394_s3] sm:$0xf] (!%p248_p2)  ;;  %vm540_vm0 = vcmask (!%p248_p2), 1043456   ;;  %p284_p3 = scmp.lt.s32.totalorder (!%p248_p2), %s946_s25, 1  ;;  %vm491_vm1 = vcmask (!%p248_p2), 64512  }
   0x6   : > { %251 = sbr.rel (%p248_p2) target bundleno = 392 (0x188), region = 48  ;;  %1114 = vmatprep.subr.msk.bf16.mxu0 (!%p248_p2), %vm540_vm0, %v490_v0  ;;  %1115 = vmatprep.subr.msk.bf16.mxu1 (!%p248_p2), %vm540_vm0, %v490_v0  ;;  %v542_v1 = vsel (!%p248_p2), %vm540_vm0, %v490_v0, 0  ;;  %v1194_v2 = vld [vmem:[%s1392_s1] ss:$0 sm:$0xff] (!%p248_p2) }
   0x7   : > { %1079 = vmatpush3.bf16.msra.mxu0 (!%p248_p2), %v542_v1  ;;  %1113 = vmatpush3.bf16.msra.mxu1 (!%p248_p2), %v542_v1  ;;  %v1203_v11 = vld [vmem:[%s1393_s2] ss:$0 sm:$0xff] (!%p248_p2) }
   0xd   : > { %s1400_s25 = smov (!%p284_p3, %s946_s25), 1 }
   0xe   : > { %s979_s28 = sshll.u32 %s1400_s25, 7  ;;  %s980_s17 = sshll.u32 %s1400_s25, 6 }
   0xf   : > { %s1189_s8 = scalar_lea.vmem %s1391_s0, %s979_s28  ;;  %s293_s20 = scalar_lea.vmem %s1397_s6, %s980_s17 }
  0x10   : > { %v983_v3 = vld [vmem:[%s1189_s8] sm:$0xff]   ;;  %v1046_v5 = vld [vmem:[%s1189_s8 + $0x8] sm:$0xff]   ;;  %v1047_v32 = vld [vmem:[%s1189_s8 + $0x10] sm:$0xff]   ;;  %s1378_s23 = scalar_lea.vmem %s1398_s7, %s980_s17 }
  0x11   : > { %v1053_v4 = vld [vmem:[%s1189_s8 + $0x40] sm:$0xff]   ;;  %v984_v6 = vunpack.c.l.bf16 %v983_v3  ;;  %v985_v7 = vunpack.c.h.bf16 %v983_v3  ;;  %v1054_v10 = vld [vmem:[%s1189_s8 + $0x48] sm:$0xff]   ;;  %v988_v12 = vunpack.c.l.bf16 %v1046_v5  ;;  %v989_v13 = vunpack.c.h.bf16 %v1046_v5  ;;  %v1055_v37 = vld [vmem:[%s1189_s8 + $0x50] sm:$0xff]  }
  0x12   : > { %v1016_v8 = vunpack.c.l.bf16 %v1053_v4  ;;  %v1017_v9 = vunpack.c.h.bf16 %v1053_v4  ;;  %v1020_v14 = vunpack.c.l.bf16 %v1054_v10  ;;  %v1021_v15 = vunpack.c.h.bf16 %v1054_v10  ;;  %v1048_v42 = vld [vmem:[%s1189_s8 + $0x18] sm:$0xff]   ;;  %v1049_v5 = vld [vmem:[%s1189_s8 + $0x20] sm:$0xff]  }
  0x13   : > { %v371_v16 = vmul.f32 %v984_v6, %v1194_v2  ;;  %v372_v17 = vmul.f32 %v985_v7, %v1194_v2  ;;  %v373_v20 = vmul.f32 %v988_v12, %v1194_v2  ;;  %v374_v21 = vmul.f32 %v989_v13, %v1194_v2  ;;  %v1056_v47 = vld [vmem:[%s1189_s8 + $0x58] sm:$0xff]  }
  0x14   : > { %v387_v18 = vmul.f32 %v1016_v8, %v1194_v2  ;;  %v388_v19 = vmul.f32 %v1017_v9, %v1194_v2  ;;  %v389_v22 = vmul.f32 %v1020_v14, %v1194_v2  ;;  %v390_v23 = vmul.f32 %v1021_v15, %v1194_v2  ;;  %v1057_v15 = vld [vmem:[%s1189_s8 + $0x60] sm:$0xff]  }
  0x15   : > { %v410_v24 = vadd.f32 %v1203_v11, %v371_v16  ;;  %v411_v25 = vadd.f32 %v1203_v11, %v372_v17  ;;  %v412_v28 = vadd.f32 %v1203_v11, %v373_v20  ;;  %v413_v29 = vadd.f32 %v1203_v11, %v374_v21  ;;  %v1050_v20 = vld [vmem:[%s1189_s8 + $0x28] sm:$0xff]  }
  0x16   : > { %v426_v26 = vadd.f32 %v1203_v11, %v387_v18  ;;  %v427_v27 = vadd.f32 %v1203_v11, %v388_v19  ;;  %v428_v30 = vadd.f32 %v1203_v11, %v389_v22  ;;  %v429_v31 = vadd.f32 %v1203_v11, %v390_v23 }
  0x17   : > { %v442_v33 = vmax.f32 %v410_v24, 0.0  ;;  %v443_v34 = vmax.f32 %v411_v25, 0.0  ;;  %v444_v38 = vmax.f32 %v412_v28, 0.0  ;;  %v445_v39 = vmax.f32 %v413_v29, 0.0  ;;  %v1058_v25 = vld [vmem:[%s1189_s8 + $0x68] sm:$0xff]  }
  0x18   : > { %v458_v35 = vmax.f32 %v426_v26, 0.0  ;;  %v459_v36 = vmax.f32 %v427_v27, 0.0  ;;  %v460_v40 = vmax.f32 %v428_v30, 0.0  ;;  %v461_v41 = vmax.f32 %v429_v31, 0.0 }
  0x19   : > { %v474_v43 = vpack.c.bf16 %v443_v34, %v442_v33  ;;  %v992_v45 = vunpack.c.l.bf16 %v1047_v32  ;;  %v993_v46 = vunpack.c.h.bf16 %v1047_v32  ;;  %v475_v48 = vpack.c.bf16 %v445_v39, %v444_v38 }
  0x1a   : > { %v482_v44 = vpack.c.bf16 %v459_v36, %v458_v35  ;;  %v483_v49 = vpack.c.bf16 %v461_v41, %v460_v40  ;;  %v1024_v50 = vunpack.c.l.bf16 %v1055_v37  ;;  %v1025_v51 = vunpack.c.h.bf16 %v1055_v37 }
  0x1b   : > { %1080 = vmatprep.mubr.msk.bf16.mxu0 %vm491_vm1, %v474_v43  ;;  %v375_v52 = vmul.f32 %v992_v45, %v1194_v2  ;;  %v376_v53 = vmul.f32 %v993_v46, %v1194_v2  ;;  %v996_v54 = vunpack.c.l.bf16 %v1048_v42  ;;  %v997_v55 = vunpack.c.h.bf16 %v1048_v42  ;;  %v1051_v42 = vld [vmem:[%s1189_s8 + $0x30] sm:$0xff]  }
  0x1c   : > { %1096 = vmatprep.mubr.msk.bf16.mxu1 %vm491_vm1, %v482_v44  ;;  %1081 = vmatmul.mubr.msk.bf16.vlgmr.msra.gmra.mrb[0].mxu0 %vm491_vm1, %v475_v48  ;;  %v391_v56 = vmul.f32 %v1024_v50, %v1194_v2  ;;  %v392_v57 = vmul.f32 %v1025_v51, %v1194_v2  ;;  %v1028_v58 = vunpack.c.l.bf16 %v1056_v47  ;;  %v1029_v59 = vunpack.c.h.bf16 %v1056_v47 }
  0x1d   : > { %1097 = vmatmul.mubr.msk.bf16.vlgmr.msra.gmra.mrb[0].mxu1 %vm491_vm1, %v483_v49  ;;  %v414_v60 = vadd.f32 %v1203_v11, %v375_v52  ;;  %v415_v61 = vadd.f32 %v1203_v11, %v376_v53  ;;  %v377_v62 = vmul.f32 %v996_v54, %v1194_v2  ;;  %v378_v63 = vmul.f32 %v997_v55, %v1194_v2  ;;  %v1059_v55 = vld [vmem:[%s1189_s8 + $0x70] sm:$0xff]  }
  0x1e   : > { %v430_v0 = vadd.f32 %v1203_v11, %v391_v56  ;;  %v431_v1 = vadd.f32 %v1203_v11, %v392_v57  ;;  %v393_v3 = vmul.f32 %v1028_v58, %v1194_v2  ;;  %v394_v4 = vmul.f32 %v1029_v59, %v1194_v2 }
  0x1f   : > { %v446_v6 = vmax.f32 %v414_v60, 0.0  ;;  %v447_v7 = vmax.f32 %v415_v61, 0.0  ;;  %v416_v8 = vadd.f32 %v1203_v11, %v377_v62  ;;  %v417_v9 = vadd.f32 %v1203_v11, %v378_v63  ;;  %v1052_v60 = vld [vmem:[%s1189_s8 + $0x38] sm:$0xff]  }
  0x20   : > { %v462_v10 = vmax.f32 %v430_v0, 0.0  ;;  %v463_v12 = vmax.f32 %v431_v1, 0.0  ;;  %v432_v13 = vadd.f32 %v1203_v11, %v393_v3  ;;  %v433_v14 = vadd.f32 %v1203_v11, %v394_v4  ;;  %v1060_v1 = vld [vmem:[%s1189_s8 + $0x78] sm:$0xff]  }
  0x21   : > { %v476_v16 = vpack.c.bf16 %v447_v7, %v446_v6  ;;  %v448_v17 = vmax.f32 %v416_v8, 0.0  ;;  %v449_v18 = vmax.f32 %v417_v9, 0.0  ;;  %v1000_v19 = vunpack.c.l.bf16 %v1049_v5 }
  0x22   : > { %v484_v21 = vpack.c.bf16 %v463_v12, %v462_v10  ;;  %v464_v22 = vmax.f32 %v432_v13, 0.0  ;;  %v465_v23 = vmax.f32 %v433_v14, 0.0  ;;  %v1001_v24 = vunpack.c.h.bf16 %v1049_v5 }
  0x23   : > { %1084 = vmatprep.mubr.msk.bf16.mxu0 %vm491_vm1, %v476_v16  ;;  %v477_v26 = vpack.c.bf16 %v449_v18, %v448_v17  ;;  %v379_v27 = vmul.f32 %v1000_v19, %v1194_v2  ;;  %v1032_v28 = vunpack.c.l.bf16 %v1057_v15  ;;  %v1033_v29 = vunpack.c.h.bf16 %v1057_v15 }
  0x24   : > { %1100 = vmatprep.mubr.msk.bf16.mxu1 %vm491_vm1, %v484_v21  ;;  %v485_v30 = vpack.c.bf16 %v465_v23, %v464_v22  ;;  %v380_v31 = vmul.f32 %v1001_v24, %v1194_v2  ;;  %v1004_v32 = vunpack.c.l.bf16 %v1050_v20  ;;  %v1005_v33 = vunpack.c.h.bf16 %v1050_v20 }
  0x25   : > { %1085 = vmatmul.mubr.msk.bf16.gmra.mrb[4].mxu0 %vm491_vm1, %v477_v26  ;;  %v418_v34 = vadd.f32 %v1203_v11, %v379_v27  ;;  %v395_v35 = vmul.f32 %v1032_v28, %v1194_v2  ;;  %v396_v36 = vmul.f32 %v1033_v29, %v1194_v2  ;;  %v1036_v37 = vunpack.c.l.bf16 %v1058_v25 }
  0x26   : > { %1101 = vmatmul.mubr.msk.bf16.gmra.mrb[4].mxu1 %vm491_vm1, %v485_v30  ;;  %v419_v38 = vadd.f32 %v1203_v11, %v380_v31  ;;  %v381_v39 = vmul.f32 %v1004_v32, %v1194_v2  ;;  %v382_v40 = vmul.f32 %v1005_v33, %v1194_v2  ;;  %v1037_v41 = vunpack.c.h.bf16 %v1058_v25 }
  0x27   : > { %v450_v43 = vmax.f32 %v418_v34, 0.0  ;;  %v434_v44 = vadd.f32 %v1203_v11, %v395_v35  ;;  %v435_v45 = vadd.f32 %v1203_v11, %v396_v36  ;;  %v397_v46 = vmul.f32 %v1036_v37, %v1194_v2 }
  0x28   : > { %v451_v47 = vmax.f32 %v419_v38, 0.0  ;;  %v420_v48 = vadd.f32 %v1203_v11, %v381_v39  ;;  %v421_v49 = vadd.f32 %v1203_v11, %v382_v40  ;;  %v398_v50 = vmul.f32 %v1037_v41, %v1194_v2 }
  0x29   : > { %v466_v51 = vmax.f32 %v434_v44, 0.0  ;;  %v467_v52 = vmax.f32 %v435_v45, 0.0  ;;  %v436_v53 = vadd.f32 %v1203_v11, %v397_v46  ;;  %v1008_v54 = vunpack.c.l.bf16 %v1051_v42 }
  0x2a   : > { %v478_v56 = vpack.c.bf16 %v451_v47, %v450_v43  ;;  %v452_v57 = vmax.f32 %v420_v48, 0.0  ;;  %v453_v58 = vmax.f32 %v421_v49, 0.0  ;;  %v437_v59 = vadd.f32 %v1203_v11, %v398_v50  ;;  %v1305_v43 = vld [vmem:[%s1396_s5] ss:$0 sm:$0xff] }
  0x2b   : > { %v486_v61 = vpack.c.bf16 %v467_v52, %v466_v51  ;;  %v468_v62 = vmax.f32 %v436_v53, 0.0  ;;  %v1009_v63 = vunpack.c.h.bf16 %v1051_v42  ;;  %v383_v0 = vmul.f32 %v1008_v54, %v1194_v2 }
  0x2c   : > { %1088 = vmatprep.mubr.msk.bf16.mxu0 %vm491_vm1, %v478_v56  ;;  %v479_v3 = vpack.c.bf16 %v453_v58, %v452_v57  ;;  %v469_v4 = vmax.f32 %v437_v59, 0.0  ;;  %v1040_v5 = vunpack.c.l.bf16 %v1059_v55  ;;  %v1041_v6 = vunpack.c.h.bf16 %v1059_v55 }
  0x2d   : > { %1104 = vmatprep.mubr.msk.bf16.mxu1 %vm491_vm1, %v486_v61  ;;  %v384_v7 = vmul.f32 %v1009_v63, %v1194_v2  ;;  %v422_v8 = vadd.f32 %v1203_v11, %v383_v0  ;;  %v1012_v9 = vunpack.c.l.bf16 %v1052_v60  ;;  %v1013_v10 = vunpack.c.h.bf16 %v1052_v60 }
  0x2e   : > { %1089 = vmatmul.mubr.msk.bf16.gmra.mrb[8].mxu0 %vm491_vm1, %v479_v3  ;;  %v487_v12 = vpack.c.bf16 %v469_v4, %v468_v62  ;;  %v399_v13 = vmul.f32 %v1040_v5, %v1194_v2  ;;  %v400_v14 = vmul.f32 %v1041_v6, %v1194_v2  ;;  %v1044_v15 = vunpack.c.l.bf16 %v1060_v1 }
  0x2f   : > { %v423_v16 = vadd.f32 %v1203_v11, %v384_v7  ;;  %v454_v17 = vmax.f32 %v422_v8, 0.0  ;;  %v385_v18 = vmul.f32 %v1012_v9, %v1194_v2  ;;  %v386_v19 = vmul.f32 %v1013_v10, %v1194_v2 }
  0x30   : > { %1105 = vmatmul.mubr.msk.bf16.gmra.mrb[8].mxu1 %vm491_vm1, %v487_v12  ;;  %v438_v20 = vadd.f32 %v1203_v11, %v399_v13  ;;  %v439_v21 = vadd.f32 %v1203_v11, %v400_v14  ;;  %v1045_v22 = vunpack.c.h.bf16 %v1060_v1  ;;  %v401_v23 = vmul.f32 %v1044_v15, %v1194_v2 }
  0x31   : > { %v455_v24 = vmax.f32 %v423_v16, 0.0  ;;  %v424_v25 = vadd.f32 %v1203_v11, %v385_v18  ;;  %v425_v26 = vadd.f32 %v1203_v11, %v386_v19 }
  0x32   : > { %v470_v27 = vmax.f32 %v438_v20, 0.0  ;;  %v471_v28 = vmax.f32 %v439_v21, 0.0  ;;  %v402_v29 = vmul.f32 %v1045_v22, %v1194_v2  ;;  %v440_v30 = vadd.f32 %v1203_v11, %v401_v23  ;;  %v1300_v2 = vld [vmem:[%s1395_s4] ss:$0 sm:$0xff] }
  0x33   : > { %v480_v31 = vpack.c.bf16 %v455_v24, %v454_v17  ;;  %v456_v32 = vmax.f32 %v424_v25, 0.0  ;;  %v457_v33 = vmax.f32 %v425_v26, 0.0 }
  0x34   : > { %v488_v34 = vpack.c.bf16 %v471_v28, %v470_v27  ;;  %v441_v35 = vadd.f32 %v1203_v11, %v402_v29  ;;  %v472_v36 = vmax.f32 %v440_v30, 0.0 }
  0x35   : > { %1092 = vmatprep.mubr.msk.bf16.mxu0 %vm491_vm1, %v480_v31  ;;  %v481_v37 = vpack.c.bf16 %v457_v33, %v456_v32 }
  0x36   : > { %1108 = vmatprep.mubr.msk.bf16.mxu1 %vm491_vm1, %v488_v34  ;;  %v473_v38 = vmax.f32 %v441_v35, 0.0 }
  0x37   : > { %1093 = vmatmul.mubr.msk.bf16.gmra.mrb[12].mxu0 %vm491_vm1, %v481_v37 }
  0x38   : > { %v489_v39 = vpack.c.bf16 %v473_v38, %v472_v36 }
  0x3a   : > { %1109 = vmatmul.mubr.msk.bf16.gmra.mrb[12].mxu1 %vm491_vm1, %v489_v39 }
  0xef   : > { %v1082_v40 = vpop.f32.mrb[0].mxu0 }
  0xf0   : > { %v1098_v41 = vpop.f32.mrb[0].mxu1  ;;  %v578_v11 = vpop.f32.mrb[1].mxu0  ;;  %v714_v54 = vmul.f32 %v1082_v40, %v1300_v2 }
  0xf1   : > { %v642_v42 = vpop.f32.mrb[1].mxu1  ;;  %v712_v44 = vmul.f32 %v1300_v2, %v578_v11  ;;  %v1083_v46 = vpop.f32.mrb[2].mxu0  ;;  %v730_v55 = vmul.f32 %v1098_v41, %v1300_v2 }
  0xf2   : > { %v728_v45 = vmul.f32 %v1300_v2, %v642_v42  ;;  %v1099_v47 = vpop.f32.mrb[2].mxu1  ;;  %v581_v48 = vpop.f32.mrb[3].mxu0  ;;  %v715_v63 = vmul.f32 %v1083_v46, %v1300_v2  ;;  %v753_v3 = vadd.f32 %v1305_v43, %v714_v54 }
  0xf3   : > { %v645_v49 = vpop.f32.mrb[3].mxu1  ;;  %v713_v50 = vmul.f32 %v1300_v2, %v581_v48  ;;  %v751_v53 = vadd.f32 %v1305_v43, %v712_v44  ;;  %v731_v0 = vmul.f32 %v1099_v47, %v1300_v2  ;;  %v769_v1 = vadd.f32 %v1305_v43, %v730_v55 }
  0xf4   : > { %v729_v51 = vmul.f32 %v1300_v2, %v645_v49  ;;  %v767_v52 = vadd.f32 %v1305_v43, %v728_v45  ;;  %v754_v10 = vadd.f32 %v1305_v43, %v715_v63 }
  0xf5   : > { %783 = vxpose.xlu0.b32.start [1/16] (narrow) %v751_v53, 32  ;;  %v752_v57 = vadd.f32 %v1305_v43, %v713_v50  ;;  %v770_v9 = vadd.f32 %v1305_v43, %v731_v0 }
  0xf6   : > { %815 = vxpose.xlu1.b32.start [1/16] (narrow) %v767_v52, 32  ;;  %v768_v56 = vadd.f32 %v1305_v43, %v729_v51 }
  0xf8   : > { %v1086_v58 = vpop.f32.mrb[4].mxu0 }
  0xf9   : > { %784 = vxpose.xlu0.b32.cont [2/16] (narrow) %v752_v57, 32  ;;  %v1102_v59 = vpop.f32.mrb[4].mxu1  ;;  %v594_v60 = vpop.f32.mrb[5].mxu0  ;;  %v718_v24 = vmul.f32 %v1086_v58, %v1300_v2 }
  0xfa   : > { %816 = vxpose.xlu1.b32.cont [2/16] (narrow) %v768_v56, 32  ;;  %v658_v61 = vpop.f32.mrb[5].mxu1  ;;  %v1087_v62 = vpop.f32.mrb[6].mxu0  ;;  %v716_v8 = vmul.f32 %v1300_v2, %v594_v60  ;;  %v734_v25 = vmul.f32 %v1102_v59, %v1300_v2 }
  0xfb   : > { %v1103_v4 = vpop.f32.mrb[6].mxu1  ;;  %v597_v5 = vpop.f32.mrb[7].mxu0  ;;  %v732_v7 = vmul.f32 %v1300_v2, %v658_v61  ;;  %v719_v29 = vmul.f32 %v1087_v62, %v1300_v2  ;;  %v757_v32 = vadd.f32 %v1305_v43, %v718_v24  ;;  %v852_v24 = vld [vmem:[%s293_s20 + $0x28] sm:$0xff] }
  0xfc   : > { %v661_v6 = vpop.f32.mrb[7].mxu1  ;;  %v755_v13 = vadd.f32 %v1305_v43, %v716_v8  ;;  %v717_v16 = vmul.f32 %v1300_v2, %v597_v5  ;;  %v735_v30 = vmul.f32 %v1103_v4, %v1300_v2  ;;  %v773_v31 = vadd.f32 %v1305_v43, %v734_v25  ;;  %v851_v25 = vld [vmem:[%s293_s20 + $0x20] sm:$0xff] }
  0xfd   : > { %785 = vxpose.xlu0.b32.cont [3/16] (narrow) %v753_v3, 32  ;;  %v771_v12 = vadd.f32 %v1305_v43, %v732_v7  ;;  %v733_v17 = vmul.f32 %v1300_v2, %v661_v6  ;;  %v758_v41 = vadd.f32 %v1305_v43, %v719_v29 }
  0xfe   : > { %817 = vxpose.xlu1.b32.cont [3/16] (narrow) %v769_v1, 32  ;;  %v756_v27 = vadd.f32 %v1305_v43, %v717_v16  ;;  %v774_v40 = vadd.f32 %v1305_v43, %v735_v30 }
  0xff   : > { %v772_v26 = vadd.f32 %v1305_v43, %v733_v17  ;;  %v849_v17 = vld [vmem:[%s293_s20 + $0x10] sm:$0xff] }
 0x101   : > { %786 = vxpose.xlu0.b32.cont [4/16] (narrow) %v754_v10, 32  ;;  %v1090_v14 = vpop.f32.mrb[8].mxu0 }
 0x102   : > { %818 = vxpose.xlu1.b32.cont [4/16] (narrow) %v770_v9, 32  ;;  %v610_v15 = vpop.f32.mrb[9].mxu0  ;;  %v722_v48 = vmul.f32 %v1090_v14, %v1300_v2 }
 0x103   : > { %v1106_v18 = vpop.f32.mrb[8].mxu1  ;;  %v1091_v19 = vpop.f32.mrb[10].mxu0  ;;  %v720_v36 = vmul.f32 %v1300_v2, %v610_v15 }
 0x104   : > { %v674_v20 = vpop.f32.mrb[9].mxu1  ;;  %v613_v21 = vpop.f32.mrb[11].mxu0  ;;  %v738_v49 = vmul.f32 %v1106_v18, %v1300_v2  ;;  %v723_v52 = vmul.f32 %v1091_v19, %v1300_v2  ;;  %v761_v55 = vadd.f32 %v1305_v43, %v722_v48 }
 0x105   : > { %787 = vxpose.xlu0.b32.cont [5/16] (narrow) %v755_v13, 32  ;;  %v1107_v22 = vpop.f32.mrb[10].mxu1  ;;  %v736_v35 = vmul.f32 %v1300_v2, %v674_v20  ;;  %v759_v45 = vadd.f32 %v1305_v43, %v720_v36  ;;  %v721_v46 = vmul.f32 %v1300_v2, %v613_v21  ;;  %v847_v13 = vld [vmem:[%s293_s20] sm:$0xff] }
 0x106   : > { %819 = vxpose.xlu1.b32.cont [5/16] (narrow) %v771_v12, 32  ;;  %v677_v23 = vpop.f32.mrb[11].mxu1  ;;  %v739_v53 = vmul.f32 %v1107_v22, %v1300_v2  ;;  %v777_v54 = vadd.f32 %v1305_v43, %v738_v49  ;;  %v762_v59 = vadd.f32 %v1305_v43, %v723_v52  ;;  %v848_v12 = vld [vmem:[%s293_s20 + $0x8] sm:$0xff] }
 0x107   : > { %v775_v44 = vadd.f32 %v1305_v43, %v736_v35  ;;  %v737_v47 = vmul.f32 %v1300_v2, %v677_v23  ;;  %v760_v51 = vadd.f32 %v1305_v43, %v721_v46 }
 0x108   : > { %v778_v58 = vadd.f32 %v1305_v43, %v739_v53 }
 0x109   : > { %788 = vxpose.xlu0.b32.cont [6/16] (narrow) %v756_v27, 32  ;;  %v776_v50 = vadd.f32 %v1305_v43, %v737_v47 }
 0x10a   : > { %820 = vxpose.xlu1.b32.cont [6/16] (narrow) %v772_v26, 32  ;;  %v1094_v28 = vpop.f32.mrb[12].mxu0 }
 0x10b   : > { %v626_v33 = vpop.f32.mrb[13].mxu0  ;;  %v726_v0 = vmul.f32 %v1094_v28, %v1300_v2 }
 0x10c   : > { %v1095_v34 = vpop.f32.mrb[14].mxu0  ;;  %v724_v57 = vmul.f32 %v1300_v2, %v626_v33  ;;  %v853_v33 = vld [vmem:[%s293_s20 + $0x30] sm:$0xff] }
 0x10d   : > { %789 = vxpose.xlu0.b32.cont [7/16] (narrow) %v757_v32, 32  ;;  %v1110_v37 = vpop.f32.mrb[12].mxu1  ;;  %v629_v38 = vpop.f32.mrb[15].mxu0  ;;  %v727_v5 = vmul.f32 %v1095_v34, %v1300_v2  ;;  %v765_v8 = vadd.f32 %v1305_v43, %v726_v0  ;;  %v854_v32 = vld [vmem:[%s293_s20 + $0x38] sm:$0xff] }
 0x10e   : > { %821 = vxpose.xlu1.b32.cont [7/16] (narrow) %v773_v31, 32  ;;  %v690_v39 = vpop.f32.mrb[13].mxu1  ;;  %v763_v61 = vadd.f32 %v1305_v43, %v724_v57  ;;  %v725_v62 = vmul.f32 %v1300_v2, %v629_v38  ;;  %v742_v1 = vmul.f32 %v1110_v37, %v1300_v2 }
 0x10f   : > { %v1111_v11 = vpop.f32.mrb[14].mxu1  ;;  %v740_v56 = vmul.f32 %v1300_v2, %v690_v39  ;;  %v766_v10 = vadd.f32 %v1305_v43, %v727_v5 }
 0x110   : > { %v693_v42 = vpop.f32.mrb[15].mxu1  ;;  %v764_v4 = vadd.f32 %v1305_v43, %v725_v62  ;;  %v743_v6 = vmul.f32 %v1111_v11, %v1300_v2  ;;  %v781_v7 = vadd.f32 %v1305_v43, %v742_v1 }
 0x111   : > { %790 = vxpose.xlu0.b32.cont [8/16] (narrow) %v758_v41, 32  ;;  %v779_v60 = vadd.f32 %v1305_v43, %v740_v56  ;;  %v741_v63 = vmul.f32 %v1300_v2, %v693_v42 }
 0x112   : > { %822 = vxpose.xlu1.b32.cont [8/16] (narrow) %v774_v40, 32  ;;  %v782_v9 = vadd.f32 %v1305_v43, %v743_v6 }
 0x113   : > { %v780_v3 = vadd.f32 %v1305_v43, %v741_v63  ;;  %v850_v43 = vld [vmem:[%s293_s20 + $0x18] sm:$0xff] }
 0x115   : > { %791 = vxpose.xlu0.b32.cont [9/16] (narrow) %v759_v45, 32 }
 0x116   : > { %823 = vxpose.xlu1.b32.cont [9/16] (narrow) %v775_v44, 32 }
 0x119   : > { %792 = vxpose.xlu0.b32.cont [10/16] (narrow) %v760_v51, 32 }
 0x11a   : > { %824 = vxpose.xlu1.b32.cont [10/16] (narrow) %v776_v50, 32 }
 0x11d   : > { %793 = vxpose.xlu0.b32.cont [11/16] (narrow) %v761_v55, 32 }
 0x11e   : > { %825 = vxpose.xlu1.b32.cont [11/16] (narrow) %v777_v54, 32 }
 0x121   : > { %794 = vxpose.xlu0.b32.cont [12/16] (narrow) %v762_v59, 32 }
 0x122   : > { %826 = vxpose.xlu1.b32.cont [12/16] (narrow) %v778_v58, 32 }
 0x125   : > { %795 = vxpose.xlu0.b32.cont [13/16] (narrow) %v763_v61, 32 }
 0x126   : > { %827 = vxpose.xlu1.b32.cont [13/16] (narrow) %v779_v60, 32 }
 0x129   : > { %796 = vxpose.xlu0.b32.cont [14/16] (narrow) %v764_v4, 32 }
 0x12a   : > { %828 = vxpose.xlu1.b32.cont [14/16] (narrow) %v780_v3, 32 }
 0x12d   : > { %797 = vxpose.xlu0.b32.cont [15/16] (narrow) %v765_v8, 32 }
 0x12e   : > { %829 = vxpose.xlu1.b32.cont [15/16] (narrow) %v781_v7, 32 }
 0x131   : > { %798 = vxpose.xlu0.b32.end [16/16] (narrow) %v766_v10, 32 }
 0x132   : > { %830 = vxpose.xlu1.b32.end [16/16] (narrow) %v782_v9, 32 }
 0x175   : > { %v799_v14 = vpop.trf.xlu0 }
 0x176   : > { %v831_v2 = vpop.trf.xlu1  ;;  %v855_v16 = vadd.f32 %v847_v13, %v799_v14 }
 0x177   : > { %v856_v15 = vadd.f32 %v848_v12, %v831_v2 }
 0x178   : > { %v863_v19 = vmax.f32 %v855_v16, 0.0 }
 0x179   : > { %v864_v18 = vmax.f32 %v856_v15, 0.0  ;;  %v800_v21 = vpop.trf.xlu0 }
 0x17a   : > { %v832_v20 = vpop.trf.xlu1  ;;  %871 = vst [vmem:[%s1378_s23] sm:$0xff] %v863_v19  ;;  %v857_v23 = vadd.f32 %v849_v17, %v800_v21 }
 0x17b   : > { %872 = vst [vmem:[%s1378_s23 + $0x8] sm:$0xff] %v864_v18  ;;  %v858_v22 = vadd.f32 %v850_v43, %v832_v20 }
 0x17c   : > { %v865_v27 = vmax.f32 %v857_v23, 0.0 }
 0x17d   : > { %v866_v26 = vmax.f32 %v858_v22, 0.0  ;;  %v801_v29 = vpop.trf.xlu0 }
 0x17e   : > { %v833_v28 = vpop.trf.xlu1  ;;  %873 = vst [vmem:[%s1378_s23 + $0x10] sm:$0xff] %v865_v27  ;;  %v859_v31 = vadd.f32 %v851_v25, %v801_v29 }
 0x17f   : > { %874 = vst [vmem:[%s1378_s23 + $0x18] sm:$0xff] %v866_v26  ;;  %v860_v30 = vadd.f32 %v852_v24, %v833_v28 }
 0x180   : > { %v867_v35 = vmax.f32 %v859_v31, 0.0 }
 0x181   : > { %v868_v34 = vmax.f32 %v860_v30, 0.0  ;;  %v802_v37 = vpop.trf.xlu0 }
 0x182   : > { %v834_v36 = vpop.trf.xlu1  ;;  %875 = vst [vmem:[%s1378_s23 + $0x20] sm:$0xff] %v867_v35  ;;  %v861_v39 = vadd.f32 %v853_v33, %v802_v37 }
 0x183   : > { %876 = vst [vmem:[%s1378_s23 + $0x28] sm:$0xff] %v868_v34  ;;  %v862_v38 = vadd.f32 %v854_v32, %v834_v36 }
 0x184   : > { %v869_v41 = vmax.f32 %v861_v39, 0.0 }
 0x185   : > { %v870_v40 = vmax.f32 %v862_v38, 0.0 }
 0x186   : > { %877 = vst [vmem:[%s1378_s23 + $0x30] sm:$0xff] %v869_v41 }
 0x187   : > { %878 = vst [vmem:[%s1378_s23 + $0x38] sm:$0xff] %v870_v40 }
 0x188 PF: > { %s17_s24 = sadd.s32 1, %s1130_s24  }
 0x189   : > { %p14_p4 = scmp.ge.s32.totalorder %s17_s24, 4  }
 0x18b   :  { %16 = sbr.rel (!%p14_p4) target bundleno = 1 (0x1), region = 81 }

// kernel: bottleneck_forward.6
= control target key start
LH: loop header
LB: loop body
LE: loop exit
PB: predicated region body
PF: predicated region fallthrough
CT: control target
= control target key end

     0   :  { %s1171_s15 = smov 0   ;;  %s1465_s0 = inlined_call_operand.vmem [shape: bf16[2,256,8], index: 0, kind: input, shape index: {}]   ;;  %s1466_s1 = inlined_call_operand.vmem [shape: f32[1,8], index: 1, kind: input, shape index: {}]   ;;  %s1467_s2 = inlined_call_operand.vmem [shape: f32[1,8], index: 2, kind: input, shape index: {}]   ;;  %s1468_s3 = inlined_call_operand.vmem [shape: bf16[8,32], index: 3, kind: input, shape index: {}]   ;;  %s1469_s4 = inlined_call_operand.vmem [shape: f32[2,2,32], index: 4, kind: output, shape index: {}]  }
   0x1 LB: > { %s834_s16 = sadd.s32 4294967295, %s1143_s15   ;;  %p838_p0 = scmp.ge.s32.totalorder %s1143_s15, 1  ;;  %s1143_s15 = sphi %s1171_s15, %s14_s15  }
   0x2   : > { %p162_p1 = scmp.lt.s32.totalorder %s1143_s15, 3 }
   0x4   : > { %p163_p2 = pnand %p838_p0, %p162_p1 }
   0x5   : > { %v387_v0 = vld [vmem:[%s1468_s3] sm:$0xf] (!%p163_p2)  ;;  %vm437_vm0 = vcmask (!%p163_p2), 1043456   ;;  %p187_p3 = scmp.lt.s32.totalorder (!%p163_p2), %s834_s16, 1  ;;  %vm388_vm1 = vcmask (!%p163_p2), 64512   ;;  %vm777_vm2 = vcmask (!%p163_p2), 1040384  }
   0x6   : > { %166 = sbr.rel (%p163_p2) target bundleno = 560 (0x230), region = 36  ;;  %1127 = vmatprep.subr.msk.bf16.mxu0 (!%p163_p2), %vm437_vm0, %v387_v0  ;;  %v439_v1 = vsel (!%p163_p2), %vm437_vm0, %v387_v0, 0  ;;  %v1193_v2 = vld [vmem:[%s1466_s1] ss:$0 sm:$0xff] (!%p163_p2)  ;;  %vm779_vm3 = vcmask (!%p163_p2), 254976  }
   0x7   : > { %1030 = vmatpush3.bf16.msra.mxu0 (!%p163_p2), %v439_v1  ;;  %v1202_v11 = vld [vmem:[%s1467_s2] ss:$0 sm:$0xff] (!%p163_p2) }
   0xd   : > { %s1471_s16 = smov (!%p187_p3, %s834_s16), 1 }
   0xe   : > { %s862_s19 = sshll.u32 %s1471_s16, 7  ;;  %s841_s27 = sshll.u32 %s1471_s16, 1 }
   0xf   : > { %s1188_s22 = scalar_lea.vmem %s1465_s0, %s862_s19  ;;  %s195_s30 = scalar_lea.vmem %s1469_s4, %s841_s27 }
  0x10   : > { %v864_v3 = vld [vmem:[%s1188_s22] sm:$0xff]   ;;  %v927_v4 = vld [vmem:[%s1188_s22 + $0x8] sm:$0xff]   ;;  %v928_v5 = vld [vmem:[%s1188_s22 + $0x10] sm:$0xff]  }
  0x11   : > { %v865_v6 = vunpack.c.l.bf16 %v864_v3  ;;  %v866_v7 = vunpack.c.h.bf16 %v864_v3  ;;  %v869_v8 = vunpack.c.l.bf16 %v927_v4  ;;  %v870_v9 = vunpack.c.h.bf16 %v927_v4  ;;  %v929_v10 = vld [vmem:[%s1188_s22 + $0x18] sm:$0xff]   ;;  %v930_v30 = vld [vmem:[%s1188_s22 + $0x20] sm:$0xff]   ;;  %v931_v35 = vld [vmem:[%s1188_s22 + $0x28] sm:$0xff]  }
  0x12   : > { %v873_v12 = vunpack.c.l.bf16 %v928_v5  ;;  %v874_v13 = vunpack.c.h.bf16 %v928_v5  ;;  %v877_v14 = vunpack.c.l.bf16 %v929_v10  ;;  %v878_v15 = vunpack.c.h.bf16 %v929_v10  ;;  %v932_v40 = vld [vmem:[%s1188_s22 + $0x30] sm:$0xff]   ;;  %v933_v52 = vld [vmem:[%s1188_s22 + $0x38] sm:$0xff]   ;;  %v934_v63 = vld [vmem:[%s1188_s22 + $0x40] sm:$0xff]  }
  0x13   : > { %v268_v16 = vmul.f32 %v865_v6, %v1193_v2  ;;  %v269_v17 = vmul.f32 %v866_v7, %v1193_v2  ;;  %v270_v18 = vmul.f32 %v869_v8, %v1193_v2  ;;  %v271_v19 = vmul.f32 %v870_v9, %v1193_v2 }
  0x14   : > { %v272_v20 = vmul.f32 %v873_v12, %v1193_v2  ;;  %v273_v21 = vmul.f32 %v874_v13, %v1193_v2  ;;  %v274_v22 = vmul.f32 %v877_v14, %v1193_v2  ;;  %v275_v23 = vmul.f32 %v878_v15, %v1193_v2 }
  0x15   : > { %v307_v24 = vadd.f32 %v1202_v11, %v268_v16  ;;  %v308_v25 = vadd.f32 %v1202_v11, %v269_v17  ;;  %v309_v26 = vadd.f32 %v1202_v11, %v270_v18  ;;  %v310_v27 = vadd.f32 %v1202_v11, %v271_v19 }
  0x16   : > { %v311_v28 = vadd.f32 %v1202_v11, %v272_v20  ;;  %v312_v29 = vadd.f32 %v1202_v11, %v273_v21  ;;  %v313_v38 = vadd.f32 %v1202_v11, %v274_v22  ;;  %v314_v39 = vadd.f32 %v1202_v11, %v275_v23  ;;  %v935_v20 = vld [vmem:[%s1188_s22 + $0x48] sm:$0xff]   ;;  %v936_v21 = vld [vmem:[%s1188_s22 + $0x50] sm:$0xff]  }
  0x17   : > { %v339_v31 = vmax.f32 %v307_v24, 0.0  ;;  %v340_v32 = vmax.f32 %v308_v25, 0.0  ;;  %v341_v33 = vmax.f32 %v309_v26, 0.0  ;;  %v342_v34 = vmax.f32 %v310_v27, 0.0 }
  0x18   : > { %v343_v36 = vmax.f32 %v311_v28, 0.0  ;;  %v344_v37 = vmax.f32 %v312_v29, 0.0  ;;  %v881_v43 = vunpack.c.l.bf16 %v930_v30  ;;  %v882_v44 = vunpack.c.h.bf16 %v930_v30 }
  0x19   : > { %v371_v41 = vpack.c.bf16 %v340_v32, %v339_v31  ;;  %v372_v42 = vpack.c.bf16 %v342_v34, %v341_v33  ;;  %v885_v46 = vunpack.c.l.bf16 %v931_v35  ;;  %v886_v47 = vunpack.c.h.bf16 %v931_v35 }
  0x1a   : > { %v373_v45 = vpack.c.bf16 %v344_v37, %v343_v36  ;;  %v276_v48 = vmul.f32 %v881_v43, %v1193_v2  ;;  %v277_v49 = vmul.f32 %v882_v44, %v1193_v2  ;;  %v889_v50 = vunpack.c.l.bf16 %v932_v40 }
  0x1b   : > { %1031 = vmatprep.mubr.msk.bf16.mxu0 %vm388_vm1, %v371_v41  ;;  %v890_v51 = vunpack.c.h.bf16 %v932_v40  ;;  %v345_v53 = vmax.f32 %v313_v38, 0.0  ;;  %v346_v54 = vmax.f32 %v314_v39, 0.0  ;;  %v278_v55 = vmul.f32 %v885_v46, %v1193_v2  ;;  %v937_v38 = vld [vmem:[%s1188_s22 + $0x58] sm:$0xff]   ;;  %v938_v41 = vld [vmem:[%s1188_s22 + $0x60] sm:$0xff]  }
  0x1c   : > { %1032 = vmatmul.mubr.msk.bf16.vlgmr.msra.gmra.mrb[0].mxu0 %vm388_vm1, %v372_v42  ;;  %v279_v56 = vmul.f32 %v886_v47, %v1193_v2  ;;  %v315_v57 = vadd.f32 %v1202_v11, %v276_v48  ;;  %v316_v58 = vadd.f32 %v1202_v11, %v277_v49  ;;  %v280_v59 = vmul.f32 %v889_v50, %v1193_v2 }
  0x1d   : > { %1035 = vmatprep.mubr.msk.bf16.mxu0 %vm388_vm1, %v373_v45  ;;  %v281_v60 = vmul.f32 %v890_v51, %v1193_v2  ;;  %v893_v61 = vunpack.c.l.bf16 %v933_v52  ;;  %v894_v62 = vunpack.c.h.bf16 %v933_v52  ;;  %v317_v3 = vadd.f32 %v1202_v11, %v278_v55 }
  0x1e   : > { %v347_v0 = vmax.f32 %v315_v57, 0.0  ;;  %v348_v1 = vmax.f32 %v316_v58, 0.0  ;;  %v318_v4 = vadd.f32 %v1202_v11, %v279_v56  ;;  %v374_v5 = vpack.c.bf16 %v346_v54, %v345_v53 }
  0x1f   : > { %v319_v7 = vadd.f32 %v1202_v11, %v280_v59  ;;  %v320_v8 = vadd.f32 %v1202_v11, %v281_v60  ;;  %v897_v9 = vunpack.c.l.bf16 %v934_v63  ;;  %v898_v10 = vunpack.c.h.bf16 %v934_v63  ;;  %v939_v60 = vld [vmem:[%s1188_s22 + $0x68] sm:$0xff]  }
  0x20   : > { %v375_v6 = vpack.c.bf16 %v348_v1, %v347_v0  ;;  %v349_v12 = vmax.f32 %v317_v3, 0.0  ;;  %v350_v13 = vmax.f32 %v318_v4, 0.0  ;;  %v282_v14 = vmul.f32 %v893_v61, %v1193_v2  ;;  %v940_v61 = vld [vmem:[%s1188_s22 + $0x70] sm:$0xff]  }
  0x21   : > { %v283_v15 = vmul.f32 %v894_v62, %v1193_v2  ;;  %v351_v16 = vmax.f32 %v319_v7, 0.0  ;;  %v352_v17 = vmax.f32 %v320_v8, 0.0  ;;  %v284_v18 = vmul.f32 %v897_v9, %v1193_v2 }
  0x22   : > { %v285_v19 = vmul.f32 %v898_v10, %v1193_v2  ;;  %v376_v22 = vpack.c.bf16 %v350_v13, %v349_v12  ;;  %v321_v23 = vadd.f32 %v1202_v11, %v282_v14  ;;  %v901_v25 = vunpack.c.l.bf16 %v935_v20 }
  0x23   : > { %v322_v24 = vadd.f32 %v1202_v11, %v283_v15  ;;  %v902_v26 = vunpack.c.h.bf16 %v935_v20  ;;  %v905_v27 = vunpack.c.l.bf16 %v936_v21  ;;  %v906_v28 = vunpack.c.h.bf16 %v936_v21 }
  0x24   : > { %1036 = vmatmul.mubr.msk.bf16.gmra.mrb[4].mxu0 %vm388_vm1, %v374_v5  ;;  %v377_v29 = vpack.c.bf16 %v352_v17, %v351_v16  ;;  %v323_v30 = vadd.f32 %v1202_v11, %v284_v18  ;;  %v324_v31 = vadd.f32 %v1202_v11, %v285_v19  ;;  %v353_v32 = vmax.f32 %v321_v23, 0.0  ;;  %v941_v18 = vld [vmem:[%s1188_s22 + $0x78] sm:$0xff]  }
  0x25   : > { %1039 = vmatprep.mubr.msk.bf16.mxu0 %vm388_vm1, %v375_v6  ;;  %v354_v33 = vmax.f32 %v322_v24, 0.0  ;;  %v286_v34 = vmul.f32 %v901_v25, %v1193_v2  ;;  %v287_v35 = vmul.f32 %v902_v26, %v1193_v2  ;;  %v288_v36 = vmul.f32 %v905_v27, %v1193_v2 }
  0x26   : > { %v289_v37 = vmul.f32 %v906_v28, %v1193_v2  ;;  %v355_v39 = vmax.f32 %v323_v30, 0.0  ;;  %v356_v40 = vmax.f32 %v324_v31, 0.0  ;;  %v909_v43 = vunpack.c.l.bf16 %v937_v38 }
  0x27   : > { %v378_v42 = vpack.c.bf16 %v354_v33, %v353_v32  ;;  %v910_v44 = vunpack.c.h.bf16 %v937_v38  ;;  %v325_v45 = vadd.f32 %v1202_v11, %v286_v34  ;;  %v326_v46 = vadd.f32 %v1202_v11, %v287_v35 }
  0x28   : > { %v327_v47 = vadd.f32 %v1202_v11, %v288_v36  ;;  %v328_v48 = vadd.f32 %v1202_v11, %v289_v37  ;;  %v379_v49 = vpack.c.bf16 %v356_v40, %v355_v39  ;;  %v913_v50 = vunpack.c.l.bf16 %v938_v41 }
  0x29   : > { %v914_v51 = vunpack.c.h.bf16 %v938_v41  ;;  %v290_v52 = vmul.f32 %v909_v43, %v1193_v2  ;;  %v291_v53 = vmul.f32 %v910_v44, %v1193_v2  ;;  %v357_v54 = vmax.f32 %v325_v45, 0.0 }
  0x2a   : > { %v358_v55 = vmax.f32 %v326_v46, 0.0  ;;  %v359_v56 = vmax.f32 %v327_v47, 0.0  ;;  %v360_v57 = vmax.f32 %v328_v48, 0.0  ;;  %v292_v58 = vmul.f32 %v913_v50, %v1193_v2 }
  0x2b   : > { %v293_v59 = vmul.f32 %v914_v51, %v1193_v2  ;;  %v329_v62 = vadd.f32 %v1202_v11, %v290_v52  ;;  %v330_v63 = vadd.f32 %v1202_v11, %v291_v53  ;;  %v917_v3 = vunpack.c.l.bf16 %v939_v60 }
  0x2c   : > { %1040 = vmatmul.mubr.msk.bf16.gmra.mrb[8].mxu0 %vm388_vm1, %v376_v22  ;;  %v380_v0 = vpack.c.bf16 %v358_v55, %v357_v54  ;;  %v381_v1 = vpack.c.bf16 %v360_v57, %v359_v56  ;;  %v918_v4 = vunpack.c.h.bf16 %v939_v60  ;;  %v331_v5 = vadd.f32 %v1202_v11, %v292_v58 }
  0x2d   : > { %1043 = vmatprep.mubr.msk.bf16.mxu0 %vm388_vm1, %v377_v29  ;;  %v332_v6 = vadd.f32 %v1202_v11, %v293_v59  ;;  %v921_v7 = vunpack.c.l.bf16 %v940_v61  ;;  %v922_v8 = vunpack.c.h.bf16 %v940_v61  ;;  %v361_v9 = vmax.f32 %v329_v62, 0.0 }
  0x2e   : > { %v362_v10 = vmax.f32 %v330_v63, 0.0  ;;  %v294_v12 = vmul.f32 %v917_v3, %v1193_v2  ;;  %v295_v13 = vmul.f32 %v918_v4, %v1193_v2  ;;  %v363_v14 = vmax.f32 %v331_v5, 0.0 }
  0x2f   : > { %v364_v15 = vmax.f32 %v332_v6, 0.0  ;;  %v296_v16 = vmul.f32 %v921_v7, %v1193_v2  ;;  %v297_v17 = vmul.f32 %v922_v8, %v1193_v2  ;;  %v925_v22 = vunpack.c.l.bf16 %v941_v18 }
  0x30   : > { %v382_v19 = vpack.c.bf16 %v362_v10, %v361_v9  ;;  %v333_v20 = vadd.f32 %v1202_v11, %v294_v12  ;;  %v334_v21 = vadd.f32 %v1202_v11, %v295_v13  ;;  %v926_v23 = vunpack.c.h.bf16 %v941_v18 }
  0x31   : > { %v383_v24 = vpack.c.bf16 %v364_v15, %v363_v14  ;;  %v335_v25 = vadd.f32 %v1202_v11, %v296_v16  ;;  %v336_v26 = vadd.f32 %v1202_v11, %v297_v17  ;;  %v298_v29 = vmul.f32 %v925_v22, %v1193_v2 }
  0x32   : > { %v365_v27 = vmax.f32 %v333_v20, 0.0  ;;  %v366_v28 = vmax.f32 %v334_v21, 0.0  ;;  %v299_v30 = vmul.f32 %v926_v23, %v1193_v2  ;;  %v1145_v2 = vmov 1.0  }
  0x33   : > { %v367_v31 = vmax.f32 %v335_v25, 0.0  ;;  %v368_v32 = vmax.f32 %v336_v26, 0.0  ;;  %v337_v34 = vadd.f32 %v1202_v11, %v298_v29  ;;  %666 = vmatprep.mubr.f32.mxu1 %v1145_v2 }
  0x34   : > { %1044 = vmatmul.mubr.msk.bf16.gmra.mrb[12].mxu0 %vm388_vm1, %v378_v42  ;;  %v384_v33 = vpack.c.bf16 %v366_v28, %v365_v27  ;;  %v338_v35 = vadd.f32 %v1202_v11, %v299_v30 }
  0x35   : > { %1047 = vmatprep.mubr.msk.bf16.mxu0 %vm388_vm1, %v379_v49  ;;  %v385_v36 = vpack.c.bf16 %v368_v32, %v367_v31  ;;  %v369_v37 = vmax.f32 %v337_v34, 0.0 }
  0x36   : > { %v370_v38 = vmax.f32 %v338_v35, 0.0 }
  0x38   : > { %v386_v39 = vpack.c.bf16 %v370_v38, %v369_v37 }
  0x3c   : > { %1048 = vmatmul.mubr.msk.bf16.gmra.mrb[16].mxu0 %vm388_vm1, %v380_v0 }
  0x3d   : > { %1051 = vmatprep.mubr.msk.bf16.mxu0 %vm388_vm1, %v381_v1 }
  0x44   : > { %1052 = vmatmul.mubr.msk.bf16.gmra.mrb[20].mxu0 %vm388_vm1, %v382_v19 }
  0x45   : > { %1055 = vmatprep.mubr.msk.bf16.mxu0 %vm388_vm1, %v383_v24 }
  0x4c   : > { %1056 = vmatmul.mubr.msk.bf16.gmra.mrb[24].mxu0 %vm388_vm1, %v384_v33 }
  0x4d   : > { %1059 = vmatprep.mubr.msk.bf16.mxu0 %vm388_vm1, %v385_v36 }
  0x54   : > { %1060 = vmatmul.mubr.msk.bf16.gmra.mrb[28].mxu0 %vm388_vm1, %v386_v39 }
  0xef   : > { %v1297_v40 = vpop.f32.mrb[0].mxu0 }
  0xf0   : > { %v475_v41 = vpop.f32.mrb[1].mxu0  ;;  %v1303_v11 = vmul.f32 %v1297_v40, %v1297_v40 }
  0xf1   : > { %v1299_v42 = vpop.f32.mrb[2].mxu0  ;;  %v1311_v46 = vmul.f32 %v475_v41, %v475_v41 }
  0xf2   : > { %v1069_v43 = vpack.c.bf16 %v1299_v42, %v1297_v40  ;;  %v1309_v44 = vmul.f32 %v1299_v42, %v1299_v42  ;;  %v478_v45 = vpop.f32.mrb[3].mxu0 }
  0xf3   : > { %v1313_v47 = vmul.f32 %v478_v45, %v478_v45  ;;  %v1065_v48 = vpack.c.bf16 %v478_v45, %v475_v41 }
  0xf4   : > { %v1101_v49 = vpack.c.bf16 %v1309_v44, %v1303_v11 }
  0xf5   : > { %v1097_v50 = vpack.c.bf16 %v1313_v47, %v1311_v46 }
  0xf7   : > { %v1319_v51 = vpop.f32.mrb[4].mxu0 }
  0xf8   : > { %v1321_v52 = vpop.f32.mrb[5].mxu0  ;;  %v1327_v54 = vmul.f32 %v1319_v51, %v1319_v51 }
  0xf9   : > { %v1323_v53 = vpop.f32.mrb[6].mxu0  ;;  %v1337_v58 = vmul.f32 %v1321_v52, %v1321_v52 }
  0xfa   : > { %v1077_v55 = vpack.c.bf16 %v1323_v53, %v1319_v51  ;;  %v1333_v56 = vmul.f32 %v1323_v53, %v1323_v53  ;;  %v494_v57 = vpop.f32.mrb[7].mxu0 }
  0xfb   : > { %v1073_v59 = vpack.c.bf16 %v494_v57, %v1321_v52  ;;  %v1340_v60 = vmul.f32 %v494_v57, %v494_v57 }
  0xfc   : > { %v1109_v61 = vpack.c.bf16 %v1333_v56, %v1327_v54 }
  0xfd   : > { %v1105_v62 = vpack.c.bf16 %v1340_v60, %v1337_v58 }
  0xff   : > { %v1346_v63 = vpop.f32.mrb[8].mxu0 }
 0x100   : > { %v1348_v0 = vpop.f32.mrb[9].mxu0  ;;  %v1354_v3 = vmul.f32 %v1346_v63, %v1346_v63 }
 0x101   : > { %v1350_v1 = vpop.f32.mrb[10].mxu0  ;;  %v1366_v7 = vmul.f32 %v1348_v0, %v1348_v0 }
 0x102   : > { %v1085_v4 = vpack.c.bf16 %v1350_v1, %v1346_v63  ;;  %v1360_v5 = vmul.f32 %v1350_v1, %v1350_v1  ;;  %v1362_v6 = vpop.f32.mrb[11].mxu0 }
 0x103   : > { %v1081_v8 = vpack.c.bf16 %v1362_v6, %v1348_v0  ;;  %v1372_v9 = vmul.f32 %v1362_v6, %v1362_v6 }
 0x104   : > { %v1117_v10 = vpack.c.bf16 %v1360_v5, %v1354_v3 }
 0x105   : > { %v1113_v12 = vpack.c.bf16 %v1372_v9, %v1366_v7 }
 0x107   : > { %v1378_v13 = vpop.f32.mrb[12].mxu0 }
 0x108   : > { %v1380_v14 = vpop.f32.mrb[13].mxu0  ;;  %v1386_v16 = vmul.f32 %v1378_v13, %v1378_v13 }
 0x109   : > { %v1382_v15 = vpop.f32.mrb[14].mxu0  ;;  %v1398_v20 = vmul.f32 %v1380_v14, %v1380_v14 }
 0x10a   : > { %v1093_v17 = vpack.c.bf16 %v1382_v15, %v1378_v13  ;;  %v1392_v18 = vmul.f32 %v1382_v15, %v1382_v15  ;;  %v1394_v19 = vpop.f32.mrb[15].mxu0 }
 0x10b   : > { %v1089_v21 = vpack.c.bf16 %v1394_v19, %v1380_v14  ;;  %v1404_v22 = vmul.f32 %v1394_v19, %v1394_v19 }
 0x10c   : > { %v1125_v23 = vpack.c.bf16 %v1392_v18, %v1386_v16 }
 0x10d   : > { %v1121_v24 = vpack.c.bf16 %v1404_v22, %v1398_v20 }
 0x10f   : > { %v1049_v25 = vpop.f32.mrb[16].mxu0 }
 0x110   : > { %v539_v26 = vpop.f32.mrb[17].mxu0  ;;  %v1410_v28 = vmul.f32 %v1049_v25, %v1049_v25 }
 0x111   : > { %v1050_v27 = vpop.f32.mrb[18].mxu0  ;;  %v688_v32 = vmul.f32 %v539_v26, %v539_v26 }
 0x112   : > { %v1067_v29 = vpack.c.bf16 %v1050_v27, %v1049_v25  ;;  %v1412_v30 = vmul.f32 %v1050_v27, %v1050_v27  ;;  %v542_v31 = vpop.f32.mrb[19].mxu0 }
 0x113   : > { %v689_v33 = vmul.f32 %v542_v31, %v542_v31  ;;  %v1063_v34 = vpack.c.bf16 %v542_v31, %v539_v26 }
 0x114   : > { %v1099_v35 = vpack.c.bf16 %v1412_v30, %v1410_v28 }
 0x115   : > { %v1095_v36 = vpack.c.bf16 %v689_v33, %v688_v32  ;;  %1064 = vmatprep.subr.bf16.mxu1 %v1063_v34 }
 0x116   : > { %1066 = vmatpush3.bf16.msra.mxu1 %v1065_v48 }
 0x117   : > { %v1053_v37 = vpop.f32.mrb[20].mxu0  ;;  %1068 = vmatprep.subr.bf16.mxu1 %v1067_v29 }
 0x118   : > { %v555_v38 = vpop.f32.mrb[21].mxu0  ;;  %v694_v41 = vmul.f32 %v1053_v37, %v1053_v37 }
 0x119   : > { %v1054_v39 = vpop.f32.mrb[22].mxu0  ;;  %v692_v0 = vmul.f32 %v555_v38, %v555_v38 }
 0x11a   : > { %v1075_v45 = vpack.c.bf16 %v1054_v39, %v1053_v37  ;;  %v695_v52 = vmul.f32 %v1054_v39, %v1054_v39  ;;  %v558_v57 = vpop.f32.mrb[23].mxu0  ;;  %1070 = vmatpush3.bf16.msra.mxu1 %v1069_v43 }
 0x11b   : > { %v1071_v6 = vpack.c.bf16 %v558_v57, %v555_v38  ;;  %v693_v25 = vmul.f32 %v558_v57, %v558_v57 }
 0x11c   : > { %v1107_v26 = vpack.c.bf16 %v695_v52, %v694_v41 }
 0x11d   : > { %v1103_v27 = vpack.c.bf16 %v693_v25, %v692_v0  ;;  %1072 = vmatprep.subr.bf16.mxu1 %v1071_v6 }
 0x11e   : > { %1074 = vmatpush3.bf16.msra.mxu1 %v1073_v59 }
 0x11f   : > { %v1057_v48 = vpop.f32.mrb[24].mxu0  ;;  %1076 = vmatprep.subr.bf16.mxu1 %v1075_v45 }
 0x120   : > { %v571_v28 = vpop.f32.mrb[25].mxu0  ;;  %v698_v30 = vmul.f32 %v1057_v48, %v1057_v48 }
 0x121   : > { %v1058_v29 = vpop.f32.mrb[26].mxu0  ;;  %v696_v40 = vmul.f32 %v571_v28, %v571_v28 }
 0x122   : > { %v1083_v31 = vpack.c.bf16 %v1058_v29, %v1057_v48  ;;  %v699_v32 = vmul.f32 %v1058_v29, %v1058_v29  ;;  %v574_v33 = vpop.f32.mrb[27].mxu0  ;;  %1078 = vmatpush3.bf16.msra.mxu1 %v1077_v55 }
 0x123   : > { %v1079_v42 = vpack.c.bf16 %v574_v33, %v571_v28  ;;  %v697_v43 = vmul.f32 %v574_v33, %v574_v33 }
 0x124   : > { %v1115_v34 = vpack.c.bf16 %v699_v32, %v698_v30 }
 0x125   : > { %v1111_v37 = vpack.c.bf16 %v697_v43, %v696_v40  ;;  %1080 = vmatprep.subr.bf16.mxu1 %v1079_v42 }
 0x126   : > { %1082 = vmatpush3.bf16.msra.mxu1 %v1081_v8 }
 0x127   : > { %v1061_v59 = vpop.f32.mrb[28].mxu0  ;;  %1084 = vmatprep.subr.bf16.mxu1 %v1083_v31 }
 0x128   : > { %v587_v38 = vpop.f32.mrb[29].mxu0  ;;  %v702_v41 = vmul.f32 %v1061_v59, %v1061_v59 }
 0x129   : > { %v1062_v39 = vpop.f32.mrb[30].mxu0  ;;  %v700_v51 = vmul.f32 %v587_v38, %v587_v38 }
 0x12a   : > { %v1091_v45 = vpack.c.bf16 %v1062_v39, %v1061_v59  ;;  %v703_v52 = vmul.f32 %v1062_v39, %v1062_v39  ;;  %v590_v57 = vpop.f32.mrb[31].mxu0  ;;  %1086 = vmatpush3.bf16.msra.mxu1 %v1085_v4 }
 0x12b   : > { %v1087_v53 = vpack.c.bf16 %v590_v57, %v587_v38  ;;  %v701_v55 = vmul.f32 %v590_v57, %v590_v57 }
 0x12c   : > { %v1123_v0 = vpack.c.bf16 %v703_v52, %v702_v41 }
 0x12d   : > { %v1119_v6 = vpack.c.bf16 %v701_v55, %v700_v51  ;;  %1088 = vmatprep.subr.bf16.mxu1 %v1087_v53 }
 0x12e   : > { %1090 = vmatpush3.bf16.msra.mxu1 %v1089_v21 }
 0x12f   : > { %1092 = vmatprep.subr.bf16.mxu1 %v1091_v45 }
 0x132   : > { %1094 = vmatpush3.bf16.msra.mxu1 %v1093_v17 }
 0x133   : > { %1096 = vmatprep.subr.bf16.mxu1 %v1095_v36 }
 0x135   : > { %667 = vmatmul.mubr.f32.vlgmr.msra.gmra.mrb[0].mxu1 %v1145_v2 }
 0x136   : > { %1098 = vmatpush3.bf16.msra.mxu1 %v1097_v50  ;;  %768 = vmatprep.mubr.f32.mxu1 %v1145_v2 }
 0x137   : > { %1100 = vmatprep.subr.bf16.mxu1 %v1099_v35 }
 0x13a   : > { %1102 = vmatpush3.bf16.msra.mxu1 %v1101_v49 }
 0x13b   : > { %1104 = vmatprep.subr.bf16.mxu1 %v1103_v27 }
 0x13e   : > { %1106 = vmatpush3.bf16.msra.mxu1 %v1105_v62 }
 0x13f   : > { %1108 = vmatprep.subr.bf16.mxu1 %v1107_v26 }
 0x142   : > { %1110 = vmatpush3.bf16.msra.mxu1 %v1109_v61 }
 0x143   : > { %1112 = vmatprep.subr.bf16.mxu1 %v1111_v37 }
 0x146   : > { %1114 = vmatpush3.bf16.msra.mxu1 %v1113_v12 }
 0x147   : > { %1116 = vmatprep.subr.bf16.mxu1 %v1115_v34 }
 0x14a   : > { %1118 = vmatpush3.bf16.msra.mxu1 %v1117_v10 }
 0x14b   : > { %1120 = vmatprep.subr.bf16.mxu1 %v1119_v6 }
 0x14e   : > { %1122 = vmatpush3.bf16.msra.mxu1 %v1121_v24 }
 0x14f   : > { %1124 = vmatprep.subr.bf16.mxu1 %v1123_v0 }
 0x152   : > { %1126 = vmatpush3.bf16.msra.mxu1 %v1125_v23 }
 0x155   : > { %769 = vmatmul.mubr.f32.vlgmr.msra.gmra.mrb[2].mxu1 %v1145_v2 }
 0x208   : > { %v991_v11 = vpop.f32.mrb[0].mxu1 }
 0x209   : > { %v992_v44 = vpop.f32.mrb[1].mxu1 }
 0x20a   : > { %v993_v46 = vadd.f32 %v992_v44, %v991_v11 }
 0x228   : > { %v1026_v47 = vpop.f32.mrb[2].mxu1 }
 0x229   : > { %v1027_v49 = vpop.f32.mrb[3].mxu1 }
 0x22a   : > { %v1028_v50 = vadd.f32 %v1027_v49, %v1026_v47 }
 0x22c   : > { %v775_v54 = vrot.slane %v1028_v50, 7 }
 0x22e   : > { %v778_v56 = vsel %vm777_vm2, %v993_v46, %v775_v54 }
 0x22f   : > { %780 = vst.msk [vmem:[%s195_s30] sm:$0x3] %vm779_vm3, %v778_v56 }
 0x230 PF: > { %s14_s15 = sadd.s32 1, %s1143_s15  }
 0x231   : > { %p11_p4 = scmp.ge.s32.totalorder %s14_s15, 4  }
 0x233   :  { %13 = sbr.rel (!%p11_p4) target bundleno = 1 (0x1), region = 66 }

// kernel: bottleneck_forward.5
= control target key start
LH: loop header
LB: loop body
LE: loop exit
PB: predicated region body
PF: predicated region fallthrough
CT: control target
= control target key end

     0   :  { %s2704_s18 = smov 0   ;;  %s3602_s0 = inlined_call_operand.vmem [shape: bf16[2,16,16,8], index: 0, kind: input, shape index: {}]   ;;  %s3603_s1 = inlined_call_operand.vmem [shape: f32[1,8], index: 1, kind: input, shape index: {}]   ;;  %s3604_s2 = inlined_call_operand.vmem [shape: f32[1,8], index: 2, kind: input, shape index: {}]   ;;  %s3605_s3 = inlined_call_operand.vmem [shape: bf16[72,8], index: 3, kind: input, shape index: {}]   ;;  %s3606_s4 = inlined_call_operand.vmem [shape: bf16[2,256,8], index: 4, kind: output, shape index: {0}]   ;;  %s3607_s5 = inlined_call_operand.vmem [shape: f32[2,2,8], index: 5, kind: output, shape index: {1}]  }
   0x1 LB: > { %s2068_s19 = sadd.s32 4294967295, %s2668_s18   ;;  %p2072_p0 = scmp.ge.s32.totalorder %s2668_s18, 1  ;;  %s2668_s18 = sphi %s2704_s18, %s16_s18  }
   0x2   : > { %p190_p1 = scmp.lt.s32.totalorder %s2668_s18, 3 }
   0x4   : > { %p191_p2 = pnand %p2072_p0, %p190_p1 }
   0x5   : > { %vm580_vm0 = vcmask (!%p191_p2), 1040384   ;;  %vm581_vm1 = vsmask.f32 (!%p191_p2), 256  ;;  %v2670_v0 = vmov (!%p191_p2), 0   ;;  %p222_p3 = scmp.lt.s32.totalorder (!%p191_p2), %s2068_s19, 1  ;;  %v2656_v3 = vld [vmem:[%s3605_s3] sm:$0xff] (!%p191_p2)  }
   0x6   : > { %194 = sbr.rel (%p191_p2) target bundleno = 785 (0x311), region = 36  ;;  %v430_v1 = vrot.slane (!%p191_p2), %v2670_v0, 7  ;;  %vm2713_vm2 = vmand (!%p191_p2), %vm580_vm0, %vm581_vm1  ;;  %vm842_vm3 = vcmask (!%p191_p2), 1046528   ;;  %2441 = vmatprep.subr.bf16.mxu0 (!%p191_p2), %v2656_v3  ;;  %v2735_v11 = vld [vmem:[%s3603_s1] ss:$0 sm:$0xff] (!%p191_p2)  ;;  %s2671_s28 = smov (!%p191_p2), 16  }
   0x7   : > { %2442 = vmatpush3.bf16.msra.mxu0 (!%p191_p2), %v2656_v3  ;;  %vm617_vm4 = vsmask.f32 (!%p191_p2), 7424  ;;  %v2753_v23 = vld [vmem:[%s3604_s2] ss:$0 sm:$0xff] (!%p191_p2)  ;;  %s2672_s6 = smov (!%p191_p2), 8   ;;  %vm1094_vm5 = vcmask (!%p191_p2), 1043456  }
   0x8   : > { %v2722_v4 = vsel (!%p191_p2), %vm2713_vm2, 0, %v430_v1  ;;  %v600_v5 = vsel (!%p191_p2), %vm2713_vm2, %v430_v1, 0  ;;  %vm955_vm6 = vcmask (!%p191_p2), 64512   ;;  %vm988_vm7 = vcmask (!%p191_p2), 130048  }
   0x9   : > { %v843_v6 = vrot.slane (!%p191_p2), %v2722_v4, 1  ;;  %v844_v7 = vrot.slane (!%p191_p2), %v600_v5, 1  ;;  %v619_v8 = vshrl.u32 (!%p191_p2), %v2722_v4, 16  ;;  %v621_v9 = vshll.u32 (!%p191_p2), %v2722_v4, 16 }
   0xa   : > { %v626_v10 = vshll.u32 (!%p191_p2), %v600_v5, 16  ;;  %vm1061_vm8 = vcmask (!%p191_p2), 195584   ;;  %vm1770_vm9 = vcmask (!%p191_p2), 60416   ;;  %vm1980_vm10 = vcmask (!%p191_p2), 58368  }
   0xb   : > { %v845_v12 = vsel (!%p191_p2), %vm842_vm3, %v843_v6, %v844_v7  ;;  %v623_v13 = vrot.slane (!%p191_p2), %v621_v9, 1 }
   0xc   : > { %923 = vrot.lane.b32.xlu1 (!%p191_p2), %v845_v12, %s2671_s28  ;;  %v628_v14 = vrot.slane (!%p191_p2), %v626_v10, 1 }
   0xd   : > { %s3627_s19 = smov (!%p222_p3, %s2068_s19), 1  ;;  %v624_v18 = vor.u32 %v623_v13, %v619_v8  ;;  %v2658_v8 = vld [vmem:[%s3605_s3 + $0xc] sm:$0xff]  }
   0xe   : > { %s2168_s22 = sshll.u32 %s3627_s19, 7  ;;  %2405 = vmatprep.subr.bf16.mxu1 %v2658_v8 }
   0xf   : > { %s2743_s27 = scalar_lea.vmem %s3602_s0, %s2168_s22  ;;  %v629_v28 = vsel %vm617_vm4, %v624_v18, %v628_v14  ;;  %2406 = vmatpush3.bf16.msra.mxu1 %v2658_v8  ;;  %s3257_s21 = scalar_lea.vmem %s3606_s4, %s2168_s22 }
  0x10   : > { %v2203_v15 = vld [vmem:[%s2743_s27] sm:$0xff]   ;;  %v2267_v16 = vld [vmem:[%s2743_s27 + $0x10] sm:$0xff]   ;;  %v2266_v17 = vld [vmem:[%s2743_s27 + $0x8] sm:$0xff]   ;;  %891 = vrot.lane.b32.xlu0 %v629_v28, %s2672_s6  ;;  %s2077_s22 = sshll.u32 %s3627_s19, 1 }
  0x11   : > { %v2204_v19 = vunpack.c.l.bf16 %v2203_v15  ;;  %v2205_v20 = vunpack.c.h.bf16 %v2203_v15  ;;  %v2212_v21 = vunpack.c.l.bf16 %v2267_v16  ;;  %v2269_v22 = vld [vmem:[%s2743_s27 + $0x20] sm:$0xff]   ;;  %v2213_v24 = vunpack.c.h.bf16 %v2267_v16  ;;  %v2268_v44 = vld [vmem:[%s2743_s27 + $0x18] sm:$0xff]   ;;  %v2774_v49 = vld [vmem:[%s2743_s27 + $0x30] sm:$0xff]   ;;  %s235_s25 = scalar_lea.vmem %s3607_s5, %s2077_s22 }
  0x12   : > { %v2208_v25 = vunpack.c.l.bf16 %v2266_v17  ;;  %v2209_v26 = vunpack.c.h.bf16 %v2266_v17  ;;  %v2220_v27 = vunpack.c.l.bf16 %v2269_v22  ;;  %v2221_v35 = vunpack.c.h.bf16 %v2269_v22 }
  0x13   : > { %v308_v29 = vmul.f32 %v2204_v19, %v2735_v11  ;;  %v309_v30 = vmul.f32 %v2205_v20, %v2735_v11  ;;  %v312_v31 = vmul.f32 %v2212_v21, %v2735_v11  ;;  %v313_v32 = vmul.f32 %v2213_v24, %v2735_v11 }
  0x14   : > { %v310_v33 = vmul.f32 %v2208_v25, %v2735_v11  ;;  %v311_v34 = vmul.f32 %v2209_v26, %v2735_v11  ;;  %v316_v39 = vmul.f32 %v2220_v27, %v2735_v11  ;;  %v317_v43 = vmul.f32 %v2221_v35, %v2735_v11 }
  0x15   : > { %v347_v36 = vadd.f32 %v2753_v23, %v308_v29  ;;  %v348_v37 = vadd.f32 %v2753_v23, %v309_v30  ;;  %v351_v38 = vadd.f32 %v2753_v23, %v312_v31  ;;  %v352_v40 = vadd.f32 %v2753_v23, %v313_v32 }
  0x16   : > { %v349_v41 = vadd.f32 %v2753_v23, %v310_v33  ;;  %v350_v42 = vadd.f32 %v2753_v23, %v311_v34  ;;  %v355_v48 = vadd.f32 %v2753_v23, %v316_v39  ;;  %v356_v53 = vadd.f32 %v2753_v23, %v317_v43 }
  0x17   : > { %v379_v45 = vmax.f32 %v347_v36, 0.0  ;;  %v380_v46 = vmax.f32 %v348_v37, 0.0  ;;  %v383_v47 = vmax.f32 %v351_v38, 0.0  ;;  %v384_v50 = vmax.f32 %v352_v40, 0.0 }
  0x18   : > { %v381_v51 = vmax.f32 %v349_v41, 0.0  ;;  %v382_v52 = vmax.f32 %v350_v42, 0.0  ;;  %v387_v55 = vmax.f32 %v355_v48, 0.0  ;;  %v2216_v56 = vunpack.c.l.bf16 %v2268_v44 }
  0x19   : > { %v411_v54 = vpack.c.bf16 %v380_v46, %v379_v45  ;;  %v2217_v57 = vunpack.c.h.bf16 %v2268_v44  ;;  %v413_v58 = vpack.c.bf16 %v384_v50, %v383_v47  ;;  %v388_v60 = vmax.f32 %v356_v53, 0.0 }
  0x1a   : > { %v412_v59 = vpack.c.bf16 %v382_v52, %v381_v51  ;;  %v2228_v61 = vunpack.c.l.bf16 %v2774_v49  ;;  %v314_v0 = vmul.f32 %v2216_v56, %v2735_v11  ;;  %v2229_v16 = vunpack.c.h.bf16 %v2774_v49 }
  0x1b   : > { %v435_v62 = vshrl.u32 %v411_v54, 16  ;;  %v438_v63 = vshll.u32 %v411_v54, 16  ;;  %v315_v1 = vmul.f32 %v2217_v57, %v2735_v11  ;;  %v449_v3 = vshrl.u32 %v413_v58, 16 }
  0x1c   : > { %v452_v5 = vshll.u32 %v413_v58, 16  ;;  %v442_v6 = vshrl.u32 %v412_v59, 16  ;;  %v445_v7 = vshll.u32 %v412_v59, 16  ;;  %v415_v10 = vpack.c.bf16 %v388_v60, %v387_v55 }
  0x1d   : > { %v437_v9 = vrot.slane %v435_v62, 7  ;;  %v353_v12 = vadd.f32 %v2753_v23, %v314_v0  ;;  %v354_v13 = vadd.f32 %v2753_v23, %v315_v1  ;;  %v451_v14 = vrot.slane %v449_v3, 7 }
  0x1e   : > { %v444_v15 = vrot.slane %v442_v6, 7  ;;  %v320_v17 = vmul.f32 %v2228_v61, %v2735_v11  ;;  %v463_v20 = vshrl.u32 %v415_v10, 16  ;;  %v466_v21 = vshll.u32 %v415_v10, 16 }
  0x1f   : > { %v440_v18 = vor.u32 %v438_v63, %v437_v9  ;;  %v601_v19 = vsel %vm2713_vm2, %v437_v9, 0  ;;  %v454_v25 = vor.u32 %v452_v5, %v451_v14  ;;  %v603_v26 = vsel %vm2713_vm2, %v451_v14, 0  ;;  %v2270_v9 = vld [vmem:[%s2743_s27 + $0x28] sm:$0xff]  }
  0x20   : > { %v847_v22 = vrot.slane %v601_v19, 1  ;;  %v638_v24 = vshll.u32 %v601_v19, 16  ;;  %v662_v28 = vshll.u32 %v603_v26, 16  ;;  %v447_v29 = vor.u32 %v445_v7, %v444_v15 }
  0x21   : > { %v2793_v27 = vsel %vm2713_vm2, 0, %v440_v18  ;;  %v602_v30 = vsel %vm2713_vm2, %v444_v15, 0  ;;  %v2802_v35 = vsel %vm2713_vm2, 0, %v454_v25  ;;  %v853_v49 = vrot.slane %v603_v26, 1  ;;  %v2273_v15 = vld [vmem:[%s2743_s27 + $0x40] sm:$0xff]  }
  0x22   : > { %v846_v31 = vrot.slane %v2793_v27, 1  ;;  %v631_v32 = vshrl.u32 %v2793_v27, 16  ;;  %v633_v33 = vshll.u32 %v2793_v27, 16  ;;  %v640_v34 = vrot.slane %v638_v24, 1 }
  0x23   : > { %v664_v36 = vrot.slane %v662_v28, 1  ;;  %v2806_v37 = vsel %vm2713_vm2, 0, %v447_v29  ;;  %v650_v38 = vshll.u32 %v602_v30, 16  ;;  %v655_v41 = vshrl.u32 %v2802_v35, 16 }
  0x24   : > { %v848_v39 = vsel %vm842_vm3, %v846_v31, %v847_v22  ;;  %v635_v40 = vrot.slane %v633_v33, 1  ;;  %v657_v42 = vshll.u32 %v2802_v35, 16  ;;  %v643_v43 = vshrl.u32 %v2806_v37, 16 }
  0x25   : > { %925 = vrot.lane.b32.xlu1 %v848_v39, %s2671_s28  ;;  %v645_v44 = vshll.u32 %v2806_v37, 16  ;;  %v652_v45 = vrot.slane %v650_v38, 1  ;;  %v852_v46 = vrot.slane %v2802_v35, 1  ;;  %v849_v50 = vrot.slane %v2806_v37, 1 }
  0x26   : > { %v636_v47 = vor.u32 %v635_v40, %v631_v32  ;;  %v659_v48 = vrot.slane %v657_v42, 1  ;;  %v850_v52 = vrot.slane %v602_v30, 1  ;;  %v465_v53 = vrot.slane %v463_v20, 7 }
  0x27   : > { %v647_v51 = vrot.slane %v645_v44, 1  ;;  %v385_v54 = vmax.f32 %v353_v12, 0.0  ;;  %v854_v57 = vsel %vm842_vm3, %v852_v46, %v853_v49  ;;  %v386_v58 = vmax.f32 %v354_v13, 0.0 }
  0x28   : > { %v641_v55 = vsel %vm617_vm4, %v636_v47, %v640_v34  ;;  %v660_v56 = vor.u32 %v659_v48, %v655_v41  ;;  %v851_v60 = vsel %vm842_vm3, %v849_v50, %v850_v52  ;;  %v468_v61 = vor.u32 %v466_v21, %v465_v53  ;;  %v2272_v48 = vld [vmem:[%s2743_s27 + $0x38] sm:$0xff]  }
  0x29   : > { %893 = vrot.lane.b32.xlu0 %v641_v55, %s2672_s6  ;;  %v648_v59 = vor.u32 %v647_v51, %v643_v43  ;;  %v605_v62 = vsel %vm2713_vm2, %v465_v53, 0  ;;  %v414_v1 = vpack.c.bf16 %v386_v58, %v385_v54  ;;  %v321_v7 = vmul.f32 %v2229_v16, %v2735_v11  ;;  %v2275_v53 = vld [vmem:[%s2743_s27 + $0x50] sm:$0xff]  }
  0x2a   : > { %v665_v63 = vsel %vm617_vm4, %v660_v56, %v664_v36  ;;  %v686_v0 = vshll.u32 %v605_v62, 16  ;;  %v859_v3 = vrot.slane %v605_v62, 1  ;;  %v2827_v6 = vsel %vm2713_vm2, 0, %v468_v61 }
  0x2b   : > { %897 = vrot.lane.b32.xlu1 %v665_v63, %s2672_s6  ;;  %v653_v5 = vsel %vm617_vm4, %v648_v59, %v652_v45  ;;  %v359_v8 = vadd.f32 %v2753_v23, %v320_v17  ;;  %v679_v10 = vshrl.u32 %v2827_v6, 16  ;;  %v681_v12 = vshll.u32 %v2827_v6, 16 }
  0x2c   : > { %v688_v13 = vrot.slane %v686_v0, 1  ;;  %v456_v14 = vshrl.u32 %v414_v1, 16  ;;  %v459_v18 = vshll.u32 %v414_v1, 16  ;;  %v858_v19 = vrot.slane %v2827_v6, 1 }
  0x2d   : > { %895 = vrot.lane.b32.xlu0 %v653_v5, %s2672_s6  ;;  %v360_v20 = vadd.f32 %v2753_v23, %v321_v7  ;;  %v391_v21 = vmax.f32 %v359_v8, 0.0  ;;  %v683_v22 = vrot.slane %v681_v12, 1  ;;  %v2224_v24 = vunpack.c.l.bf16 %v2270_v9 }
  0x2e   : > { %v458_v16 = vrot.slane %v456_v14, 7  ;;  %v2225_v17 = vunpack.c.h.bf16 %v2270_v9  ;;  %v860_v25 = vsel %vm842_vm3, %v858_v19, %v859_v3  ;;  %v2236_v28 = vunpack.c.l.bf16 %v2273_v15 }
  0x2f   : > { %929 = vrot.lane.b32.xlu1 %v854_v57, %s2671_s28  ;;  %v392_v26 = vmax.f32 %v360_v20, 0.0  ;;  %v2237_v29 = vunpack.c.h.bf16 %v2273_v15  ;;  %v684_v30 = vor.u32 %v683_v22, %v679_v10  ;;  %v318_v33 = vmul.f32 %v2224_v24, %v2735_v11 }
  0x30   : > { %v461_v31 = vor.u32 %v459_v18, %v458_v16  ;;  %v604_v32 = vsel %vm2713_vm2, %v458_v16, 0  ;;  %v319_v39 = vmul.f32 %v2225_v17, %v2735_v11  ;;  %v324_v43 = vmul.f32 %v2236_v28, %v2735_v11 }
  0x31   : > { %927 = vrot.lane.b32.xlu0 %v851_v60, %s2671_s28  ;;  %v674_v34 = vshll.u32 %v604_v32, 16  ;;  %v856_v36 = vrot.slane %v604_v32, 1  ;;  %v417_v38 = vpack.c.bf16 %v392_v26, %v391_v21  ;;  %v689_v40 = vsel %vm617_vm4, %v684_v30, %v688_v13 }
  0x32   : > { %v2848_v41 = vsel %vm2713_vm2, 0, %v461_v31  ;;  %v357_v42 = vadd.f32 %v2753_v23, %v318_v33  ;;  %v358_v51 = vadd.f32 %v2753_v23, %v319_v39  ;;  %v325_v56 = vmul.f32 %v2237_v29, %v2735_v11 }
  0x33   : > { %901 = vrot.lane.b32.xlu1 %v689_v40, %s2672_s6  ;;  %v667_v44 = vshrl.u32 %v2848_v41, 16  ;;  %v669_v45 = vshll.u32 %v2848_v41, 16  ;;  %v676_v46 = vrot.slane %v674_v34, 1  ;;  %v855_v47 = vrot.slane %v2848_v41, 1 }
  0x34   : > { %v477_v49 = vshrl.u32 %v417_v38, 16  ;;  %v480_v50 = vshll.u32 %v417_v38, 16  ;;  %v389_v52 = vmax.f32 %v357_v42, 0.0  ;;  %v363_v57 = vadd.f32 %v2753_v23, %v324_v43 }
  0x35   : > { %v671_v54 = vrot.slane %v669_v45, 1  ;;  %v857_v55 = vsel %vm842_vm3, %v855_v47, %v856_v36  ;;  %v390_v59 = vmax.f32 %v358_v51, 0.0  ;;  %v2232_v60 = vunpack.c.l.bf16 %v2272_v48 }
  0x36   : > { %v479_v58 = vrot.slane %v477_v49, 7  ;;  %v2233_v61 = vunpack.c.h.bf16 %v2272_v48  ;;  %v364_v63 = vadd.f32 %v2753_v23, %v325_v56  ;;  %v395_v0 = vmax.f32 %v363_v57, 0.0 }
  0x37   : > { %v672_v62 = vor.u32 %v671_v54, %v667_v44  ;;  %933 = vrot.lane.b32.xlu1 %v860_v25, %s2671_s28  ;;  %v2244_v1 = vunpack.c.l.bf16 %v2275_v53  ;;  %v416_v7 = vpack.c.bf16 %v390_v59, %v389_v52  ;;  %v322_v8 = vmul.f32 %v2232_v60, %v2735_v11 }
  0x38   : > { %v482_v3 = vor.u32 %v480_v50, %v479_v58  ;;  %v607_v5 = vsel %vm2713_vm2, %v479_v58, 0  ;;  %v396_v13 = vmax.f32 %v364_v63, 0.0  ;;  %v323_v19 = vmul.f32 %v2233_v61, %v2735_v11  ;;  %v2274_v63 = vld [vmem:[%s2743_s27 + $0x48] sm:$0xff]  }
  0x39   : > { %v677_v9 = vsel %vm617_vm4, %v672_v62, %v676_v46  ;;  %v710_v10 = vshll.u32 %v607_v5, 16  ;;  %v865_v12 = vrot.slane %v607_v5, 1  ;;  %v470_v15 = vshrl.u32 %v416_v7, 16 }
  0x3a   : > { %899 = vrot.lane.b32.xlu0 %v677_v9, %s2672_s6  ;;  %v2871_v14 = vsel %vm2713_vm2, 0, %v482_v3  ;;  %v473_v18 = vshll.u32 %v416_v7, 16  ;;  %v419_v17 = vpack.c.bf16 %v396_v13, %v395_v0  ;;  %v361_v25 = vadd.f32 %v2753_v23, %v322_v8 }
  0x3b   : > { %v703_v20 = vshrl.u32 %v2871_v14, 16  ;;  %v705_v21 = vshll.u32 %v2871_v14, 16  ;;  %v712_v22 = vrot.slane %v710_v10, 1  ;;  %v864_v16 = vrot.slane %v2871_v14, 1 }
  0x3c   : > { %v472_v24 = vrot.slane %v470_v15, 7  ;;  %v362_v26 = vadd.f32 %v2753_v23, %v323_v19  ;;  %v2245_v30 = vunpack.c.h.bf16 %v2275_v53  ;;  %v328_v31 = vmul.f32 %v2244_v1, %v2735_v11  ;;  %v2277_v19 = vld [vmem:[%s2743_s27 + $0x60] sm:$0xff]  }
  0x3d   : > { %v707_v28 = vrot.slane %v705_v21, 1  ;;  %v866_v29 = vsel %vm842_vm3, %v864_v16, %v865_v12  ;;  %v491_v34 = vshrl.u32 %v419_v17, 16  ;;  %v494_v36 = vshll.u32 %v419_v17, 16 }
  0x3e   : > { %931 = vrot.lane.b32.xlu0 %v857_v55, %s2671_s28  ;;  %v475_v32 = vor.u32 %v473_v18, %v472_v24  ;;  %v606_v33 = vsel %vm2713_vm2, %v472_v24, 0  ;;  %v393_v42 = vmax.f32 %v361_v25, 0.0  ;;  %v394_v45 = vmax.f32 %v362_v26, 0.0 }
  0x3f   : > { %v708_v38 = vor.u32 %v707_v28, %v703_v20  ;;  %v698_v39 = vshll.u32 %v606_v33, 16  ;;  %v862_v40 = vrot.slane %v606_v33, 1  ;;  %v493_v44 = vrot.slane %v491_v34, 7 }
  0x40   : > { %v2886_v43 = vsel %vm2713_vm2, 0, %v475_v32  ;;  %v329_v46 = vmul.f32 %v2245_v30, %v2735_v11  ;;  %v418_v54 = vpack.c.bf16 %v394_v45, %v393_v42  ;;  %v367_v58 = vadd.f32 %v2753_v23, %v328_v31 }
  0x41   : > { %v713_v47 = vsel %vm617_vm4, %v708_v38, %v712_v22  ;;  %v691_v48 = vshrl.u32 %v2886_v43, 16  ;;  %v693_v49 = vshll.u32 %v2886_v43, 16  ;;  %v700_v50 = vrot.slane %v698_v39, 1  ;;  %v2276_v38 = vld [vmem:[%s2743_s27 + $0x58] sm:$0xff]  }
  0x42   : > { %905 = vrot.lane.b32.xlu1 %v713_v47, %s2672_s6  ;;  %v861_v51 = vrot.slane %v2886_v43, 1  ;;  %v496_v52 = vor.u32 %v494_v36, %v493_v44  ;;  %v609_v53 = vsel %vm2713_vm2, %v493_v44, 0  ;;  %v484_v61 = vshrl.u32 %v418_v54, 16 }
  0x43   : > { %v695_v55 = vrot.slane %v693_v49, 1  ;;  %v734_v56 = vshll.u32 %v609_v53, 16  ;;  %v871_v57 = vrot.slane %v609_v53, 1  ;;  %v487_v62 = vshll.u32 %v418_v54, 16 }
  0x44   : > { %v863_v59 = vsel %vm842_vm3, %v861_v51, %v862_v40  ;;  %v2900_v60 = vsel %vm2713_vm2, 0, %v496_v52  ;;  %v486_v7 = vrot.slane %v484_v61, 7  ;;  %v368_v9 = vadd.f32 %v2753_v23, %v329_v46 }
  0x45   : > { %v696_v0 = vor.u32 %v695_v55, %v691_v48  ;;  %v727_v1 = vshrl.u32 %v2900_v60, 16  ;;  %v729_v3 = vshll.u32 %v2900_v60, 16  ;;  %v736_v5 = vrot.slane %v734_v56, 1 }
  0x46   : > { %937 = vrot.lane.b32.xlu1 %v866_v29, %s2671_s28  ;;  %v870_v8 = vrot.slane %v2900_v60, 1  ;;  %v399_v10 = vmax.f32 %v367_v58, 0.0  ;;  %v2240_v15 = vunpack.c.l.bf16 %v2274_v63  ;;  %v2241_v18 = vunpack.c.h.bf16 %v2274_v63 }
  0x47   : > { %v701_v12 = vsel %vm617_vm4, %v696_v0, %v700_v50  ;;  %v731_v13 = vrot.slane %v729_v3, 1  ;;  %v489_v20 = vor.u32 %v487_v62, %v486_v7  ;;  %v608_v21 = vsel %vm2713_vm2, %v486_v7, 0 }
  0x48   : > { %903 = vrot.lane.b32.xlu0 %v701_v12, %s2672_s6  ;;  %v872_v22 = vsel %vm842_vm3, %v870_v8, %v871_v57  ;;  %v400_v16 = vmax.f32 %v368_v9, 0.0  ;;  %v722_v17 = vshll.u32 %v608_v21, 16  ;;  %v868_v25 = vrot.slane %v608_v21, 1  ;;  %v2279_v8 = vld [vmem:[%s2743_s27 + $0x70] sm:$0xff]  }
  0x49   : > { %v732_v24 = vor.u32 %v731_v13, %v727_v1  ;;  %v326_v26 = vmul.f32 %v2240_v15, %v2735_v11  ;;  %v2917_v28 = vsel %vm2713_vm2, 0, %v489_v20  ;;  %v327_v30 = vmul.f32 %v2241_v18, %v2735_v11 }
  0x4a   : > { %v421_v29 = vpack.c.bf16 %v400_v16, %v399_v10  ;;  %v2252_v31 = vunpack.c.l.bf16 %v2277_v19  ;;  %v715_v33 = vshrl.u32 %v2917_v28, 16  ;;  %v717_v34 = vshll.u32 %v2917_v28, 16 }
  0x4b   : > { %v737_v32 = vsel %vm617_vm4, %v732_v24, %v736_v5  ;;  %v724_v36 = vrot.slane %v722_v17, 1  ;;  %v867_v39 = vrot.slane %v2917_v28, 1  ;;  %v365_v44 = vadd.f32 %v2753_v23, %v326_v26 }
  0x4c   : > { %935 = vrot.lane.b32.xlu0 %v863_v59, %s2671_s28  ;;  %909 = vrot.lane.b32.xlu1 %v737_v32, %s2672_s6  ;;  %v505_v40 = vshrl.u32 %v421_v29, 16  ;;  %v508_v42 = vshll.u32 %v421_v29, 16  ;;  %v719_v45 = vrot.slane %v717_v34, 1  ;;  %v366_v46 = vadd.f32 %v2753_v23, %v327_v30 }
  0x4d   : > { %v2253_v47 = vunpack.c.h.bf16 %v2277_v19  ;;  %v332_v48 = vmul.f32 %v2252_v31, %v2735_v11  ;;  %v397_v50 = vmax.f32 %v365_v44, 0.0  ;;  %v2248_v51 = vunpack.c.l.bf16 %v2276_v38 }
  0x4e   : > { %v507_v49 = vrot.slane %v505_v40, 7  ;;  %v720_v52 = vor.u32 %v719_v45, %v715_v33  ;;  %v398_v53 = vmax.f32 %v366_v46, 0.0  ;;  %v2249_v58 = vunpack.c.h.bf16 %v2276_v38 }
  0x4f   : > { %v333_v54 = vmul.f32 %v2253_v47, %v2735_v11  ;;  %v371_v55 = vadd.f32 %v2753_v23, %v332_v48  ;;  %v330_v59 = vmul.f32 %v2248_v51, %v2735_v11  ;;  %v869_v62 = vsel %vm842_vm3, %v867_v39, %v868_v25 }
  0x50   : > { %941 = vrot.lane.b32.xlu1 %v872_v22, %s2671_s28  ;;  %v510_v56 = vor.u32 %v508_v42, %v507_v49  ;;  %v611_v57 = vsel %vm2713_vm2, %v507_v49, 0  ;;  %v725_v61 = vsel %vm617_vm4, %v720_v52, %v724_v36  ;;  %v420_v0 = vpack.c.bf16 %v398_v53, %v397_v50 }
  0x51   : > { %v758_v63 = vshll.u32 %v611_v57, 16  ;;  %907 = vrot.lane.b32.xlu0 %v725_v61, %s2672_s6  ;;  %v372_v3 = vadd.f32 %v2753_v23, %v333_v54  ;;  %v403_v5 = vmax.f32 %v371_v55, 0.0  ;;  %v331_v7 = vmul.f32 %v2249_v58, %v2735_v11 }
  0x52   : > { %v2941_v1 = vsel %vm2713_vm2, 0, %v510_v56  ;;  %v498_v12 = vshrl.u32 %v420_v0, 16  ;;  %v877_v13 = vrot.slane %v611_v57, 1  ;;  %v501_v18 = vshll.u32 %v420_v0, 16 }
  0x53   : > { %v751_v9 = vshrl.u32 %v2941_v1, 16  ;;  %v753_v10 = vshll.u32 %v2941_v1, 16  ;;  %v760_v15 = vrot.slane %v758_v63, 1  ;;  %v404_v19 = vmax.f32 %v372_v3, 0.0 }
  0x54   : > { %v369_v20 = vadd.f32 %v2753_v23, %v330_v59  ;;  %v500_v22 = vrot.slane %v498_v12, 7  ;;  %v370_v16 = vadd.f32 %v2753_v23, %v331_v7  ;;  %v2260_v24 = vunpack.c.l.bf16 %v2279_v8 }
  0x55   : > { %v755_v21 = vrot.slane %v753_v10, 1  ;;  %939 = vrot.lane.b32.xlu0 %v869_v62, %s2671_s28  ;;  %v876_v17 = vrot.slane %v2941_v1, 1  ;;  %v423_v25 = vpack.c.bf16 %v404_v19, %v403_v5  ;;  %v2261_v29 = vunpack.c.h.bf16 %v2279_v8  ;;  %v2278_v62 = vld [vmem:[%s2743_s27 + $0x68] sm:$0xff]  }
  0x56   : > { %v401_v26 = vmax.f32 %v369_v20, 0.0  ;;  %v503_v31 = vor.u32 %v501_v18, %v500_v22  ;;  %v610_v32 = vsel %vm2713_vm2, %v500_v22, 0  ;;  %v402_v33 = vmax.f32 %v370_v16, 0.0  ;;  %v2657_v22 = vld [vmem:[%s3605_s3 + $0x8] ss:$0 sps:$4 sm:$0xff]  }
  0x57   : > { %v756_v30 = vor.u32 %v755_v21, %v751_v9  ;;  %v746_v34 = vshll.u32 %v610_v32, 16  ;;  %v519_v36 = vshrl.u32 %v423_v25, 16  ;;  %v522_v38 = vshll.u32 %v423_v25, 16  ;;  %2642 = vmatprep.subr.msk.bf16.mxu0 %vm1094_vm5, %v2657_v22 }
  0x58   : > { %v2957_v40 = vsel %vm2713_vm2, 0, %v503_v31  ;;  %v422_v42 = vpack.c.bf16 %v402_v33, %v401_v26  ;;  %v336_v44 = vmul.f32 %v2260_v24, %v2735_v11  ;;  %v878_v47 = vsel %vm842_vm3, %v876_v17, %v877_v13  ;;  %v2659_v26 = vld [vmem:[%s3605_s3 + $0x14] ss:$0 sps:$4 sm:$0xff]  }
  0x59   : > { %v761_v39 = vsel %vm617_vm4, %v756_v30, %v760_v15  ;;  %v739_v45 = vshrl.u32 %v2957_v40, 16  ;;  %v741_v46 = vshll.u32 %v2957_v40, 16  ;;  %v874_v48 = vrot.slane %v610_v32, 1  ;;  %2641 = vmatprep.subr.msk.bf16.mxu1 %vm1094_vm5, %v2659_v26 }
  0x5a   : > { %913 = vrot.lane.b32.xlu1 %v761_v39, %s2672_s6  ;;  %v521_v49 = vrot.slane %v519_v36, 7  ;;  %v512_v50 = vshrl.u32 %v422_v42, 16  ;;  %v515_v51 = vshll.u32 %v422_v42, 16  ;;  %v337_v52 = vmul.f32 %v2261_v29, %v2735_v11 }
  0x5b   : > { %v743_v53 = vrot.slane %v741_v46, 1  ;;  %v748_v54 = vrot.slane %v746_v34, 1  ;;  %v873_v55 = vrot.slane %v2957_v40, 1  ;;  %v375_v56 = vadd.f32 %v2753_v23, %v336_v44  ;;  %v3003_v46 = vld [vmem:[%s3605_s3 + $0x18] sm:$0xff]  }
  0x5c   : > { %v524_v57 = vor.u32 %v522_v38, %v521_v49  ;;  %v613_v58 = vsel %vm2713_vm2, %v521_v49, 0  ;;  %v514_v59 = vrot.slane %v512_v50, 7  ;;  %v376_v61 = vadd.f32 %v2753_v23, %v337_v52 }
  0x5d   : > { %v744_v63 = vor.u32 %v743_v53, %v739_v45  ;;  %v782_v0 = vshll.u32 %v613_v58, 16  ;;  %v407_v3 = vmax.f32 %v375_v56, 0.0  ;;  %v2256_v15 = vunpack.c.l.bf16 %v2278_v62  ;;  %v2280_v45 = vld [vmem:[%s2743_s27 + $0x78] sm:$0xff]  }
  0x5e   : > { %945 = vrot.lane.b32.xlu1 %v878_v47, %s2671_s28  ;;  %v2974_v5 = vsel %vm2713_vm2, 0, %v524_v57  ;;  %v517_v7 = vor.u32 %v515_v51, %v514_v59  ;;  %v612_v8 = vsel %vm2713_vm2, %v514_v59, 0  ;;  %v408_v9 = vmax.f32 %v376_v61, 0.0 }
  0x5f   : > { %v749_v10 = vsel %vm617_vm4, %v744_v63, %v748_v54  ;;  %v775_v12 = vshrl.u32 %v2974_v5, 16  ;;  %v777_v13 = vshll.u32 %v2974_v5, 16  ;;  %v875_v18 = vsel %vm842_vm3, %v873_v55, %v874_v48 }
  0x60   : > { %911 = vrot.lane.b32.xlu0 %v749_v10, %s2672_s6  ;;  %v2985_v19 = vsel %vm2713_vm2, 0, %v517_v7  ;;  %v770_v20 = vshll.u32 %v612_v8, 16  ;;  %v883_v21 = vrot.slane %v613_v58, 1  ;;  %v784_v24 = vrot.slane %v782_v0, 1 }
  0x61   : > { %v779_v16 = vrot.slane %v777_v13, 1  ;;  %v763_v17 = vshrl.u32 %v2985_v19, 16  ;;  %v765_v25 = vshll.u32 %v2985_v19, 16  ;;  %v882_v29 = vrot.slane %v2974_v5, 1 }
  0x62   : > { %v880_v30 = vrot.slane %v612_v8, 1  ;;  %v425_v31 = vpack.c.bf16 %v408_v9, %v407_v3  ;;  %v2257_v32 = vunpack.c.h.bf16 %v2278_v62  ;;  %v772_v36 = vrot.slane %v770_v20, 1 }
  0x63   : > { %v780_v33 = vor.u32 %v779_v16, %v775_v12  ;;  %v767_v34 = vrot.slane %v765_v25, 1  ;;  %v334_v38 = vmul.f32 %v2256_v15, %v2735_v11  ;;  %v879_v49 = vrot.slane %v2985_v19, 1 }
  0x64   : > { %943 = vrot.lane.b32.xlu0 %v875_v18, %s2671_s28  ;;  %v533_v39 = vshrl.u32 %v425_v31, 16  ;;  %v536_v42 = vshll.u32 %v425_v31, 16  ;;  %v335_v44 = vmul.f32 %v2257_v32, %v2735_v11  ;;  %v884_v51 = vsel %vm842_vm3, %v882_v29, %v883_v21 }
  0x65   : > { %v785_v47 = vsel %vm617_vm4, %v780_v33, %v784_v24  ;;  %v768_v48 = vor.u32 %v767_v34, %v763_v17  ;;  %v373_v50 = vadd.f32 %v2753_v23, %v334_v38  ;;  %v1271_v54 = vsel %vm1094_vm5, %v2657_v22, 0 }
  0x66   : > { %917 = vrot.lane.b32.xlu1 %v785_v47, %s2672_s6  ;;  %v535_v52 = vrot.slane %v533_v39, 7  ;;  %v374_v53 = vadd.f32 %v2753_v23, %v335_v44  ;;  %2444 = vmatpush3.bf16.msra.mxu0 %v1271_v54  ;;  %v2264_v57 = vunpack.c.l.bf16 %v2280_v45  ;;  %v2265_v58 = vunpack.c.h.bf16 %v2280_v45 }
  0x67   : > { %v773_v55 = vsel %vm617_vm4, %v768_v48, %v772_v36  ;;  %v405_v56 = vmax.f32 %v373_v50, 0.0  ;;  %v1096_v63 = vsel %vm1094_vm5, %v2659_v26, 0  ;;  %2477 = vmatprep.subr.bf16.mxu0 %v3003_v46  ;;  %v881_v0 = vsel %vm842_vm3, %v879_v49, %v880_v30 }
  0x68   : > { %915 = vrot.lane.b32.xlu0 %v773_v55, %s2672_s6  ;;  %v538_v59 = vor.u32 %v536_v42, %v535_v52  ;;  %v615_v61 = vsel %vm2713_vm2, %v535_v52, 0  ;;  %v406_v62 = vmax.f32 %v374_v53, 0.0  ;;  %v338_v7 = vmul.f32 %v2264_v57, %v2735_v11  ;;  %2408 = vmatpush3.bf16.msra.mxu1 %v1096_v63 }
  0x69   : > { %v806_v3 = vshll.u32 %v615_v61, 16  ;;  %v339_v8 = vmul.f32 %v2265_v58, %v2735_v11  ;;  %v889_v29 = vrot.slane %v615_v61, 1 }
  0x6a   : > { %949 = vrot.lane.b32.xlu1 %v884_v51, %s2671_s28  ;;  %v3026_v9 = vsel %vm2713_vm2, 0, %v538_v59  ;;  %v424_v10 = vpack.c.bf16 %v406_v62, %v405_v56  ;;  %v377_v20 = vadd.f32 %v2753_v23, %v338_v7 }
  0x6b   : > { %v799_v12 = vshrl.u32 %v3026_v9, 16  ;;  %v801_v13 = vshll.u32 %v3026_v9, 16  ;;  %v378_v11 = vadd.f32 %v2753_v23, %v339_v8  ;;  %v808_v22 = vrot.slane %v806_v3, 1 }
  0x6c   : > { %947 = vrot.lane.b32.xlu0 %v881_v0, %s2671_s28  ;;  %v526_v15 = vshrl.u32 %v424_v10, 16  ;;  %v529_v18 = vshll.u32 %v424_v10, 16  ;;  %v409_v24 = vmax.f32 %v377_v20, 0.0  ;;  %v888_v26 = vrot.slane %v3026_v9, 1 }
  0x6d   : > { %v803_v21 = vrot.slane %v801_v13, 1  ;;  %v410_v17 = vmax.f32 %v378_v11, 0.0  ;;  %v2661_v11 = vld [vmem:[%s3605_s3 + $0x20] ss:$0 sps:$4 sm:$0xff]  }
  0x6e   : > { %v528_v16 = vrot.slane %v526_v15, 7  ;;  %v890_v44 = vsel %vm842_vm3, %v888_v26, %v889_v29 }
  0x6f   : > { %v804_v25 = vor.u32 %v803_v21, %v799_v12  ;;  %v426_v32 = vpack.c.bf16 %v410_v17, %v409_v24 }
  0x70   : > { %v531_v30 = vor.u32 %v529_v18, %v528_v16  ;;  %v614_v31 = vsel %vm2713_vm2, %v528_v16, 0  ;;  %v1447_v16 = vsel %vm1094_vm5, %v2661_v11, 0 }
  0x71   : > { %v809_v33 = vsel %vm617_vm4, %v804_v25, %v808_v22  ;;  %v794_v34 = vshll.u32 %v614_v31, 16  ;;  %v540_v36 = vshrl.u32 %v426_v32, 16  ;;  %v543_v38 = vshll.u32 %v426_v32, 16 }
  0x72   : > { %921 = vrot.lane.b32.xlu1 %v809_v33, %s2672_s6  ;;  %v3040_v23 = vsel %vm2713_vm2, 0, %v531_v30  ;;  %v886_v53 = vrot.slane %v614_v31, 1 }
  0x73   : > { %v787_v39 = vshrl.u32 %v3040_v23, 16  ;;  %v789_v42 = vshll.u32 %v3040_v23, 16  ;;  %v542_v45 = vrot.slane %v540_v36, 7  ;;  %v796_v48 = vrot.slane %v794_v34, 1 }
  0x74   : > { %v885_v52 = vrot.slane %v3040_v23, 1 }
  0x75   : > { %v791_v47 = vrot.slane %v789_v42, 1  ;;  %v545_v49 = vor.u32 %v543_v38, %v542_v45  ;;  %v616_v50 = vsel %vm2713_vm2, %v542_v45, 0 }
  0x76   : > { %953 = vrot.lane.b32.xlu1 %v890_v44, %s2671_s28  ;;  %v1032_v54 = vshll.u32 %v616_v50, 16  ;;  %v1039_v56 = vrot.slane %v616_v50, 1  ;;  %v887_v62 = vsel %vm842_vm3, %v885_v52, %v886_v53 }
  0x77   : > { %v792_v51 = vor.u32 %v791_v47, %v787_v39  ;;  %v3051_v55 = vsel %vm2713_vm2, 0, %v545_v49 }
  0x78   : > { %v1025_v58 = vshrl.u32 %v3051_v55, 16  ;;  %v1027_v59 = vshll.u32 %v3051_v55, 16  ;;  %v1038_v61 = vrot.slane %v3051_v55, 1  ;;  %v1034_v0 = vrot.slane %v1032_v54, 1 }
  0x79   : > { %v797_v57 = vsel %vm617_vm4, %v792_v51, %v796_v48 }
  0x7a   : > { %919 = vrot.lane.b32.xlu0 %v797_v57, %s2672_s6  ;;  %v1029_v63 = vrot.slane %v1027_v59, 1  ;;  %v1040_v3 = vsel %vm842_vm3, %v1038_v61, %v1039_v56 }
  0x7b   : > { %1043 = vrot.lane.b32.xlu1 %v1040_v3, %s2671_s28 }
  0x7c   : > { %v1030_v2 = vor.u32 %v1029_v63, %v1025_v58 }
  0x7e   : > { %951 = vrot.lane.b32.xlu0 %v887_v62, %s2671_s28  ;;  %v1035_v7 = vsel %vm617_vm4, %v1030_v2, %v1034_v0  ;;  %v924_v10 = vpop.permute.xlu1 %923 }
  0x82   : > { %1041 = vrot.lane.b32.xlu0 %v1035_v7, %s2672_s6  ;;  %v892_v8 = vpop.permute.xlu0 %891 }
  0x83   : > { %v957_v12 = vsel %vm955_vm6, %v2722_v4, %v892_v8 }
  0x84   : > { %v3067_v13 = vsel %vm988_vm7, %v957_v12, %v924_v10 }
  0x85   : > { %2445 = vmatprep.mubr.msk.bf16.mxu0 %vm1061_vm8, %v3067_v13 }
  0x97   : > { %v926_v15 = vpop.permute.xlu1 %925 }
  0x9b   : > { %v894_v18 = vpop.permute.xlu0 %893 }
  0x9c   : > { %v959_v20 = vsel %vm955_vm6, %v2793_v27, %v894_v18 }
  0x9d   : > { %v898_v21 = vpop.permute.xlu1 %897  ;;  %v992_v22 = vsel %vm988_vm7, %v959_v20, %v926_v15 }
  0x9e   : > { %2409 = vmatprep.mubr.msk.bf16.mxu1 %vm1061_vm8, %v992_v22  ;;  %2446 = vmatmul.mubr.msk.bf16.vlgmr.msra.gmra.mrb[0].mxu0 %vm1061_vm8, %v992_v22  ;;  %v963_v27 = vsel %vm955_vm6, %v2802_v35, %v898_v21 }
  0x9f   : > { %v896_v4 = vpop.permute.xlu0 %895  ;;  %2478 = vmatpush3.bf16.msra.mxu0 %v3003_v46 }
  0xa0   : > { %2643 = vmatprep.subr.msk.bf16.mxu0 %vm1094_vm5, %v2661_v11  ;;  %v961_v17 = vsel %vm955_vm6, %v2806_v37, %v896_v4 }
  0xa1   : > { %v930_v24 = vpop.permute.xlu1 %929 }
  0xa2   : > { %v3090_v29 = vsel %vm988_vm7, %v963_v27, %v930_v24 }
  0xa3   : > { %v928_v25 = vpop.permute.xlu0 %927  ;;  %2480 = vmatpush3.bf16.msra.mxu0 %v1447_v16 }
  0xa4   : > { %v3087_v26 = vsel %vm988_vm7, %v961_v17, %v928_v25 }
  0xa5   : > { %2410 = vmatmul.mubr.msk.bf16.vlgmr.msra.gmra.mrb[0].mxu1 %vm1061_vm8, %v3087_v26  ;;  %2449 = vmatprep.mubr.msk.bf16.mxu0 %vm1061_vm8, %v3087_v26  ;;  %v902_v35 = vpop.permute.xlu1 %901 }
  0xa6   : > { %2413 = vmatprep.mubr.msk.bf16.mxu1 %vm1061_vm8, %v3090_v29  ;;  %2450 = vmatmul.mubr.msk.bf16.gmra.mrb[4].mxu0 %vm1061_vm8, %v3090_v29  ;;  %v967_v46 = vsel %vm955_vm6, %v2827_v6, %v902_v35 }
  0xa9   : > { %v934_v30 = vpop.permute.xlu1 %933 }
  0xaa   : > { %v3108_v34 = vsel %vm988_vm7, %v967_v46, %v934_v30 }
  0xac   : > { %v900_v37 = vpop.permute.xlu0 %899 }
  0xad   : > { %v965_v31 = vsel %vm955_vm6, %v2848_v41, %v900_v37  ;;  %v3608_v37 = vmov 1.0  }
  0xb0   : > { %v932_v32 = vpop.permute.xlu0 %931 }
  0xb1   : > { %v3105_v33 = vsel %vm988_vm7, %v965_v31, %v932_v32 }
  0xb2   : > { %2414 = vmatmul.mubr.msk.bf16.gmra.mrb[4].mxu1 %vm1061_vm8, %v3105_v33  ;;  %2453 = vmatprep.mubr.msk.bf16.mxu0 %vm1061_vm8, %v3105_v33 }
  0xb3   : > { %2417 = vmatprep.mubr.msk.bf16.mxu1 %vm1061_vm8, %v3108_v34  ;;  %2454 = vmatmul.mubr.msk.bf16.gmra.mrb[8].mxu0 %vm1061_vm8, %v3108_v34 }
  0xb4   : > { %v906_v6 = vpop.permute.xlu1 %905 }
  0xb5   : > { %v971_v38 = vsel %vm955_vm6, %v2871_v14, %v906_v6 }
  0xb8   : > { %v938_v36 = vpop.permute.xlu1 %937 }
  0xb9   : > { %v3126_v45 = vsel %vm988_vm7, %v971_v38, %v938_v36 }
  0xba   : > { %v904_v41 = vpop.permute.xlu0 %903 }
  0xbb   : > { %v969_v39 = vsel %vm955_vm6, %v2886_v43, %v904_v41 }
  0xbe   : > { %v936_v42 = vpop.permute.xlu0 %935  ;;  %v910_v47 = vpop.permute.xlu1 %909 }
  0xbf   : > { %v3123_v44 = vsel %vm988_vm7, %v969_v39, %v936_v42  ;;  %v975_v43 = vsel %vm955_vm6, %v2900_v60, %v910_v47 }
  0xc0   : > { %2418 = vmatmul.mubr.msk.bf16.gmra.mrb[8].mxu1 %vm1061_vm8, %v3123_v44  ;;  %2457 = vmatprep.mubr.msk.bf16.mxu0 %vm1061_vm8, %v3123_v44 }
  0xc1   : > { %2421 = vmatprep.mubr.msk.bf16.mxu1 %vm1061_vm8, %v3126_v45  ;;  %2458 = vmatmul.mubr.msk.bf16.gmra.mrb[12].mxu0 %vm1061_vm8, %v3126_v45 }
  0xc2   : > { %v942_v48 = vpop.permute.xlu1 %941 }
  0xc3   : > { %v908_v14 = vpop.permute.xlu0 %907  ;;  %v1008_v52 = vsel %vm988_vm7, %v975_v43, %v942_v48 }
  0xc4   : > { %v973_v49 = vsel %vm955_vm6, %v2917_v28, %v908_v14 }
  0xc7   : > { %v940_v50 = vpop.permute.xlu0 %939 }
  0xc8   : > { %v1006_v51 = vsel %vm988_vm7, %v973_v49, %v940_v50 }
  0xc9   : > { %2422 = vmatmul.mubr.msk.bf16.gmra.mrb[12].mxu1 %vm1061_vm8, %v1006_v51  ;;  %2461 = vmatprep.mubr.msk.bf16.mxu0 %vm1061_vm8, %v1006_v51 }
  0xca   : > { %2425 = vmatprep.mubr.msk.bf16.mxu1 %vm1061_vm8, %v1008_v52  ;;  %2462 = vmatmul.mubr.msk.bf16.gmra.mrb[16].mxu0 %vm1061_vm8, %v1008_v52 }
  0xcc   : > { %v914_v53 = vpop.permute.xlu1 %913 }
  0xcd   : > { %v979_v56 = vsel %vm955_vm6, %v2941_v1, %v914_v53 }
  0xd0   : > { %v946_v60 = vpop.permute.xlu1 %945 }
  0xd1   : > { %v1012_v59 = vsel %vm988_vm7, %v979_v56, %v946_v60 }
  0xd2   : > { %v912_v54 = vpop.permute.xlu0 %911 }
  0xd3   : > { %v977_v28 = vsel %vm955_vm6, %v2957_v40, %v912_v54 }
  0xd6   : > { %v944_v57 = vpop.permute.xlu0 %943 }
  0xd7   : > { %v1010_v58 = vsel %vm988_vm7, %v977_v28, %v944_v57 }
  0xd8   : > { %v918_v61 = vpop.permute.xlu1 %917  ;;  %2426 = vmatmul.mubr.msk.bf16.gmra.mrb[16].mxu1 %vm1061_vm8, %v1010_v58  ;;  %2465 = vmatprep.mubr.msk.bf16.mxu0 %vm1061_vm8, %v1010_v58 }
  0xd9   : > { %2429 = vmatprep.mubr.msk.bf16.mxu1 %vm1061_vm8, %v1012_v59  ;;  %2466 = vmatmul.mubr.msk.bf16.gmra.mrb[20].mxu0 %vm1061_vm8, %v1012_v59  ;;  %v983_v1 = vsel %vm955_vm6, %v2974_v5, %v918_v61 }
  0xda   : > { %v916_v62 = vpop.permute.xlu0 %915 }
  0xdb   : > { %v981_v40 = vsel %vm955_vm6, %v2985_v19, %v916_v62 }
  0xdc   : > { %v950_v63 = vpop.permute.xlu1 %949 }
  0xdd   : > { %v1016_v2 = vsel %vm988_vm7, %v983_v1, %v950_v63 }
  0xde   : > { %v948_v0 = vpop.permute.xlu0 %947 }
  0xdf   : > { %v1014_v3 = vsel %vm988_vm7, %v981_v40, %v948_v0 }
  0xe0   : > { %2430 = vmatmul.mubr.msk.bf16.gmra.mrb[20].mxu1 %vm1061_vm8, %v1014_v3  ;;  %2469 = vmatprep.mubr.msk.bf16.mxu0 %vm1061_vm8, %v1014_v3 }
  0xe1   : > { %2433 = vmatprep.mubr.msk.bf16.mxu1 %vm1061_vm8, %v1016_v2  ;;  %2470 = vmatmul.mubr.msk.bf16.gmra.mrb[24].mxu0 %vm1061_vm8, %v1016_v2 }
  0xe4   : > { %v922_v7 = vpop.permute.xlu1 %921 }
  0xe5   : > { %v987_v5 = vsel %vm955_vm6, %v3026_v9, %v922_v7 }
  0xe8   : > { %v954_v10 = vpop.permute.xlu1 %953 }
  0xe9   : > { %v1020_v18 = vsel %vm988_vm7, %v987_v5, %v954_v10 }
  0xec   : > { %v920_v8 = vpop.permute.xlu0 %919 }
  0xed   : > { %v985_v19 = vsel %vm955_vm6, %v3040_v23, %v920_v8  ;;  %v1044_v20 = vpop.permute.xlu1 %1043 }
  0xf0   : > { %v952_v12 = vpop.permute.xlu0 %951 }
  0xf1   : > { %v1018_v15 = vsel %vm988_vm7, %v985_v19, %v952_v12 }
  0xf2   : > { %2434 = vmatmul.mubr.msk.bf16.gmra.mrb[24].mxu1 %vm1061_vm8, %v1018_v15  ;;  %2473 = vmatprep.mubr.msk.bf16.mxu0 %vm1061_vm8, %v1018_v15 }
  0xf3   : > { %2437 = vmatprep.mubr.msk.bf16.mxu1 %vm1061_vm8, %v1020_v18  ;;  %2474 = vmatmul.mubr.msk.bf16.gmra.mrb[28].mxu0 %vm1061_vm8, %v1020_v18 }
  0xf4   : > { %2481 = vmatprep.mubr.msk.bf16.mxu0 %vm1061_vm8, %v3087_v26  ;;  %v1042_v9 = vpop.permute.xlu0 %1041 }
  0xf5   : > { %v1046_v23 = vsel %vm955_vm6, %v3051_v55, %v1042_v9 }
  0xf6   : > { %v1048_v11 = vsel %vm988_vm7, %v1046_v23, %v1044_v20 }
  0xfa   : > { %2438 = vmatmul.mubr.msk.bf16.gmra.mrb[28].mxu1 %vm1061_vm8, %v1048_v11 }
  0xfb   : > { %2482 = vmatmul.mubr.msk.bf16.vlgmr.msra.gmra.mrb[0].mxu0 %vm1061_vm8, %v3090_v29  ;;  %1867 = vmatprep.mubr.f32.mxu1 %v3608_v37 }
  0xfc   : > { %2485 = vmatprep.mubr.msk.bf16.mxu0 %vm1061_vm8, %v3105_v33 }
 0x103   : > { %2486 = vmatmul.mubr.msk.bf16.gmra.mrb[4].mxu0 %vm1061_vm8, %v3108_v34 }
 0x104   : > { %2489 = vmatprep.mubr.msk.bf16.mxu0 %vm1061_vm8, %v3123_v44 }
 0x10b   : > { %2490 = vmatmul.mubr.msk.bf16.gmra.mrb[8].mxu0 %vm1061_vm8, %v3126_v45 }
 0x10c   : > { %2493 = vmatprep.mubr.msk.bf16.mxu0 %vm1061_vm8, %v1006_v51 }
 0x113   : > { %2494 = vmatmul.mubr.msk.bf16.gmra.mrb[12].mxu0 %vm1061_vm8, %v1008_v52 }
 0x114   : > { %2497 = vmatprep.mubr.msk.bf16.mxu0 %vm1061_vm8, %v1010_v58 }
 0x11b   : > { %2498 = vmatmul.mubr.msk.bf16.gmra.mrb[16].mxu0 %vm1061_vm8, %v1012_v59 }
 0x11c   : > { %2501 = vmatprep.mubr.msk.bf16.mxu0 %vm1061_vm8, %v1014_v3 }
 0x123   : > { %2502 = vmatmul.mubr.msk.bf16.gmra.mrb[20].mxu0 %vm1061_vm8, %v1016_v2 }
 0x124   : > { %2505 = vmatprep.mubr.msk.bf16.mxu0 %vm1061_vm8, %v1018_v15 }
 0x12b   : > { %2506 = vmatmul.mubr.msk.bf16.gmra.mrb[24].mxu0 %vm1061_vm8, %v1020_v18 }
 0x12c   : > { %2509 = vmatprep.mubr.msk.bf16.mxu0 %vm1061_vm8, %v1048_v11 }
 0x133   : > { %2510 = vmatmul.mubr.msk.bf16.gmra.mrb[28].mxu0 %vm1061_vm8, %v3067_v13 }
 0x178   : > { %v2411_v55 = vpop.f32.mrb[0].mxu1 }
 0x179   : > { %v1132_v21 = vpop.f32.mrb[1].mxu1 }
 0x17a   : > { %v2412_v22 = vpop.f32.mrb[2].mxu1 }
 0x17b   : > { %v1135_v4 = vpop.f32.mrb[3].mxu1 }
 0x185   : > { %v2415_v16 = vpop.f32.mrb[4].mxu1 }
 0x186   : > { %v1148_v27 = vpop.f32.mrb[5].mxu1 }
 0x187   : > { %v2416_v24 = vpop.f32.mrb[6].mxu1 }
 0x188   : > { %v1151_v17 = vpop.f32.mrb[7].mxu1 }
 0x193   : > { %v3203_v25 = vpop.f32.mrb[8].mxu1 }
 0x194   : > { %v3205_v26 = vpop.f32.mrb[9].mxu1 }
 0x195   : > { %v3207_v29 = vpop.f32.mrb[10].mxu1 }
 0x196   : > { %v3209_v35 = vpop.f32.mrb[11].mxu1 }
 0x19c   : > { %v3212_v13 = vpop.f32.mrb[12].mxu1 }
 0x19d   : > { %v3214_v46 = vpop.f32.mrb[13].mxu1 }
 0x19e   : > { %v3216_v30 = vpop.f32.mrb[14].mxu1 }
 0x19f   : > { %v3218_v31 = vpop.f32.mrb[15].mxu1 }
 0x1ab   : > { %v3220_v32 = vpop.f32.mrb[16].mxu1 }
 0x1ac   : > { %v3222_v33 = vpop.f32.mrb[17].mxu1 }
 0x1ad   : > { %v3224_v34 = vpop.f32.mrb[18].mxu1 }
 0x1ae   : > { %v3226_v6 = vpop.f32.mrb[19].mxu1 }
 0x1b3   : > { %v3228_v41 = vpop.f32.mrb[20].mxu1 }
 0x1b4   : > { %v3230_v36 = vpop.f32.mrb[21].mxu1 }
 0x1b5   : > { %v3232_v38 = vpop.f32.mrb[22].mxu1 }
 0x1b6   : > { %v3234_v39 = vpop.f32.mrb[23].mxu1 }
 0x1c5   : > { %v3236_v42 = vpop.f32.mrb[24].mxu1 }
 0x1c6   : > { %v3238_v44 = vpop.f32.mrb[25].mxu1 }
 0x1c7   : > { %v3240_v45 = vpop.f32.mrb[26].mxu1 }
 0x1c8   : > { %v3242_v47 = vpop.f32.mrb[27].mxu1 }
 0x1cd   : > { %v3244_v14 = vpop.f32.mrb[28].mxu1 }
 0x1ce   : > { %v2483_v43 = vpop.f32.mrb[0].mxu0  ;;  %v3246_v48 = vpop.f32.mrb[29].mxu1 }
 0x1cf   : > { %v3248_v49 = vadd.f32 %v2483_v43, %v2411_v55  ;;  %v1483_v50 = vpop.f32.mrb[1].mxu0  ;;  %v3250_v51 = vpop.f32.mrb[30].mxu1 }
 0x1d0   : > { %v3259_v52 = vadd.f32 %v1483_v50, %v1132_v21  ;;  %v2484_v53 = vpop.f32.mrb[2].mxu0  ;;  %v3261_v54 = vpop.f32.mrb[31].mxu1 }
 0x1d1   : > { %v2172_v60 = vpack.c.bf16 %v3248_v49, %v3248_v49  ;;  %v3265_v56 = vadd.f32 %v2484_v53, %v2412_v22  ;;  %v1486_v28 = vpop.f32.mrb[3].mxu0  ;;  %v3275_v59 = vmul.f32 %v3248_v49, %v3248_v49 }
 0x1d2   : > { %v2170_v57 = vpack.c.bf16 %v3259_v52, %v3259_v52  ;;  %v3269_v58 = vadd.f32 %v1486_v28, %v1135_v4  ;;  %v3289_v63 = vmul.f32 %v3259_v52, %v3259_v52 }
 0x1d3   : > { %1773 = vst.msk [vmem:[%s3257_s21 + $0x8] sm:$0xf] %vm1770_vm9, %v2172_v60  ;;  %v2173_v61 = vpack.c.bf16 %v3265_v56, %v3265_v56  ;;  %v2519_v62 = vpack.c.bf16 %v3265_v56, %v3248_v49  ;;  %v3283_v1 = vmul.f32 %v3265_v56, %v3265_v56 }
 0x1d4   : > { %1771 = vst.msk [vmem:[%s3257_s21] sm:$0xf] %vm1770_vm9, %v2170_v57  ;;  %v2171_v40 = vpack.c.bf16 %v3269_v58, %v3269_v58  ;;  %v2515_v0 = vpack.c.bf16 %v3269_v58, %v3259_v52  ;;  %v3297_v3 = vmul.f32 %v3269_v58, %v3269_v58 }
 0x1d5   : > { %1774 = vst.msk [vmem:[%s3257_s21 + $0xc] sm:$0xf] %vm1770_vm9, %v2173_v61 }
 0x1d6   : > { %1772 = vst.msk [vmem:[%s3257_s21 + $0x4] sm:$0xf] %vm1770_vm9, %v2171_v40  ;;  %v2487_v8 = vpop.f32.mrb[4].mxu0 }
 0x1d7   : > { %v3307_v5 = vadd.f32 %v2487_v8, %v2415_v16  ;;  %v1499_v10 = vpop.f32.mrb[5].mxu0 }
 0x1d8   : > { %v3309_v19 = vadd.f32 %v1499_v10, %v1148_v27  ;;  %v2488_v12 = vpop.f32.mrb[6].mxu0 }
 0x1d9   : > { %v2176_v15 = vpack.c.bf16 %v3307_v5, %v3307_v5  ;;  %v3313_v18 = vadd.f32 %v2488_v12, %v2416_v24  ;;  %v1502_v9 = vpop.f32.mrb[7].mxu0  ;;  %v3323_v11 = vmul.f32 %v3307_v5, %v3307_v5 }
 0x1da   : > { %v2174_v20 = vpack.c.bf16 %v3309_v19, %v3309_v19  ;;  %v3317_v23 = vadd.f32 %v1502_v9, %v1151_v17  ;;  %v3337_v4 = vmul.f32 %v3309_v19, %v3309_v19 }
 0x1db   : > { %1777 = vst.msk [vmem:[%s3257_s21 + $0x18] sm:$0xf] %vm1770_vm9, %v2176_v15  ;;  %v2177_v55 = vpack.c.bf16 %v3313_v18, %v3313_v18  ;;  %v3331_v22 = vmul.f32 %v3313_v18, %v3313_v18 }
 0x1dc   : > { %1775 = vst.msk [vmem:[%s3257_s21 + $0x10] sm:$0xf] %vm1770_vm9, %v2174_v20  ;;  %v2175_v16 = vpack.c.bf16 %v3317_v23, %v3317_v23  ;;  %v2523_v27 = vpack.c.bf16 %v3317_v23, %v3309_v19  ;;  %v3345_v24 = vmul.f32 %v3317_v23, %v3317_v23  ;;  %v3612_v23 = vpack.c.bf16 %v3313_v18, %v3307_v5 }
 0x1dd   : > { %1778 = vst.msk [vmem:[%s3257_s21 + $0x1c] sm:$0xf] %vm1770_vm9, %v2177_v55 }
 0x1de   : > { %1776 = vst.msk [vmem:[%s3257_s21 + $0x14] sm:$0xf] %vm1770_vm9, %v2175_v16  ;;  %v2491_v50 = vpop.f32.mrb[8].mxu0 }
 0x1df   : > { %v3356_v53 = vadd.f32 %v2491_v50, %v3203_v25  ;;  %v1515_v60 = vpop.f32.mrb[9].mxu0 }
 0x1e0   : > { %v3359_v28 = vadd.f32 %v1515_v60, %v3205_v26  ;;  %v2492_v57 = vpop.f32.mrb[10].mxu0 }
 0x1e1   : > { %v2180_v61 = vpack.c.bf16 %v3356_v53, %v3356_v53  ;;  %v3364_v40 = vadd.f32 %v2492_v57, %v3207_v29  ;;  %v1518_v8 = vpop.f32.mrb[11].mxu0  ;;  %v3375_v26 = vmul.f32 %v3356_v53, %v3356_v53 }
 0x1e2   : > { %v2178_v10 = vpack.c.bf16 %v3359_v28, %v3359_v28  ;;  %v3369_v25 = vadd.f32 %v1518_v8, %v3209_v35  ;;  %v3389_v35 = vmul.f32 %v3359_v28, %v3359_v28 }
 0x1e3   : > { %1781 = vst.msk [vmem:[%s3257_s21 + $0x28] sm:$0xf] %vm1770_vm9, %v2180_v61  ;;  %v2181_v12 = vpack.c.bf16 %v3364_v40, %v3364_v40  ;;  %v3383_v15 = vmul.f32 %v3364_v40, %v3364_v40 }
 0x1e4   : > { %1779 = vst.msk [vmem:[%s3257_s21 + $0x20] sm:$0xf] %vm1770_vm9, %v2178_v10  ;;  %v2179_v9 = vpack.c.bf16 %v3369_v25, %v3369_v25  ;;  %v3397_v55 = vmul.f32 %v3369_v25, %v3369_v25  ;;  %v3613_v18 = vpack.c.bf16 %v3369_v25, %v3359_v28  ;;  %v3614_v25 = vpack.c.bf16 %v3364_v40, %v3356_v53 }
 0x1e5   : > { %1782 = vst.msk [vmem:[%s3257_s21 + $0x2c] sm:$0xf] %vm1770_vm9, %v2181_v12  ;;  %v3617_v40 = vmov 1.0  }
 0x1e6   : > { %1780 = vst.msk [vmem:[%s3257_s21 + $0x24] sm:$0xf] %vm1770_vm9, %v2179_v9  ;;  %v2495_v60 = vpop.f32.mrb[12].mxu0 }
 0x1e7   : > { %v3408_v57 = vadd.f32 %v2495_v60, %v3212_v13  ;;  %v1531_v61 = vpop.f32.mrb[13].mxu0 }
 0x1e8   : > { %v3411_v8 = vadd.f32 %v1531_v61, %v3214_v46  ;;  %v2496_v10 = vpop.f32.mrb[14].mxu0 }
 0x1e9   : > { %v2184_v12 = vpack.c.bf16 %v3408_v57, %v3408_v57  ;;  %v3416_v16 = vadd.f32 %v2496_v10, %v3216_v30  ;;  %v1534_v9 = vpop.f32.mrb[15].mxu0  ;;  %v3427_v46 = vmul.f32 %v3408_v57, %v3408_v57 }
 0x1ea   : > { %v2182_v50 = vpack.c.bf16 %v3411_v8, %v3411_v8  ;;  %v3421_v13 = vadd.f32 %v1534_v9, %v3218_v31  ;;  %v3441_v31 = vmul.f32 %v3411_v8, %v3411_v8 }
 0x1eb   : > { %1785 = vst.msk [vmem:[%s3257_s21 + $0x38] sm:$0xf] %vm1770_vm9, %v2184_v12  ;;  %v2185_v60 = vpack.c.bf16 %v3416_v16, %v3416_v16  ;;  %v3435_v61 = vmul.f32 %v3416_v16, %v3416_v16  ;;  %v3616_v53 = vpack.c.bf16 %v3416_v16, %v3408_v57  ;;  %v3619_v16 = vpack.c.bf16 %v3283_v1, %v3275_v59 }
 0x1ec   : > { %1783 = vst.msk [vmem:[%s3257_s21 + $0x30] sm:$0xf] %vm1770_vm9, %v2182_v50  ;;  %v2183_v10 = vpack.c.bf16 %v3421_v13, %v3421_v13  ;;  %v3449_v9 = vmul.f32 %v3421_v13, %v3421_v13  ;;  %v3620_v57 = vpack.c.bf16 %v3345_v24, %v3337_v4  ;;  %v3622_v59 = vpack.c.bf16 %v3397_v55, %v3389_v35 }
 0x1ed   : > { %1786 = vst.msk [vmem:[%s3257_s21 + $0x3c] sm:$0xf] %vm1770_vm9, %v2185_v60  ;;  %v3623_v1 = vpack.c.bf16 %v3383_v15, %v3375_v26 }
 0x1ee   : > { %1784 = vst.msk [vmem:[%s3257_s21 + $0x34] sm:$0xf] %vm1770_vm9, %v2183_v10  ;;  %v2499_v43 = vpop.f32.mrb[16].mxu0 }
 0x1ef   : > { %v2593_v2 = vadd.f32 %v2499_v43, %v3220_v32  ;;  %v1547_v7 = vpop.f32.mrb[17].mxu0 }
 0x1f0   : > { %v2594_v37 = vadd.f32 %v1547_v7, %v3222_v33  ;;  %v2500_v30 = vpop.f32.mrb[18].mxu0 }
 0x1f1   : > { %v2188_v12 = vpack.c.bf16 %v2593_v2, %v2593_v2  ;;  %v2595_v60 = vadd.f32 %v2500_v30, %v3224_v34  ;;  %v1550_v29 = vpop.f32.mrb[19].mxu0  ;;  %v3465_v17 = vmul.f32 %v2593_v2, %v2593_v2 }
 0x1f2   : > { %v2186_v50 = vpack.c.bf16 %v2594_v37, %v2594_v37  ;;  %v2596_v10 = vadd.f32 %v1550_v29, %v3226_v6  ;;  %v3471_v33 = vmul.f32 %v2594_v37, %v2594_v37 }
 0x1f3   : > { %1789 = vst.msk [vmem:[%s3257_s21 + $0x48] sm:$0xf] %vm1770_vm9, %v2188_v12  ;;  %v2189_v20 = vpack.c.bf16 %v2595_v60, %v2595_v60  ;;  %v3467_v21 = vmul.f32 %v2595_v60, %v2595_v60  ;;  %v2517_v32 = vpack.c.bf16 %v2595_v60, %v2593_v2 }
 0x1f4   : > { %1787 = vst.msk [vmem:[%s3257_s21 + $0x40] sm:$0xf] %vm1770_vm9, %v2186_v50  ;;  %v2187_v7 = vpack.c.bf16 %v2596_v10, %v2596_v10  ;;  %v3473_v43 = vmul.f32 %v2596_v10, %v2596_v10  ;;  %v2513_v34 = vpack.c.bf16 %v2596_v10, %v2594_v37 }
 0x1f5   : > { %1790 = vst.msk [vmem:[%s3257_s21 + $0x4c] sm:$0xf] %vm1770_vm9, %v2189_v20  ;;  %v2549_v6 = vpack.c.bf16 %v3467_v21, %v3465_v17 }
 0x1f6   : > { %1788 = vst.msk [vmem:[%s3257_s21 + $0x44] sm:$0xf] %vm1770_vm9, %v2187_v7  ;;  %v2503_v29 = vpop.f32.mrb[20].mxu0  ;;  %2514 = vmatprep.subr.bf16.mxu1 %v2513_v34  ;;  %v2545_v2 = vpack.c.bf16 %v3473_v43, %v3471_v33 }
 0x1f7   : > { %v2597_v30 = vadd.f32 %v2503_v29, %v3228_v41  ;;  %v1563_v12 = vpop.f32.mrb[21].mxu0  ;;  %2516 = vmatpush3.bf16.msra.mxu1 %v2515_v0 }
 0x1f8   : > { %v2598_v37 = vadd.f32 %v1563_v12, %v3230_v36  ;;  %v2504_v20 = vpop.f32.mrb[22].mxu0  ;;  %2518 = vmatprep.subr.bf16.mxu1 %v2517_v32 }
 0x1f9   : > { %v2192_v50 = vpack.c.bf16 %v2597_v30, %v2597_v30  ;;  %v2599_v60 = vadd.f32 %v2504_v20, %v3232_v38  ;;  %v1566_v10 = vpop.f32.mrb[23].mxu0  ;;  %v3492_v41 = vmul.f32 %v2597_v30, %v2597_v30 }
 0x1fa   : > { %v2190_v7 = vpack.c.bf16 %v2598_v37, %v2598_v37  ;;  %v2600_v34 = vadd.f32 %v1566_v10, %v3234_v39  ;;  %v3501_v38 = vmul.f32 %v2598_v37, %v2598_v37 }
 0x1fb   : > { %1793 = vst.msk [vmem:[%s3257_s21 + $0x58] sm:$0xf] %vm1770_vm9, %v2192_v50  ;;  %v2193_v52 = vpack.c.bf16 %v2599_v60, %v2599_v60  ;;  %v3494_v58 = vmul.f32 %v2599_v60, %v2599_v60  ;;  %2520 = vmatpush3.bf16.msra.mxu1 %v2519_v62  ;;  %v2525_v36 = vpack.c.bf16 %v2599_v60, %v2597_v30 }
 0x1fc   : > { %1791 = vst.msk [vmem:[%s3257_s21 + $0x50] sm:$0xf] %vm1770_vm9, %v2190_v7  ;;  %v2191_v0 = vpack.c.bf16 %v2600_v34, %v2600_v34  ;;  %v3503_v32 = vmul.f32 %v2600_v34, %v2600_v34  ;;  %v2521_v39 = vpack.c.bf16 %v2600_v34, %v2598_v37 }
 0x1fd   : > { %1794 = vst.msk [vmem:[%s3257_s21 + $0x5c] sm:$0xf] %vm1770_vm9, %v2193_v52  ;;  %v2557_v29 = vpack.c.bf16 %v3494_v58, %v3492_v41 }
 0x1fe   : > { %1792 = vst.msk [vmem:[%s3257_s21 + $0x54] sm:$0xf] %vm1770_vm9, %v2191_v0  ;;  %v2507_v12 = vpop.f32.mrb[24].mxu0  ;;  %2522 = vmatprep.subr.bf16.mxu1 %v2521_v39  ;;  %v2553_v49 = vpack.c.bf16 %v3503_v32, %v3501_v38 }
 0x1ff   : > { %v2601_v56 = vadd.f32 %v2507_v12, %v3236_v42  ;;  %v1579_v62 = vpop.f32.mrb[25].mxu0  ;;  %2524 = vmatpush3.bf16.msra.mxu1 %v2523_v27 }
 0x200   : > { %v2602_v30 = vadd.f32 %v1579_v62, %v3238_v44  ;;  %v2508_v37 = vpop.f32.mrb[26].mxu0  ;;  %2526 = vmatprep.subr.bf16.mxu1 %v2525_v36 }
 0x201   : > { %v2196_v20 = vpack.c.bf16 %v2601_v56, %v2601_v56  ;;  %v2603_v50 = vadd.f32 %v2508_v37, %v3240_v45  ;;  %v1582_v60 = vpop.f32.mrb[27].mxu0  ;;  %v1899_v42 = vmul.f32 %v2601_v56, %v2601_v56 }
 0x202   : > { %v2194_v10 = vpack.c.bf16 %v2602_v30, %v2602_v30  ;;  %v2604_v7 = vadd.f32 %v1582_v60, %v3242_v47  ;;  %v1897_v27 = vmul.f32 %v2602_v30, %v2602_v30 }
 0x203   : > { %1797 = vst.msk [vmem:[%s3257_s21 + $0x68] sm:$0xf] %vm1770_vm9, %v2196_v20  ;;  %v2197_v34 = vpack.c.bf16 %v2603_v50, %v2603_v50  ;;  %v1900_v19 = vmul.f32 %v2603_v50, %v2603_v50  ;;  %2528 = vmatpush3.bf16.msra.mxu1 %v3612_v23  ;;  %v2533_v44 = vpack.c.bf16 %v2603_v50, %v2601_v56 }
 0x204   : > { %1795 = vst.msk [vmem:[%s3257_s21 + $0x60] sm:$0xf] %vm1770_vm9, %v2194_v10  ;;  %v2195_v52 = vpack.c.bf16 %v2604_v7, %v2604_v7  ;;  %v1898_v45 = vmul.f32 %v2604_v7, %v2604_v7  ;;  %v2529_v36 = vpack.c.bf16 %v2604_v7, %v2602_v30  ;;  %v3615_v23 = vpack.c.bf16 %v3421_v13, %v3411_v8 }
 0x205   : > { %1798 = vst.msk [vmem:[%s3257_s21 + $0x6c] sm:$0xf] %vm1770_vm9, %v2197_v34  ;;  %v2565_v0 = vpack.c.bf16 %v1900_v19, %v1899_v42 }
 0x206   : > { %1796 = vst.msk [vmem:[%s3257_s21 + $0x64] sm:$0xf] %vm1770_vm9, %v2195_v52  ;;  %v2511_v47 = vpop.f32.mrb[28].mxu0  ;;  %2530 = vmatprep.subr.bf16.mxu1 %v2529_v36  ;;  %v2561_v39 = vpack.c.bf16 %v1898_v45, %v1897_v27 }
 0x207   : > { %v2605_v12 = vadd.f32 %v2511_v47, %v3244_v14  ;;  %v1595_v5 = vpop.f32.mrb[29].mxu0  ;;  %2532 = vmatpush3.bf16.msra.mxu1 %v3613_v18 }
 0x208   : > { %v2606_v56 = vadd.f32 %v1595_v5, %v3246_v48  ;;  %v2512_v62 = vpop.f32.mrb[30].mxu0  ;;  %2534 = vmatprep.subr.bf16.mxu1 %v2533_v44  ;;  %v3618_v44 = vpack.c.bf16 %v3297_v3, %v3289_v63  ;;  %v3621_v63 = vpack.c.bf16 %v3331_v22, %v3323_v11  ;;  %v3624_v3 = vpack.c.bf16 %v3449_v9, %v3441_v31 }
 0x209   : > { %v2200_v30 = vpack.c.bf16 %v2605_v12, %v2605_v12  ;;  %v2607_v37 = vadd.f32 %v2512_v62, %v3250_v51  ;;  %v1598_v20 = vpop.f32.mrb[31].mxu0  ;;  %v1903_v14 = vmul.f32 %v2605_v12, %v2605_v12  ;;  %v3625_v11 = vpack.c.bf16 %v3435_v61, %v3427_v46 }
 0x20a   : > { %v2198_v50 = vpack.c.bf16 %v2606_v56, %v2606_v56  ;;  %v2608_v60 = vadd.f32 %v1598_v20, %v3261_v54  ;;  %v1901_v7 = vmul.f32 %v2606_v56, %v2606_v56 }
 0x20b   : > { %1801 = vst.msk [vmem:[%s3257_s21 + $0x78] sm:$0xf] %vm1770_vm9, %v2200_v30  ;;  %v2201_v10 = vpack.c.bf16 %v2607_v37, %v2607_v37  ;;  %v1904_v28 = vmul.f32 %v2607_v37, %v2607_v37  ;;  %2536 = vmatpush3.bf16.msra.mxu1 %v3614_v25  ;;  %v2541_v48 = vpack.c.bf16 %v2607_v37, %v2605_v12 }
 0x20c   : > { %1799 = vst.msk [vmem:[%s3257_s21 + $0x70] sm:$0xf] %vm1770_vm9, %v2198_v50  ;;  %v2199_v42 = vpack.c.bf16 %v2608_v60, %v2608_v60  ;;  %v1902_v51 = vmul.f32 %v2608_v60, %v2608_v60  ;;  %v2537_v34 = vpack.c.bf16 %v2608_v60, %v2606_v56 }
 0x20d   : > { %1802 = vst.msk [vmem:[%s3257_s21 + $0x7c] sm:$0xf] %vm1770_vm9, %v2201_v10  ;;  %v2573_v19 = vpack.c.bf16 %v1904_v28, %v1903_v14 }
 0x20e   : > { %1800 = vst.msk [vmem:[%s3257_s21 + $0x74] sm:$0xf] %vm1770_vm9, %v2199_v42  ;;  %2538 = vmatprep.subr.bf16.mxu1 %v2537_v34  ;;  %v2569_v54 = vpack.c.bf16 %v1902_v51, %v1901_v7 }
 0x20f   : > { %2540 = vmatpush3.bf16.msra.mxu1 %v3615_v23 }
 0x210   : > { %2542 = vmatprep.subr.bf16.mxu1 %v2541_v48 }
 0x213   : > { %2544 = vmatpush3.bf16.msra.mxu1 %v3616_v53 }
 0x214   : > { %2546 = vmatprep.subr.bf16.mxu1 %v2545_v2 }
 0x216   : > { %1868 = vmatmul.mubr.f32.vlgmr.msra.gmra.mrb[32].mxu1 %v3617_v40 }
 0x217   : > { %2548 = vmatpush3.bf16.msra.mxu1 %v3618_v44  ;;  %1969 = vmatprep.mubr.f32.mxu1 %v3617_v40 }
 0x218   : > { %2550 = vmatprep.subr.bf16.mxu1 %v2549_v6 }
 0x21b   : > { %2552 = vmatpush3.bf16.msra.mxu1 %v3619_v16 }
 0x21c   : > { %2554 = vmatprep.subr.bf16.mxu1 %v2553_v49 }
 0x21f   : > { %2556 = vmatpush3.bf16.msra.mxu1 %v3620_v57 }
 0x220   : > { %2558 = vmatprep.subr.bf16.mxu1 %v2557_v29 }
 0x223   : > { %2560 = vmatpush3.bf16.msra.mxu1 %v3621_v63 }
 0x224   : > { %2562 = vmatprep.subr.bf16.mxu1 %v2561_v39 }
 0x227   : > { %2564 = vmatpush3.bf16.msra.mxu1 %v3622_v59 }
 0x228   : > { %2566 = vmatprep.subr.bf16.mxu1 %v2565_v0 }
 0x22b   : > { %2568 = vmatpush3.bf16.msra.mxu1 %v3623_v1 }
 0x22c   : > { %2570 = vmatprep.subr.bf16.mxu1 %v2569_v54 }
 0x22f   : > { %2572 = vmatpush3.bf16.msra.mxu1 %v3624_v3 }
 0x230   : > { %2574 = vmatprep.subr.bf16.mxu1 %v2573_v19 }
 0x233   : > { %2576 = vmatpush3.bf16.msra.mxu1 %v3625_v11 }
 0x236   : > { %1970 = vmatmul.mubr.f32.vlgmr.msra.gmra.mrb[34].mxu1 %v3617_v40 }
 0x2e9   : > { %v2367_v21 = vpop.f32.mrb[32].mxu1 }
 0x2ea   : > { %v2368_v22 = vpop.f32.mrb[33].mxu1 }
 0x2eb   : > { %v2369_v4 = vadd.f32 %v2368_v22, %v2367_v21 }
 0x309   : > { %v2402_v24 = vpop.f32.mrb[34].mxu1 }
 0x30a   : > { %v2403_v17 = vpop.f32.mrb[35].mxu1 }
 0x30b   : > { %v2404_v26 = vadd.f32 %v2403_v17, %v2402_v24 }
 0x30d   : > { %v1976_v15 = vrot.slane %v2404_v26, 7 }
 0x30f   : > { %v1979_v35 = vsel %vm580_vm0, %v2369_v4, %v1976_v15 }
 0x310   : > { %1981 = vst.msk [vmem:[%s235_s25] sm:$0x3] %vm1980_vm10, %v1979_v35 }
 0x311 PF: > { %s16_s18 = sadd.s32 1, %s2668_s18  }
 0x312   : > { %p13_p4 = scmp.ge.s32.totalorder %s16_s18, 4  }
 0x314   :  { %15 = sbr.rel (!%p13_p4) target bundleno = 1 (0x1), region = 78 }

</bundles_post_ra>
